<compile_context>
chip_gen: v7x
topology: tpu7x:2x2x1
jax: 0.10.0
libtpu: 0.0.40
codegen_flags: <defaults>
</compile_context>

<pallas_src>
import functools

import jax
import jax.numpy as jnp
from jax import lax
from jax.experimental import pallas as pl
from jax.experimental.pallas import tpu as pltpu
import numpy as np

EPS = 1e-5
LANE = 128


# ------------------------------ helpers -------------------------------------

def _round_up(x, m):
    return (x + m - 1) // m * m


def _pad_to(a, shape):
    pads = [(0, t - s) for s, t in zip(a.shape, shape)]
    if all(p == (0, 0) for p in pads):
        return a
    return jnp.pad(a, pads)


def _device_caps():
    """Per-generation tile caps / VMEM budget (v7x: 64 MiB VMEM, 2 TCs)."""
    try:
        kind = jax.devices()[0].device_kind.lower()
    except Exception:  # pragma: no cover
        kind = ""
    if "v7" in kind:
        return {"tm_cap": 512, "tk_cap": 512, "vmem_limit": 40 * 1024 * 1024}
    return {"tm_cap": 1024, "tk_cap": 512, "vmem_limit": 64 * 1024 * 1024}


def _choose_tile_m(m, cap):
    """Pad M to a multiple of 128 and pick the largest multiple-of-128 tile
    (<= cap) that divides it — MXU-row / packed-bf16 friendly."""
    mp = _round_up(m, 128)
    best, t = 128, 128
    while t <= min(cap, mp):
        if mp % t == 0:
            best = t
        t += 128
    return best, mp


def _choose_tile_k(kp, cap):
    for t in (512, 384, 256, 128):
        if t <= cap and kp % t == 0:
            return t
    return kp


# --------------- single-buffer (Buffered(1)) capability probe ---------------

_SB_CACHE = None


def _single_buffer_supported():
    """True iff BlockSpec(pipeline_mode=pl.Buffered(1)) builds, lowers, runs."""
    global _SB_CACHE
    if _SB_CACHE is not None:
        return _SB_CACHE
    try:
        def _probe(x_ref, o_ref):
            o_ref[...] = x_ref[...]

        fn = pl.pallas_call(
            _probe,
            out_shape=jax.ShapeDtypeStruct((8, 128), jnp.float32),
            grid=(1,),
            in_specs=[pl.BlockSpec((8, 128), lambda i: (0, 0),
                                   pipeline_mode=pl.Buffered(1))],
            out_specs=pl.BlockSpec((8, 128), lambda i: (0, 0)),
        )
        jax.block_until_ready(fn(jnp.zeros((8, 128), jnp.float32)))
        _SB_CACHE = True
    except Exception:
        _SB_CACHE = False
    return _SB_CACHE


def _const_spec(shape, index_map, single_buffer):
    """BlockSpec for a block whose index_map is constant across the grid:
    single-buffer it (VMEM footprint /2) when the feature is available."""
    if single_buffer:
        return pl.BlockSpec(shape, index_map, pipeline_mode=pl.Buffered(1))
    return pl.BlockSpec(shape, index_map)


# --------------------------- Pallas kernels ---------------------------------

def _matmul_bias_kernel(x_ref, w_ref, b_ref, o_ref, acc_ref, *, relu):
    """out = relu?(x @ w + bias); K-tiled with a resident f32 VMEM accumulator.
    (BN scale is already folded into w's columns.)"""
    @pl.when(pl.program_id(1) == 0)
    def _():
        acc_ref[...] = jnp.zeros_like(acc_ref)

    acc_ref[...] += jnp.dot(x_ref[...], w_ref[...],
                            preferred_element_type=jnp.float32)

    @pl.when(pl.program_id(1) == pl.num_programs(1) - 1)
    def _():
        out = acc_ref[...] + b_ref[...]
        if relu:
            out = jnp.maximum(out, 0.0)
        o_ref[...] = out.astype(o_ref.dtype)


def matmul_bias(x2d, w2d, bias, *, relu, out_dtype, caps, single_buffer):
    m, k = x2d.shape
    c = w2d.shape[1]
    tm, mp = _choose_tile_m(m, caps["tm_cap"])
    tk = _choose_tile_k(k, caps["tk_cap"])
    x2d = _pad_to(x2d, (mp, k))
    out_bytes = 2 if out_dtype == jnp.bfloat16 else 4
    out = pl.pallas_call(
        functools.partial(_matmul_bias_kernel, relu=relu),
        out_shape=jax.ShapeDtypeStruct((mp, c), out_dtype),
        grid_spec=pltpu.PrefetchScalarGridSpec(
            num_scalar_prefetch=0,
            grid=(mp // tm, k // tk),
            in_specs=[
                pl.BlockSpec((tm, tk), lambda i, kk: (i, kk)),
                pl.BlockSpec((tk, c), lambda i, kk: (kk, 0)),
                _const_spec((1, c), lambda i, kk: (0, 0), single_buffer),
            ],
            out_specs=pl.BlockSpec((tm, c), lambda i, kk: (i, 0)),
            scratch_shapes=[pltpu.VMEM((tm, c), jnp.float32)],
        ),
        compiler_params=pltpu.CompilerParams(
            dimension_semantics=("parallel", "arbitrary"),
            vmem_limit_bytes=caps["vmem_limit"]),
        cost_estimate=pl.CostEstimate(
            flops=2 * mp * k * c, transcendentals=0,
            bytes_accessed=(mp * k + k * c) * 2 + mp * c * out_bytes),
    )(x2d, w2d, bias)
    # padded-M rows hold relu(bias) — harmless ONLY because of this slice.
    return out[:m]


def _conv3x3_kernel(x_ref, w_ref, b_ref, o_ref, pad_ref, *, h, w, wp2, rows):
    """3x3 / pad-1 / stride-1 conv + bias + relu on one image.

    The zero-padded flattened slab ((h+3)*(w+2), C) is built in VMEM scratch
    (no HBM pad copy); the tap (kh, kw) for ALL output positions is then the
    contiguous row slice starting at kh*(w+2)+kw.  The 2 junk columns per
    output row are compacted in-kernel before the single (h*w, C) store."""
    c = w_ref.shape[-1]

    # Build the padded slab.  Zero every step: the image axis is "parallel"
    # (may be sharded across TensorCores), so a zero-once-at-step-0 scheme is
    # not safe; the memset is tiny relative to the 9 matmuls.
    pad_ref[...] = jnp.zeros_like(pad_ref)
    for r in range(h):
        dst = (r + 1) * wp2 + 1
        pad_ref[dst:dst + w, :] = x_ref[0, r * w:(r + 1) * w, :]

    # 9 taps = contiguous row slices; accumulate in f32.
    acc = jnp.zeros((rows, c), jnp.float32)
    for kh in range(3):
        for kw in range(3):
            start = kh * wp2 + kw
            tap = pad_ref[start:start + rows, :]
            acc = acc + jnp.dot(tap, w_ref[kh * 3 + kw],
                                preferred_element_type=jnp.float32)

    out = jnp.maximum(acc + b_ref[...], 0.0).astype(o_ref.dtype)

    # In-kernel compaction: drop the 2 junk columns per image row.
    for r in range(h):
        o_ref[0, r * w:(r + 1) * w, :] = out[r * wp2:r * wp2 + w, :]


def conv3x3_s1_bn_relu(x_flat, w9, bias, *, n, h, w, caps, single_buffer):
    """x_flat: (N, H*W, C) bf16; w9: (9, C, C) bf16 (BN scale folded);
    bias: (1, C) f32 -> (N*H*W, C) bf16, stride 1, pad 1."""
    c = x_flat.shape[-1]
    wp2 = w + 2
    rows = h * wp2                 # output rows incl. 2 junk cols per image row
    rows_in = (h + 3) * wp2        # padded slab (+1 safety row for tap bounds)
    out = pl.pallas_call(
        functools.partial(_conv3x3_kernel, h=h, w=w, wp2=wp2, rows=rows),
        out_shape=jax.ShapeDtypeStruct((n, h * w, c), jnp.bfloat16),
        grid_spec=pltpu.PrefetchScalarGridSpec(
            num_scalar_prefetch=0,
            grid=(n,),
            in_specs=[
                pl.BlockSpec((1, h * w, c), lambda i: (i, 0, 0)),
                _const_spec((9, c, c), lambda i: (0, 0, 0), single_buffer),
                _const_spec((1, c), lambda i: (0, 0), single_buffer),
            ],
            out_specs=pl.BlockSpec((1, h * w, c), lambda i: (i, 0, 0)),
            scratch_shapes=[pltpu.VMEM((rows_in, c), jnp.bfloat16)],
        ),
        compiler_params=pltpu.CompilerParams(
            dimension_semantics=("parallel",),
            vmem_limit_bytes=caps["vmem_limit"]),
        cost_estimate=pl.CostEstimate(
            flops=2 * n * rows * 9 * c * c, transcendentals=0,
            bytes_accessed=(2 * n * h * w * c + 9 * c * c) * 2 + c * 4),
    )(x_flat, w9, bias)
    return out.reshape(n * h * w, c)


def _conv3_shortcut_kernel(a_ref, w3_ref, x_ref, ws_ref, b_ref, o_ref):
    """o = relu(a@w3' + x@ws' + (b3+bs)): conv3+bn3 fused with the shortcut
    1x1-conv+bn and the residual add; BN scales already folded into weights,
    shortcut tensor never hits HBM.  bf16 output, f32 accumulation."""
    acc = jnp.dot(a_ref[...], w3_ref[...], preferred_element_type=jnp.float32)
    acc = acc + jnp.dot(x_ref[...], ws_ref[...],
                        preferred_element_type=jnp.float32)
    o_ref[...] = jnp.maximum(acc + b_ref[...], 0.0).astype(o_ref.dtype)


def conv3_plus_shortcut(a2d, w3, xs2d, ws, bias, *, caps, single_buffer):
    m, p = a2d.shape
    k = xs2d.shape[1]
    c = w3.shape[1]
    tm, mp = _choose_tile_m(m, caps["tm_cap"])
    a2d = _pad_to(a2d, (mp, p))
    xs2d = _pad_to(xs2d, (mp, k))
    out = pl.pallas_call(
        _conv3_shortcut_kernel,
        out_shape=jax.ShapeDtypeStruct((mp, c), jnp.bfloat16),
        grid_spec=pltpu.PrefetchScalarGridSpec(
            num_scalar_prefetch=0,
            grid=(mp // tm,),
            in_specs=[
                pl.BlockSpec((tm, p), lambda i: (i, 0)),
                _const_spec((p, c), lambda i: (0, 0), single_buffer),
                pl.BlockSpec((tm, k), lambda i: (i, 0)),
                _const_spec((k, c), lambda i: (0, 0), single_buffer),
                _const_spec((1, c), lambda i: (0, 0), single_buffer),
            ],
            out_specs=pl.BlockSpec((tm, c), lambda i: (i, 0)),
        ),
        compiler_params=pltpu.CompilerParams(
            dimension_semantics=("parallel",),
            vmem_limit_bytes=caps["vmem_limit"]),
        cost_estimate=pl.CostEstimate(
            flops=2 * mp * (p + k) * c, transcendentals=0,
            bytes_accessed=(mp * (p + k) + (p + k) * c + mp * c) * 2),
    )(a2d, w3, xs2d, ws, bias)
    return out[:m]


# --------------------------- stride>1 fallback -------------------------------

def im2col_3x3(x, stride, ho, wo):
    n, h, w, c = x.shape
    xp = jnp.pad(x, ((0, 0), (1, 1), (1, 1), (0, 0)))
    taps = []
    for kh in range(3):
        for kw in range(3):
            taps.append(xp[:, kh:kh + stride * (ho - 1) + 1:stride,
                           kw:kw + stride * (wo - 1) + 1:stride, :])
    return jnp.concatenate(taps, axis=-1).reshape(n * ho * wo, 9 * c)


# ------------------------------ forward --------------------------------------

def bottleneck_forward(x_nhwc, params, stride=1, single_buffer=False):
    """Eval-mode Bottleneck forward (NHWC); BatchNorm folded into the conv
    weights (scale) + bias.  Shortcut conv+bn is applied (in_planes != 4*planes
    as constructed).  Output is bf16 (f32 accumulation internally)."""
    caps = _device_caps()
    bf16 = jnp.bfloat16

    n, h, w, cin = x_nhwc.shape
    planes = params["w1"].shape[1]
    cout = params["w3"].shape[1]                       # 4 * planes
    kp, pp, cp = (_round_up(c, LANE) for c in (cin, planes, cout))

    # ---- fold BN (scale -> weight columns, shift -> bias), pad, cast once.
    def fold(wmat, bn, cols_pad):
        gamma, beta, mean, var = bn
        scale = gamma / jnp.sqrt(var + EPS)
        shift = beta - mean * scale
        w_scaled = wmat * scale[None, :]
        bias = _pad_to(shift.reshape(1, -1), (1, cols_pad)).astype(jnp.float32)
        return w_scaled, bias

    w1s, b1 = fold(params["w1"], params["bn1"], pp)
    w2s, b2 = fold(params["w2"], params["bn2"], pp)
    w3s, b3 = fold(params["w3"], params["bn3"], cp)
    wss, bs = fold(params["ws"], params["bns"], cp)

    w1 = _pad_to(w1s, (kp, pp)).astype(bf16)
    w2 = _pad_to(w2s.reshape(9, planes, planes), (9, pp, pp)).astype(bf16)
    w3 = _pad_to(w3s, (pp, cp)).astype(bf16)
    ws = _pad_to(wss, (kp, cp)).astype(bf16)
    b3s = b3 + bs                        # single bias for the fused epilogue

    xp = _pad_to(x_nhwc.astype(bf16), (n, h, w, kp))

    # ---- conv1 (1x1) + bn1 + relu : M/K-tiled matmul
    out1 = matmul_bias(xp.reshape(n * h * w, kp), w1, b1, relu=True,
                       out_dtype=bf16, caps=caps, single_buffer=single_buffer)

    # ---- conv2 (3x3, pad 1) + bn2 + relu
    if stride == 1:
        ho, wo = h, w
        out2 = conv3x3_s1_bn_relu(out1.reshape(n, h * w, pp), w2, b2,
                                  n=n, h=h, w=w, caps=caps,
                                  single_buffer=single_buffer)
    else:
        # TODO(synk): extend the in-kernel tap accumulation to strided conv;
        # for stride > 1 fall back to a tiled im2col matmul.
        ho = (h - 1) // stride + 1
        wo = (w - 1) // stride + 1
        cols = im2col_3x3(out1.reshape(n, h, w, pp), stride, ho, wo)
        out2 = matmul_bias(cols, w2.reshape(9 * pp, pp), b2, relu=True,
                           out_dtype=bf16, caps=caps,
                           single_buffer=single_buffer)

    # ---- conv3 (1x1) + bn3 + shortcut (1x1 conv + bn) + add + relu : fused
    xs = xp if stride == 1 else xp[:, ::stride, ::stride, :]
    out3 = conv3_plus_shortcut(out2, w3, xs.reshape(n * ho * wo, kp), ws, b3s,
                               caps=caps, single_buffer=single_buffer)
    return out3.reshape(n, ho, wo, cp)[..., :cout]


# --------------- pure-JAX reference (same folded-BN mixed precision) ---------

def ref_forward(x_nhwc, params, stride=1):
    bf16 = jnp.bfloat16

    def fold(wmat, bn):
        gamma, beta, mean, var = bn
        scale = gamma / jnp.sqrt(var + EPS)
        return (wmat * scale[None, :]).astype(bf16), beta - mean * scale

    def conv(x, w_hwio, strides, pad):
        return lax.conv_general_dilated(
            x.astype(bf16), w_hwio, strides, pad,
            dimension_numbers=("NHWC", "HWIO", "NHWC"),
            preferred_element_type=jnp.float32)

    cin = x_nhwc.shape[-1]
    planes = params["w1"].shape[1]
    w1, b1 = fold(params["w1"], params["bn1"])
    w2, b2 = fold(params["w2"], params["bn2"])
    w3, b3 = fold(params["w3"], params["bn3"])
    ws, bs = fold(params["ws"], params["bns"])

    out = jax.nn.relu(conv(x_nhwc, w1.reshape(1, 1, cin, planes),
                           (1, 1), "VALID") + b1).astype(bf16)
    out = jax.nn.relu(conv(out, w2.reshape(3, 3, planes, planes),
                           (stride, stride), ((1, 1), (1, 1))) + b2).astype(bf16)
    out = conv(out, w3.reshape(1, 1, planes, 4 * planes), (1, 1), "VALID") + b3
    short = conv(x_nhwc, ws.reshape(1, 1, cin, 4 * planes),
                 (stride, stride), "VALID") + bs
    return jax.nn.relu(out + short)


# --------------------------------- main ---------------------------------------

def make_params(key, in_planes, planes):
    expansion = 4
    ks = jax.random.split(key, 8)

    def bn_params(k, c):
        kg, kb, km, kv = jax.random.split(k, 4)
        gamma = jax.random.uniform(kg, (c,), jnp.float32, 0.5, 1.5)
        beta = jax.random.normal(kb, (c,), jnp.float32) * 0.1
        mean = jax.random.normal(km, (c,), jnp.float32) * 0.1
        var = jax.random.uniform(kv, (c,), jnp.float32, 0.5, 1.5)
        return gamma, beta, mean, var

    # weights stored in matmul layout: 1x1 -> (Cin, Cout); 3x3 -> (9*Cin, Cout)
    # with row order (kh, kw, cin).
    w1 = jax.random.normal(ks[0], (in_planes, planes), jnp.float32) * 0.1
    w2 = jax.random.normal(ks[1], (9 * planes, planes), jnp.float32) * 0.1
    w3 = jax.random.normal(ks[2], (planes, expansion * planes), jnp.float32) * 0.1
    ws = jax.random.normal(ks[3], (in_planes, expansion * planes), jnp.float32) * 0.1

    return {
        "w1": w1, "bn1": bn_params(ks[4], planes),
        "w2": w2, "bn2": bn_params(ks[5], planes),
        "w3": w3, "bn3": bn_params(ks[6], expansion * planes),
        "ws": ws, "bns": bn_params(ks[7], expansion * planes),
    }


if __name__ == "__main__":
    key = jax.random.PRNGKey(0)
    kx, kparam = jax.random.split(key)

    N, H, W = 2, 8, 8
    in_planes, planes, stride = 8, 4, 1   # shortcut conv active (8 != 16)

    x = jax.random.normal(kx, (N, H, W, in_planes), jnp.float32)
    params = make_params(kparam, in_planes, planes)

    single_buffer = _single_buffer_supported()   # probe Buffered(1) support

    fwd = jax.jit(bottleneck_forward, static_argnames=("stride", "single_buffer"))
    out = jax.block_until_ready(
        fwd(x, params, stride=stride, single_buffer=single_buffer))

    ref = jax.block_until_ready(ref_forward(x, params, stride=stride))
    # kernel emits bf16; quantize the f32 reference identically for comparison
    ref = np.asarray(ref.astype(jnp.bfloat16).astype(jnp.float32))
    np.testing.assert_allclose(np.asarray(out.astype(jnp.float32)), ref,
                               rtol=1e-2, atol=1e-2)

    print("KERNEL_OK")
</pallas_src>

<mosaic_0001>
module attributes {stable_mosaic.version = 11 : i64} {
  func.func @_probe(%arg0: i32, %arg1: memref<8x128xf32, #tpu.memory_space<vmem>>, %arg2: memref<8x128xf32, #tpu.memory_space<vmem>>) attributes {dimension_semantics = [#tpu.dimension_semantics<arbitrary>], iteration_bounds = array<i64: 1>, scalar_prefetch = 0 : i64, scratch_operands = 0 : i64, tpu.core_type = #tpu.core_type<tc>, window_params = [{pipeline_mode = #tpu.pipeline_mode<synchronous>, transform_indices = @transform_0, window_bounds = array<i64: 8, 128>}, {pipeline_mode = #tpu.pipeline_mode<synchronous>, transform_indices = @transform_1, window_bounds = array<i64: 8, 128>}]} {
    %c0 = arith.constant 0 : index
    %c0_0 = arith.constant 0 : index
    %0 = vector.load %arg1[%c0, %c0_0] : memref<8x128xf32, #tpu.memory_space<vmem>>, vector<8x128xf32>
    %c0_1 = arith.constant 0 : index
    %c0_2 = arith.constant 0 : index
    %1 = vector.load %arg2[%c0_1, %c0_2] : memref<8x128xf32, #tpu.memory_space<vmem>>, vector<8x128xf32>
    tpu.vector_store %arg2[%c0_1, %c0_2], %0 {strides = array<i32>} : memref<8x128xf32, #tpu.memory_space<vmem>>, vector<8x128xf32>,
    return
  }
  func.func @transform_0(%arg0: i32) -> (i32, i32) {
    %c0_i32 = arith.constant 0 : i32
    %c0_i32_0 = arith.constant 0 : i32
    %c0_i32_1 = arith.constant 0 : i32
    return %c0_i32, %c0_i32_0 : i32, i32
  }
  func.func @transform_1(%arg0: i32) -> (i32, i32) {
    %c0_i32 = arith.constant 0 : i32
    %c0_i32_0 = arith.constant 0 : i32
    %c0_i32_1 = arith.constant 0 : i32
    return %c0_i32, %c0_i32_0 : i32, i32
  }
}

module attributes {stable_mosaic.version = 11 : i64} {
  func.func @_matmul_bias_kernel(%arg0: i32, %arg1: i32, %arg2: memref<128x128xbf16, #tpu.memory_space<vmem>>, %arg3: memref<128x128xbf16, #tpu.memory_space<vmem>>, %arg4: memref<1x128xf32, #tpu.memory_space<vmem>>, %arg5: memref<128x128xbf16, #tpu.memory_space<vmem>>, %arg6: memref<128x128xf32, #tpu.memory_space<vmem>>) attributes {dimension_semantics = [#tpu.dimension_semantics<parallel>, #tpu.dimension_semantics<arbitrary>], iteration_bounds = array<i64: 1, 1>, scalar_prefetch = 0 : i64, scratch_operands = 1 : i64, tpu.core_type = #tpu.core_type<tc>, window_params = [{transform_indices = @transform_0, window_bounds = array<i64: 128, 128>}, {transform_indices = @transform_1, window_bounds = array<i64: 128, 128>}, {pipeline_mode = #tpu.pipeline_mode<synchronous>, transform_indices = @transform_2, window_bounds = array<i64: 1, 128>}, {transform_indices = @transform_3, window_bounds = array<i64: 128, 128>}]} {
    %c0_i32 = arith.constant 0 : i32
    %0 = arith.cmpi eq, %arg1, %c0_i32 : i32
    %1 = arith.extui %0 : i1 to i32
    %c0_i32_0 = arith.constant 0 : i32
    %2 = arith.cmpi ne, %1, %c0_i32_0 : i32
    scf.if %2 {
      %cst_10 = arith.constant 0.000000e+00 : f32
      %12 = vector.broadcast %cst_10 : f32 to vector<128x128xf32>
      %c0_11 = arith.constant 0 : index
      %c0_12 = arith.constant 0 : index
      %13 = vector.load %arg6[%c0_11, %c0_12] : memref<128x128xf32, #tpu.memory_space<vmem>>, vector<128x128xf32>
      tpu.vector_store %arg6[%c0_11, %c0_12], %12 {strides = array<i32>} : memref<128x128xf32, #tpu.memory_space<vmem>>, vector<128x128xf32>,
    } else {
    }
    %c0 = arith.constant 0 : index
    %c0_1 = arith.constant 0 : index
    %3 = vector.load %arg6[%c0, %c0_1] : memref<128x128xf32, #tpu.memory_space<vmem>>, vector<128x128xf32>
    %c0_2 = arith.constant 0 : index
    %c0_3 = arith.constant 0 : index
    %4 = vector.load %arg2[%c0_2, %c0_3] : memref<128x128xbf16, #tpu.memory_space<vmem>>, vector<128x128xbf16>
    %c0_4 = arith.constant 0 : index
    %c0_5 = arith.constant 0 : index
    %5 = vector.load %arg3[%c0_4, %c0_5] : memref<128x128xbf16, #tpu.memory_space<vmem>>, vector<128x128xbf16>
    %cst = arith.constant dense<0.000000e+00> : vector<128x128xf32>
    %6 = tpu.matmul %4, %5, %cst {dimension_numbers = #tpu.dot_dimension_numbers<[1], [0], [0], [1], [0, 0, 1, 1], [], []>} : vector<128x128xbf16>, vector<128x128xbf16>, vector<128x128xf32> -> vector<128x128xf32>
    %7 = arith.addf %3, %6 : vector<128x128xf32>
    %c0_6 = arith.constant 0 : index
    %c0_7 = arith.constant 0 : index
    %8 = vector.load %arg6[%c0_6, %c0_7] : memref<128x128xf32, #tpu.memory_space<vmem>>, vector<128x128xf32>
    tpu.vector_store %arg6[%c0_6, %c0_7], %7 {strides = array<i32>} : memref<128x128xf32, #tpu.memory_space<vmem>>, vector<128x128xf32>,
    %c0_i32_8 = arith.constant 0 : i32
    %9 = arith.cmpi eq, %arg1, %c0_i32_8 : i32
    %10 = arith.extui %9 : i1 to i32
    %c0_i32_9 = arith.constant 0 : i32
    %11 = arith.cmpi ne, %10, %c0_i32_9 : i32
    scf.if %11 {
      %c0_10 = arith.constant 0 : index
      %c0_11 = arith.constant 0 : index
      %12 = vector.load %arg6[%c0_10, %c0_11] : memref<128x128xf32, #tpu.memory_space<vmem>>, vector<128x128xf32>
      %c0_12 = arith.constant 0 : index
      %c0_13 = arith.constant 0 : index
      %13 = vector.load %arg4[%c0_12, %c0_13] : memref<1x128xf32, #tpu.memory_space<vmem>>, vector<1x128xf32>
      %14 = vector.broadcast %13 : vector<1x128xf32> to vector<128x128xf32>
      %15 = arith.addf %12, %14 : vector<128x128xf32>
      %cst_14 = arith.constant 0.000000e+00 : f32
      %16 = vector.broadcast %cst_14 : f32 to vector<128x128xf32>
      %17 = arith.maximumf %15, %16 : vector<128x128xf32>
      %18 = arith.truncf %17 : vector<128x128xf32> to vector<128x128xbf16>
      %c0_15 = arith.constant 0 : index
      %c0_16 = arith.constant 0 : index
      %19 = vector.load %arg5[%c0_15, %c0_16] : memref<128x128xbf16, #tpu.memory_space<vmem>>, vector<128x128xbf16>
      tpu.vector_store %arg5[%c0_15, %c0_16], %18 {strides = array<i32>} : memref<128x128xbf16, #tpu.memory_space<vmem>>, vector<128x128xbf16>,
    } else {
    }
    return
  }
  func.func @transform_0(%arg0: i32, %arg1: i32) -> (i32, i32) {
    %c0_i32 = arith.constant 0 : i32
    return %arg0, %arg1 : i32, i32
  }
  func.func @transform_1(%arg0: i32, %arg1: i32) -> (i32, i32) {
    %c0_i32 = arith.constant 0 : i32
    %c0_i32_0 = arith.constant 0 : i32
    return %arg1, %c0_i32 : i32, i32
  }
  func.func @transform_2(%arg0: i32, %arg1: i32) -> (i32, i32) {
    %c0_i32 = arith.constant 0 : i32
    %c0_i32_0 = arith.constant 0 : i32
    %c0_i32_1 = arith.constant 0 : i32
    return %c0_i32, %c0_i32_0 : i32, i32
  }
  func.func @transform_3(%arg0: i32, %arg1: i32) -> (i32, i32) {
    %c0_i32 = arith.constant 0 : i32
    %c0_i32_0 = arith.constant 0 : i32
    return %arg0, %c0_i32 : i32, i32
  }
}

module attributes {stable_mosaic.version = 11 : i64} {
  func.func @_conv3_shortcut_kernel(%arg0: i32, %arg1: memref<128x128xbf16, #tpu.memory_space<vmem>>, %arg2: memref<128x128xbf16, #tpu.memory_space<vmem>>, %arg3: memref<128x128xbf16, #tpu.memory_space<vmem>>, %arg4: memref<128x128xbf16, #tpu.memory_space<vmem>>, %arg5: memref<1x128xf32, #tpu.memory_space<vmem>>, %arg6: memref<128x128xbf16, #tpu.memory_space<vmem>>) attributes {dimension_semantics = [#tpu.dimension_semantics<parallel>], iteration_bounds = array<i64: 1>, scalar_prefetch = 0 : i64, scratch_operands = 0 : i64, tpu.core_type = #tpu.core_type<tc>, window_params = [{transform_indices = @transform_0, window_bounds = array<i64: 128, 128>}, {pipeline_mode = #tpu.pipeline_mode<synchronous>, transform_indices = @transform_1, window_bounds = array<i64: 128, 128>}, {transform_indices = @transform_2, window_bounds = array<i64: 128, 128>}, {pipeline_mode = #tpu.pipeline_mode<synchronous>, transform_indices = @transform_3, window_bounds = array<i64: 128, 128>}, {pipeline_mode = #tpu.pipeline_mode<synchronous>, transform_indices = @transform_4, window_bounds = array<i64: 1, 128>}, {transform_indices = @transform_5, window_bounds = array<i64: 128, 128>}]} {
    %c0 = arith.constant 0 : index
    %c0_0 = arith.constant 0 : index
    %0 = vector.load %arg1[%c0, %c0_0] : memref<128x128xbf16, #tpu.memory_space<vmem>>, vector<128x128xbf16>
    %c0_1 = arith.constant 0 : index
    %c0_2 = arith.constant 0 : index
    %1 = vector.load %arg2[%c0_1, %c0_2] : memref<128x128xbf16, #tpu.memory_space<vmem>>, vector<128x128xbf16>
    %cst = arith.constant dense<0.000000e+00> : vector<128x128xf32>
    %2 = tpu.matmul %0, %1, %cst {dimension_numbers = #tpu.dot_dimension_numbers<[1], [0], [0], [1], [0, 0, 1, 1], [], []>} : vector<128x128xbf16>, vector<128x128xbf16>, vector<128x128xf32> -> vector<128x128xf32>
    %c0_3 = arith.constant 0 : index
    %c0_4 = arith.constant 0 : index
    %3 = vector.load %arg3[%c0_3, %c0_4] : memref<128x128xbf16, #tpu.memory_space<vmem>>, vector<128x128xbf16>
    %c0_5 = arith.constant 0 : index
    %c0_6 = arith.constant 0 : index
    %4 = vector.load %arg4[%c0_5, %c0_6] : memref<128x128xbf16, #tpu.memory_space<vmem>>, vector<128x128xbf16>
    %cst_7 = arith.constant dense<0.000000e+00> : vector<128x128xf32>
    %5 = tpu.matmul %3, %4, %cst_7 {dimension_numbers = #tpu.dot_dimension_numbers<[1], [0], [0], [1], [0, 0, 1, 1], [], []>} : vector<128x128xbf16>, vector<128x128xbf16>, vector<128x128xf32> -> vector<128x128xf32>
    %6 = arith.addf %2, %5 : vector<128x128xf32>
    %c0_8 = arith.constant 0 : index
    %c0_9 = arith.constant 0 : index
    %7 = vector.load %arg5[%c0_8, %c0_9] : memref<1x128xf32, #tpu.memory_space<vmem>>, vector<1x128xf32>
    %8 = vector.broadcast %7 : vector<1x128xf32> to vector<128x128xf32>
    %9 = arith.addf %6, %8 : vector<128x128xf32>
    %cst_10 = arith.constant 0.000000e+00 : f32
    %10 = vector.broadcast %cst_10 : f32 to vector<128x128xf32>
    %11 = arith.maximumf %9, %10 : vector<128x128xf32>
    %12 = arith.truncf %11 : vector<128x128xf32> to vector<128x128xbf16>
    %c0_11 = arith.constant 0 : index
    %c0_12 = arith.constant 0 : index
    %13 = vector.load %arg6[%c0_11, %c0_12] : memref<128x128xbf16, #tpu.memory_space<vmem>>, vector<128x128xbf16>
    tpu.vector_store %arg6[%c0_11, %c0_12], %12 {strides = array<i32>} : memref<128x128xbf16, #tpu.memory_space<vmem>>, vector<128x128xbf16>,
    return
  }
  func.func @transform_0(%arg0: i32) -> (i32, i32) {
    %c0_i32 = arith.constant 0 : i32
    %c0_i32_0 = arith.constant 0 : i32
    return %arg0, %c0_i32 : i32, i32
  }
  func.func @transform_1(%arg0: i32) -> (i32, i32) {
    %c0_i32 = arith.constant 0 : i32
    %c0_i32_0 = arith.constant 0 : i32
    %c0_i32_1 = arith.constant 0 : i32
    return %c0_i32, %c0_i32_0 : i32, i32
  }
  func.func @transform_2(%arg0: i32) -> (i32, i32) {
    %c0_i32 = arith.constant 0 : i32
    %c0_i32_0 = arith.constant 0 : i32
    return %arg0, %c0_i32 : i32, i32
  }
  func.func @transform_3(%arg0: i32) -> (i32, i32) {
    %c0_i32 = arith.constant 0 : i32
    %c0_i32_0 = arith.constant 0 : i32
    %c0_i32_1 = arith.constant 0 : i32
    return %c0_i32, %c0_i32_0 : i32, i32
  }
  func.func @transform_4(%arg0: i32) -> (i32, i32) {
    %c0_i32 = arith.constant 0 : i32
    %c0_i32_0 = arith.constant 0 : i32
    %c0_i32_1 = arith.constant 0 : i32
    return %c0_i32, %c0_i32_0 : i32, i32
  }
  func.func @transform_5(%arg0: i32) -> (i32, i32) {
    %c0_i32 = arith.constant 0 : i32
    %c0_i32_0 = arith.constant 0 : i32
    return %arg0, %c0_i32 : i32, i32
  }
}

module attributes {stable_mosaic.version = 11 : i64} {
  func.func @_conv3x3_kernel(%arg0: i32, %arg1: memref<1x64x128xbf16, #tpu.memory_space<vmem>>, %arg2: memref<9x128x128xbf16, #tpu.memory_space<vmem>>, %arg3: memref<1x128xf32, #tpu.memory_space<vmem>>, %arg4: memref<1x64x128xbf16, #tpu.memory_space<vmem>>, %arg5: memref<110x128xbf16, #tpu.memory_space<vmem>>) attributes {dimension_semantics = [#tpu.dimension_semantics<parallel>], iteration_bounds = array<i64: 2>, scalar_prefetch = 0 : i64, scratch_operands = 1 : i64, tpu.core_type = #tpu.core_type<tc>, window_params = [{transform_indices = @transform_0, window_bounds = array<i64: 1, 64, 128>}, {pipeline_mode = #tpu.pipeline_mode<synchronous>, transform_indices = @transform_1, window_bounds = array<i64: 9, 128, 128>}, {pipeline_mode = #tpu.pipeline_mode<synchronous>, transform_indices = @transform_2, window_bounds = array<i64: 1, 128>}, {transform_indices = @transform_3, window_bounds = array<i64: 1, 64, 128>}]} {
    %cst = arith.constant 0.000000e+00 : bf16
    %0 = vector.broadcast %cst : bf16 to vector<110x128xbf16>
    %c0 = arith.constant 0 : index
    %c0_0 = arith.constant 0 : index
    %1 = vector.load %arg5[%c0, %c0_0] : memref<110x128xbf16, #tpu.memory_space<vmem>>, vector<110x128xbf16>
    tpu.vector_store %arg5[%c0, %c0_0], %0 {strides = array<i32>} : memref<110x128xbf16, #tpu.memory_space<vmem>>, vector<110x128xbf16>,
    %c0_1 = arith.constant 0 : index
    %c0_2 = arith.constant 0 : index
    %c0_3 = arith.constant 0 : index
    %2 = vector.load %arg1[%c0_1, %c0_2, %c0_3] : memref<1x64x128xbf16, #tpu.memory_space<vmem>>, vector<1x8x128xbf16>
    %3 = vector.shape_cast %2 : vector<1x8x128xbf16> to vector<8x128xbf16>
    %c11 = arith.constant 11 : index
    %c0_4 = arith.constant 0 : index
    %4 = vector.load %arg5[%c11, %c0_4] : memref<110x128xbf16, #tpu.memory_space<vmem>>, vector<8x128xbf16>
    tpu.vector_store %arg5[%c11, %c0_4], %3 {strides = array<i32>} : memref<110x128xbf16, #tpu.memory_space<vmem>>, vector<8x128xbf16>,
    %c0_5 = arith.constant 0 : index
    %c8 = arith.constant 8 : index
    %c0_6 = arith.constant 0 : index
    %5 = vector.load %arg1[%c0_5, %c8, %c0_6] : memref<1x64x128xbf16, #tpu.memory_space<vmem>>, vector<1x8x128xbf16>
    %6 = vector.shape_cast %5 : vector<1x8x128xbf16> to vector<8x128xbf16>
    %c21 = arith.constant 21 : index
    %c0_7 = arith.constant 0 : index
    %7 = vector.load %arg5[%c21, %c0_7] : memref<110x128xbf16, #tpu.memory_space<vmem>>, vector<8x128xbf16>
    tpu.vector_store %arg5[%c21, %c0_7], %6 {strides = array<i32>} : memref<110x128xbf16, #tpu.memory_space<vmem>>, vector<8x128xbf16>,
    %c0_8 = arith.constant 0 : index
    %c16 = arith.constant 16 : index
    %c0_9 = arith.constant 0 : index
    %8 = vector.load %arg1[%c0_8, %c16, %c0_9] : memref<1x64x128xbf16, #tpu.memory_space<vmem>>, vector<1x8x128xbf16>
    %9 = vector.shape_cast %8 : vector<1x8x128xbf16> to vector<8x128xbf16>
    %c31 = arith.constant 31 : index
    %c0_10 = arith.constant 0 : index
    %10 = vector.load %arg5[%c31, %c0_10] : memref<110x128xbf16, #tpu.memory_space<vmem>>, vector<8x128xbf16>
    tpu.vector_store %arg5[%c31, %c0_10], %9 {strides = array<i32>} : memref<110x128xbf16, #tpu.memory_space<vmem>>, vector<8x128xbf16>,
    %c0_11 = arith.constant 0 : index
    %c24 = arith.constant 24 : index
    %c0_12 = arith.constant 0 : index
    %11 = vector.load %arg1[%c0_11, %c24, %c0_12] : memref<1x64x128xbf16, #tpu.memory_space<vmem>>, vector<1x8x128xbf16>
    %12 = vector.shape_cast %11 : vector<1x8x128xbf16> to vector<8x128xbf16>
    %c41 = arith.constant 41 : index
    %c0_13 = arith.constant 0 : index
    %13 = vector.load %arg5[%c41, %c0_13] : memref<110x128xbf16, #tpu.memory_space<vmem>>, vector<8x128xbf16>
    tpu.vector_store %arg5[%c41, %c0_13], %12 {strides = array<i32>} : memref<110x128xbf16, #tpu.memory_space<vmem>>, vector<8x128xbf16>,
    %c0_14 = arith.constant 0 : index
    %c32 = arith.constant 32 : index
    %c0_15 = arith.constant 0 : index
    %14 = vector.load %arg1[%c0_14, %c32, %c0_15] : memref<1x64x128xbf16, #tpu.memory_space<vmem>>, vector<1x8x128xbf16>
    %15 = vector.shape_cast %14 : vector<1x8x128xbf16> to vector<8x128xbf16>
    %c51 = arith.constant 51 : index
    %c0_16 = arith.constant 0 : index
    %16 = vector.load %arg5[%c51, %c0_16] : memref<110x128xbf16, #tpu.memory_space<vmem>>, vector<8x128xbf16>
    tpu.vector_store %arg5[%c51, %c0_16], %15 {strides = array<i32>} : memref<110x128xbf16, #tpu.memory_space<vmem>>, vector<8x128xbf16>,
    %c0_17 = arith.constant 0 : index
    %c40 = arith.constant 40 : index
    %c0_18 = arith.constant 0 : index
    %17 = vector.load %arg1[%c0_17, %c40, %c0_18] : memref<1x64x128xbf16, #tpu.memory_space<vmem>>, vector<1x8x128xbf16>
    %18 = vector.shape_cast %17 : vector<1x8x128xbf16> to vector<8x128xbf16>
    %c61 = arith.constant 61 : index
    %c0_19 = arith.constant 0 : index
    %19 = vector.load %arg5[%c61, %c0_19] : memref<110x128xbf16, #tpu.memory_space<vmem>>, vector<8x128xbf16>
    tpu.vector_store %arg5[%c61, %c0_19], %18 {strides = array<i32>} : memref<110x128xbf16, #tpu.memory_space<vmem>>, vector<8x128xbf16>,
    %c0_20 = arith.constant 0 : index
    %c48 = arith.constant 48 : index
    %c0_21 = arith.constant 0 : index
    %20 = vector.load %arg1[%c0_20, %c48, %c0_21] : memref<1x64x128xbf16, #tpu.memory_space<vmem>>, vector<1x8x128xbf16>
    %21 = vector.shape_cast %20 : vector<1x8x128xbf16> to vector<8x128xbf16>
    %c71 = arith.constant 71 : index
    %c0_22 = arith.constant 0 : index
    %22 = vector.load %arg5[%c71, %c0_22] : memref<110x128xbf16, #tpu.memory_space<vmem>>, vector<8x128xbf16>
    tpu.vector_store %arg5[%c71, %c0_22], %21 {strides = array<i32>} : memref<110x128xbf16, #tpu.memory_space<vmem>>, vector<8x128xbf16>,
    %c0_23 = arith.constant 0 : index
    %c56 = arith.constant 56 : index
    %c0_24 = arith.constant 0 : index
    %23 = vector.load %arg1[%c0_23, %c56, %c0_24] : memref<1x64x128xbf16, #tpu.memory_space<vmem>>, vector<1x8x128xbf16>
    %24 = vector.shape_cast %23 : vector<1x8x128xbf16> to vector<8x128xbf16>
    %c81 = arith.constant 81 : index
    %c0_25 = arith.constant 0 : index
    %25 = vector.load %arg5[%c81, %c0_25] : memref<110x128xbf16, #tpu.memory_space<vmem>>, vector<8x128xbf16>
    tpu.vector_store %arg5[%c81, %c0_25], %24 {strides = array<i32>} : memref<110x128xbf16, #tpu.memory_space<vmem>>, vector<8x128xbf16>,
    %cst_26 = arith.constant 0.000000e+00 : f32
    %26 = vector.broadcast %cst_26 : f32 to vector<80x128xf32>
    %c0_27 = arith.constant 0 : index
    %c0_28 = arith.constant 0 : index
    %27 = vector.load %arg5[%c0_27, %c0_28] : memref<110x128xbf16, #tpu.memory_space<vmem>>, vector<80x128xbf16>
    %c0_29 = arith.constant 0 : index
    %c0_30 = arith.constant 0 : index
    %c0_31 = arith.constant 0 : index
    %28 = vector.load %arg2[%c0_29, %c0_30, %c0_31] : memref<9x128x128xbf16, #tpu.memory_space<vmem>>, vector<1x128x128xbf16>
    %29 = vector.shape_cast %28 : vector<1x128x128xbf16> to vector<128x128xbf16>
    %cst_32 = arith.constant dense<0.000000e+00> : vector<80x128xf32>
    %30 = tpu.matmul %27, %29, %cst_32 {dimension_numbers = #tpu.dot_dimension_numbers<[1], [0], [0], [1], [0, 0, 1, 1], [], []>} : vector<80x128xbf16>, vector<128x128xbf16>, vector<80x128xf32> -> vector<80x128xf32>
    %31 = arith.addf %26, %30 : vector<80x128xf32>
    %c1 = arith.constant 1 : index
    %c0_33 = arith.constant 0 : index
    %32 = vector.load %arg5[%c1, %c0_33] : memref<110x128xbf16, #tpu.memory_space<vmem>>, vector<80x128xbf16>
    %c1_34 = arith.constant 1 : index
    %c0_35 = arith.constant 0 : index
    %c0_36 = arith.constant 0 : index
    %33 = vector.load %arg2[%c1_34, %c0_35, %c0_36] : memref<9x128x128xbf16, #tpu.memory_space<vmem>>, vector<1x128x128xbf16>
    %34 = vector.shape_cast %33 : vector<1x128x128xbf16> to vector<128x128xbf16>
    %cst_37 = arith.constant dense<0.000000e+00> : vector<80x128xf32>
    %35 = tpu.matmul %32, %34, %cst_37 {dimension_numbers = #tpu.dot_dimension_numbers<[1], [0], [0], [1], [0, 0, 1, 1], [], []>} : vector<80x128xbf16>, vector<128x128xbf16>, vector<80x128xf32> -> vector<80x128xf32>
    %36 = arith.addf %31, %35 : vector<80x128xf32>
    %c2 = arith.constant 2 : index
    %c0_38 = arith.constant 0 : index
    %37 = vector.load %arg5[%c2, %c0_38] : memref<110x128xbf16, #tpu.memory_space<vmem>>, vector<80x128xbf16>
    %c2_39 = arith.constant 2 : index
    %c0_40 = arith.constant 0 : index
    %c0_41 = arith.constant 0 : index
    %38 = vector.load %arg2[%c2_39, %c0_40, %c0_41] : memref<9x128x128xbf16, #tpu.memory_space<vmem>>, vector<1x128x128xbf16>
    %39 = vector.shape_cast %38 : vector<1x128x128xbf16> to vector<128x128xbf16>
    %cst_42 = arith.constant dense<0.000000e+00> : vector<80x128xf32>
    %40 = tpu.matmul %37, %39, %cst_42 {dimension_numbers = #tpu.dot_dimension_numbers<[1], [0], [0], [1], [0, 0, 1, 1], [], []>} : vector<80x128xbf16>, vector<128x128xbf16>, vector<80x128xf32> -> vector<80x128xf32>
    %41 = arith.addf %36, %40 : vector<80x128xf32>
    %c10 = arith.constant 10 : index
    %c0_43 = arith.constant 0 : index
    %42 = vector.load %arg5[%c10, %c0_43] : memref<110x128xbf16, #tpu.memory_space<vmem>>, vector<80x128xbf16>
    %c3 = arith.constant 3 : index
    %c0_44 = arith.constant 0 : index
    %c0_45 = arith.constant 0 : index
    %43 = vector.load %arg2[%c3, %c0_44, %c0_45] : memref<9x128x128xbf16, #tpu.memory_space<vmem>>, vector<1x128x128xbf16>
    %44 = vector.shape_cast %43 : vector<1x128x128xbf16> to vector<128x128xbf16>
    %cst_46 = arith.constant dense<0.000000e+00> : vector<80x128xf32>
    %45 = tpu.matmul %42, %44, %cst_46 {dimension_numbers = #tpu.dot_dimension_numbers<[1], [0], [0], [1], [0, 0, 1, 1], [], []>} : vector<80x128xbf16>, vector<128x128xbf16>, vector<80x128xf32> -> vector<80x128xf32>
    %46 = arith.addf %41, %45 : vector<80x128xf32>
    %c11_47 = arith.constant 11 : index
    %c0_48 = arith.constant 0 : index
    %47 = vector.load %arg5[%c11_47, %c0_48] : memref<110x128xbf16, #tpu.memory_space<vmem>>, vector<80x128xbf16>
    %c4 = arith.constant 4 : index
    %c0_49 = arith.constant 0 : index
    %c0_50 = arith.constant 0 : index
    %48 = vector.load %arg2[%c4, %c0_49, %c0_50] : memref<9x128x128xbf16, #tpu.memory_space<vmem>>, vector<1x128x128xbf16>
    %49 = vector.shape_cast %48 : vector<1x128x128xbf16> to vector<128x128xbf16>
    %cst_51 = arith.constant dense<0.000000e+00> : vector<80x128xf32>
    %50 = tpu.matmul %47, %49, %cst_51 {dimension_numbers = #tpu.dot_dimension_numbers<[1], [0], [0], [1], [0, 0, 1, 1], [], []>} : vector<80x128xbf16>, vector<128x128xbf16>, vector<80x128xf32> -> vector<80x128xf32>
    %51 = arith.addf %46, %50 : vector<80x128xf32>
    %c12 = arith.constant 12 : index
    %c0_52 = arith.constant 0 : index
    %52 = vector.load %arg5[%c12, %c0_52] : memref<110x128xbf16, #tpu.memory_space<vmem>>, vector<80x128xbf16>
    %c5 = arith.constant 5 : index
    %c0_53 = arith.constant 0 : index
    %c0_54 = arith.constant 0 : index
    %53 = vector.load %arg2[%c5, %c0_53, %c0_54] : memref<9x128x128xbf16, #tpu.memory_space<vmem>>, vector<1x128x128xbf16>
    %54 = vector.shape_cast %53 : vector<1x128x128xbf16> to vector<128x128xbf16>
    %cst_55 = arith.constant dense<0.000000e+00> : vector<80x128xf32>
    %55 = tpu.matmul %52, %54, %cst_55 {dimension_numbers = #tpu.dot_dimension_numbers<[1], [0], [0], [1], [0, 0, 1, 1], [], []>} : vector<80x128xbf16>, vector<128x128xbf16>, vector<80x128xf32> -> vector<80x128xf32>
    %56 = arith.addf %51, %55 : vector<80x128xf32>
    %c20 = arith.constant 20 : index
    %c0_56 = arith.constant 0 : index
    %57 = vector.load %arg5[%c20, %c0_56] : memref<110x128xbf16, #tpu.memory_space<vmem>>, vector<80x128xbf16>
    %c6 = arith.constant 6 : index
    %c0_57 = arith.constant 0 : index
    %c0_58 = arith.constant 0 : index
    %58 = vector.load %arg2[%c6, %c0_57, %c0_58] : memref<9x128x128xbf16, #tpu.memory_space<vmem>>, vector<1x128x128xbf16>
    %59 = vector.shape_cast %58 : vector<1x128x128xbf16> to vector<128x128xbf16>
    %cst_59 = arith.constant dense<0.000000e+00> : vector<80x128xf32>
    %60 = tpu.matmul %57, %59, %cst_59 {dimension_numbers = #tpu.dot_dimension_numbers<[1], [0], [0], [1], [0, 0, 1, 1], [], []>} : vector<80x128xbf16>, vector<128x128xbf16>, vector<80x128xf32> -> vector<80x128xf32>
    %61 = arith.addf %56, %60 : vector<80x128xf32>
    %c21_60 = arith.constant 21 : index
    %c0_61 = arith.constant 0 : index
    %62 = vector.load %arg5[%c21_60, %c0_61] : memref<110x128xbf16, #tpu.memory_space<vmem>>, vector<80x128xbf16>
    %c7 = arith.constant 7 : index
    %c0_62 = arith.constant 0 : index
    %c0_63 = arith.constant 0 : index
    %63 = vector.load %arg2[%c7, %c0_62, %c0_63] : memref<9x128x128xbf16, #tpu.memory_space<vmem>>, vector<1x128x128xbf16>
    %64 = vector.shape_cast %63 : vector<1x128x128xbf16> to vector<128x128xbf16>
    %cst_64 = arith.constant dense<0.000000e+00> : vector<80x128xf32>
    %65 = tpu.matmul %62, %64, %cst_64 {dimension_numbers = #tpu.dot_dimension_numbers<[1], [0], [0], [1], [0, 0, 1, 1], [], []>} : vector<80x128xbf16>, vector<128x128xbf16>, vector<80x128xf32> -> vector<80x128xf32>
    %66 = arith.addf %61, %65 : vector<80x128xf32>
    %c22 = arith.constant 22 : index
    %c0_65 = arith.constant 0 : index
    %67 = vector.load %arg5[%c22, %c0_65] : memref<110x128xbf16, #tpu.memory_space<vmem>>, vector<80x128xbf16>
    %c8_66 = arith.constant 8 : index
    %c0_67 = arith.constant 0 : index
    %c0_68 = arith.constant 0 : index
    %68 = vector.load %arg2[%c8_66, %c0_67, %c0_68] : memref<9x128x128xbf16, #tpu.memory_space<vmem>>, vector<1x128x128xbf16>
    %69 = vector.shape_cast %68 : vector<1x128x128xbf16> to vector<128x128xbf16>
    %cst_69 = arith.constant dense<0.000000e+00> : vector<80x128xf32>
    %70 = tpu.matmul %67, %69, %cst_69 {dimension_numbers = #tpu.dot_dimension_numbers<[1], [0], [0], [1], [0, 0, 1, 1], [], []>} : vector<80x128xbf16>, vector<128x128xbf16>, vector<80x128xf32> -> vector<80x128xf32>
    %71 = arith.addf %66, %70 : vector<80x128xf32>
    %c0_70 = arith.constant 0 : index
    %c0_71 = arith.constant 0 : index
    %72 = vector.load %arg3[%c0_70, %c0_71] : memref<1x128xf32, #tpu.memory_space<vmem>>, vector<1x128xf32>
    %73 = vector.broadcast %72 : vector<1x128xf32> to vector<80x128xf32>
    %74 = arith.addf %71, %73 : vector<80x128xf32>
    %cst_72 = arith.constant 0.000000e+00 : f32
    %75 = vector.broadcast %cst_72 : f32 to vector<80x128xf32>
    %76 = arith.maximumf %74, %75 : vector<80x128xf32>
    %77 = arith.truncf %76 : vector<80x128xf32> to vector<80x128xbf16>
    %78 = vector.extract_strided_slice %77 {offsets = [0, 0], sizes = [8, 128], strides = [1, 1]} : vector<80x128xbf16> to vector<8x128xbf16>
    %c0_73 = arith.constant 0 : index
    %c0_74 = arith.constant 0 : index
    %c0_75 = arith.constant 0 : index
    %79 = vector.load %arg4[%c0_73, %c0_74, %c0_75] : memref<1x64x128xbf16, #tpu.memory_space<vmem>>, vector<1x8x128xbf16>
    %80 = vector.shape_cast %79 : vector<1x8x128xbf16> to vector<8x128xbf16>
    %81 = vector.shape_cast %78 : vector<8x128xbf16> to vector<1x8x128xbf16>
    tpu.vector_store %arg4[%c0_73, %c0_74, %c0_75], %81 {strides = array<i32>} : memref<1x64x128xbf16, #tpu.memory_space<vmem>>, vector<1x8x128xbf16>,
    %82 = vector.extract_strided_slice %77 {offsets = [10, 0], sizes = [8, 128], strides = [1, 1]} : vector<80x128xbf16> to vector<8x128xbf16>
    %c0_76 = arith.constant 0 : index
    %c8_77 = arith.constant 8 : index
    %c0_78 = arith.constant 0 : index
    %83 = vector.load %arg4[%c0_76, %c8_77, %c0_78] : memref<1x64x128xbf16, #tpu.memory_space<vmem>>, vector<1x8x128xbf16>
    %84 = vector.shape_cast %83 : vector<1x8x128xbf16> to vector<8x128xbf16>
    %85 = vector.shape_cast %82 : vector<8x128xbf16> to vector<1x8x128xbf16>
    tpu.vector_store %arg4[%c0_76, %c8_77, %c0_78], %85 {strides = array<i32>} : memref<1x64x128xbf16, #tpu.memory_space<vmem>>, vector<1x8x128xbf16>,
    %86 = vector.extract_strided_slice %77 {offsets = [20, 0], sizes = [8, 128], strides = [1, 1]} : vector<80x128xbf16> to vector<8x128xbf16>
    %c0_79 = arith.constant 0 : index
    %c16_80 = arith.constant 16 : index
    %c0_81 = arith.constant 0 : index
    %87 = vector.load %arg4[%c0_79, %c16_80, %c0_81] : memref<1x64x128xbf16, #tpu.memory_space<vmem>>, vector<1x8x128xbf16>
    %88 = vector.shape_cast %87 : vector<1x8x128xbf16> to vector<8x128xbf16>
    %89 = vector.shape_cast %86 : vector<8x128xbf16> to vector<1x8x128xbf16>
    tpu.vector_store %arg4[%c0_79, %c16_80, %c0_81], %89 {strides = array<i32>} : memref<1x64x128xbf16, #tpu.memory_space<vmem>>, vector<1x8x128xbf16>,
    %90 = vector.extract_strided_slice %77 {offsets = [30, 0], sizes = [8, 128], strides = [1, 1]} : vector<80x128xbf16> to vector<8x128xbf16>
    %c0_82 = arith.constant 0 : index
    %c24_83 = arith.constant 24 : index
    %c0_84 = arith.constant 0 : index
    %91 = vector.load %arg4[%c0_82, %c24_83, %c0_84] : memref<1x64x128xbf16, #tpu.memory_space<vmem>>, vector<1x8x128xbf16>
    %92 = vector.shape_cast %91 : vector<1x8x128xbf16> to vector<8x128xbf16>
    %93 = vector.shape_cast %90 : vector<8x128xbf16> to vector<1x8x128xbf16>
    tpu.vector_store %arg4[%c0_82, %c24_83, %c0_84], %93 {strides = array<i32>} : memref<1x64x128xbf16, #tpu.memory_space<vmem>>, vector<1x8x128xbf16>,
    %94 = vector.extract_strided_slice %77 {offsets = [40, 0], sizes = [8, 128], strides = [1, 1]} : vector<80x128xbf16> to vector<8x128xbf16>
    %c0_85 = arith.constant 0 : index
    %c32_86 = arith.constant 32 : index
    %c0_87 = arith.constant 0 : index
    %95 = vector.load %arg4[%c0_85, %c32_86, %c0_87] : memref<1x64x128xbf16, #tpu.memory_space<vmem>>, vector<1x8x128xbf16>
    %96 = vector.shape_cast %95 : vector<1x8x128xbf16> to vector<8x128xbf16>
    %97 = vector.shape_cast %94 : vector<8x128xbf16> to vector<1x8x128xbf16>
    tpu.vector_store %arg4[%c0_85, %c32_86, %c0_87], %97 {strides = array<i32>} : memref<1x64x128xbf16, #tpu.memory_space<vmem>>, vector<1x8x128xbf16>,
    %98 = vector.extract_strided_slice %77 {offsets = [50, 0], sizes = [8, 128], strides = [1, 1]} : vector<80x128xbf16> to vector<8x128xbf16>
    %c0_88 = arith.constant 0 : index
    %c40_89 = arith.constant 40 : index
    %c0_90 = arith.constant 0 : index
    %99 = vector.load %arg4[%c0_88, %c40_89, %c0_90] : memref<1x64x128xbf16, #tpu.memory_space<vmem>>, vector<1x8x128xbf16>
    %100 = vector.shape_cast %99 : vector<1x8x128xbf16> to vector<8x128xbf16>
    %101 = vector.shape_cast %98 : vector<8x128xbf16> to vector<1x8x128xbf16>
    tpu.vector_store %arg4[%c0_88, %c40_89, %c0_90], %101 {strides = array<i32>} : memref<1x64x128xbf16, #tpu.memory_space<vmem>>, vector<1x8x128xbf16>,
    %102 = vector.extract_strided_slice %77 {offsets = [60, 0], sizes = [8, 128], strides = [1, 1]} : vector<80x128xbf16> to vector<8x128xbf16>
    %c0_91 = arith.constant 0 : index
    %c48_92 = arith.constant 48 : index
    %c0_93 = arith.constant 0 : index
    %103 = vector.load %arg4[%c0_91, %c48_92, %c0_93] : memref<1x64x128xbf16, #tpu.memory_space<vmem>>, vector<1x8x128xbf16>
    %104 = vector.shape_cast %103 : vector<1x8x128xbf16> to vector<8x128xbf16>
    %105 = vector.shape_cast %102 : vector<8x128xbf16> to vector<1x8x128xbf16>
    tpu.vector_store %arg4[%c0_91, %c48_92, %c0_93], %105 {strides = array<i32>} : memref<1x64x128xbf16, #tpu.memory_space<vmem>>, vector<1x8x128xbf16>,
    %106 = vector.extract_strided_slice %77 {offsets = [70, 0], sizes = [8, 128], strides = [1, 1]} : vector<80x128xbf16> to vector<8x128xbf16>
    %c0_94 = arith.constant 0 : index
    %c56_95 = arith.constant 56 : index
    %c0_96 = arith.constant 0 : index
    %107 = vector.load %arg4[%c0_94, %c56_95, %c0_96] : memref<1x64x128xbf16, #tpu.memory_space<vmem>>, vector<1x8x128xbf16>
    %108 = vector.shape_cast %107 : vector<1x8x128xbf16> to vector<8x128xbf16>
    %109 = vector.shape_cast %106 : vector<8x128xbf16> to vector<1x8x128xbf16>
    tpu.vector_store %arg4[%c0_94, %c56_95, %c0_96], %109 {strides = array<i32>} : memref<1x64x128xbf16, #tpu.memory_space<vmem>>, vector<1x8x128xbf16>,
    return
  }
  func.func @transform_0(%arg0: i32) -> (i32, i32, i32) {
    %c0_i32 = arith.constant 0 : i32
    %c0_i32_0 = arith.constant 0 : i32
    %c0_i32_1 = arith.constant 0 : i32
    return %arg0, %c0_i32, %c0_i32_0 : i32, i32, i32
  }
  func.func @transform_1(%arg0: i32) -> (i32, i32, i32) {
    %c0_i32 = arith.constant 0 : i32
    %c0_i32_0 = arith.constant 0 : i32
    %c0_i32_1 = arith.constant 0 : i32
    %c0_i32_2 = arith.constant 0 : i32
    return %c0_i32, %c0_i32_0, %c0_i32_1 : i32, i32, i32
  }
  func.func @transform_2(%arg0: i32) -> (i32, i32) {
    %c0_i32 = arith.constant 0 : i32
    %c0_i32_0 = arith.constant 0 : i32
    %c0_i32_1 = arith.constant 0 : i32
    return %c0_i32, %c0_i32_0 : i32, i32
  }
  func.func @transform_3(%arg0: i32) -> (i32, i32, i32) {
    %c0_i32 = arith.constant 0 : i32
    %c0_i32_0 = arith.constant 0 : i32
    %c0_i32_1 = arith.constant 0 : i32
    return %arg0, %c0_i32, %c0_i32_0 : i32, i32, i32
  }
}

</mosaic_0001>

<bundles_post_ra>
// kernel: tpu_custom_call.1
= control target key start
LH: loop header
LB: loop body
LE: loop exit
PB: predicated region body
PF: predicated region fallthrough
CT: control target
= control target key end

     0   :  { %6 = vsyncpa [#allocation3], 0  ;;  %s124_s0 = inlined_call_operand.hbm [shape: f32[8,128], index: 0, kind: input, shape index: {}]   ;;  %s125_s1 = inlined_call_operand.hbm [shape: f32[8,128], index: 1, kind: output, shape index: {}]  }
   0x1   :  { %7 = vsyncpa [#allocation4], 0  ;;  %s88_s6 = smov [#allocation2]   ;;  %s40_s10 = scalar_lea.hbm %s124_s0, 128 }
   0x2   :  { %s14_s7 = sshll.u32 %s88_s6, 4  ;;  %p41_p0 = scmp.ne.s32.totalorder %s124_s0, %s40_s10  ;;  %s15_s7 = int_to_ptr.vmem [resolvable:$true] %s14_s7 }
   0x3   :  { %p44_p1 = scmp.lt.u32.totalorder %s40_s10, %s124_s0 }
   0x5   :  { %p46_p2 = pnand %p44_p1, %p41_p0 }
   0x7   :  { %49 = shalt.err (!%p46_p2)
}
   0x8   :  { %s50_s15 = scalar_lea.vmem %s15_s7, 128  ;;  %p55_p4 = scmp.lt.s32.totalorder %s15_s7, %s15_s7 }
   0x9   :  { %p51_p3 = scmp.ne.s32.totalorder %s15_s7, %s50_s15  ;;  %p56_p5 = scmp.lt.s32.totalorder %s50_s15, %s50_s15 }
   0xb   :  { %p57_p6 = por %p56_p5, %p55_p4 }
   0xd   :  { %p58_p7 = pnand %p57_p6, %p51_p3 }
   0xf   :  { %61 = shalt.err (!%p58_p7)
}
  0x10   :  { %17 = dma.hbm_to_vmem [thread:$0]  %s124_s0, 128, %s15_s7, [#allocation3]  }
  0x11   :  { %84 = dma.done.wait [#allocation3], 128  }
  0x12   :  { %85 = vsyncadd [#allocation3], 4294967168  ;;  %s89_s18 = smov [#allocation5]   ;;  %v21_v0 = vld [vmem:[#allocation2] sm:$0xff] }
  0x13   :  { %s29_s19 = sshll.u32 %s89_s18, 4  ;;  %22 = vst [vmem:[#allocation5] sm:$0xff] %v21_v0  ;;  %s30_s19 = int_to_ptr.vmem [resolvable:$true] %s29_s19 }
  0x14   :  { %s62_s20 = scalar_lea.vmem %s30_s19, 128  ;;  %p67_p9 = scmp.lt.s32.totalorder %s30_s19, %s30_s19 }
  0x15   :  { %p63_p8 = scmp.ne.s32.totalorder %s30_s19, %s62_s20  ;;  %p68_p10 = scmp.lt.s32.totalorder %s62_s20, %s62_s20 }
  0x17   :  { %p69_p11 = por %p68_p10, %p67_p9 }
  0x19   :  { %p70_p12 = pnand %p69_p11, %p63_p8 }
  0x1b   :  { %73 = shalt.err (!%p70_p12)
}
  0x1c   :  { %s74_s23 = scalar_lea.hbm %s125_s1, 128 }
  0x1d   :  { %p75_p13 = scmp.ne.s32.totalorder %s125_s1, %s74_s23  ;;  %p78_p0 = scmp.lt.u32.totalorder %s74_s23, %s125_s1 }
  0x1f   :  { %p80_p1 = pnand %p78_p0, %p75_p13 }
  0x21   :  { %83 = shalt.err (!%p80_p1)
}
  0x22   :  { %32 = dma.vmem_to_hbm [thread:$0]  %s30_s19, 128, %s125_s1, [#allocation4]  }
  0x23   :  { %86 = dma.done.wait [#allocation4], 128  }
  0x24   :  { %87 = vsyncadd [#allocation4], 4294967168 }
  0x25   :  { %36 = vsyncpa [#allocation3], 1 }
  0x26   :  { %37 = vsyncpa [#allocation4], 1 }

// kernel: bottleneck_forward.3
= control target key start
LH: loop header
LB: loop body
LE: loop exit
PB: predicated region body
PF: predicated region fallthrough
CT: control target
= control target key end

     0   :  { %8 = vsyncpa [#allocation4], 0  ;;  %s870_s0 = inlined_call_operand.hbm [shape: bf16[128,128], index: 0, kind: input, shape index: {}]   ;;  %s871_s1 = inlined_call_operand.hbm [shape: bf16[128,128], index: 1, kind: input, shape index: {}]   ;;  %s872_s2 = inlined_call_operand.hbm [shape: f32[1,128], index: 2, kind: input, shape index: {}]   ;;  %s873_s3 = inlined_call_operand.hbm [shape: bf16[128,128], index: 3, kind: output, shape index: {}]  }
   0x1   :  { %9 = vsyncpa [#allocation7], 0 }
   0x2   :  { %10 = vsyncpa [#allocation5], 0  ;;  %s780_s12 = smov [#allocation6]   ;;  %s781_s14 = smov [#allocation3]  }
   0x3   :  { %s28_s13 = sshll.u32 %s780_s12, 4  ;;  %s16_s15 = sshll.u32 %s781_s14, 4  ;;  %s29_s13 = int_to_ptr.vmem [resolvable:$true] %s28_s13  ;;  %s806_s15 = int_to_ptr.vmem [resolvable:$true] %s16_s15 }
   0x4   :  { %s686_s18 = scalar_lea.hbm %s871_s1, 1024 }
   0x5   :  { %p687_p0 = scmp.ne.s32.totalorder %s871_s1, %s686_s18  ;;  %p690_p1 = scmp.lt.u32.totalorder %s686_s18, %s871_s1 }
   0x7   :  { %p692_p2 = pnand %p690_p1, %p687_p0 }
   0x9   :  { %695 = shalt.err (!%p692_p2)
}
   0xa   :  { %s696_s23 = scalar_lea.vmem %s29_s13, 1024  ;;  %p701_p4 = scmp.lt.s32.totalorder %s29_s13, %s29_s13 }
   0xb   :  { %p697_p3 = scmp.ne.s32.totalorder %s29_s13, %s696_s23  ;;  %p702_p5 = scmp.lt.s32.totalorder %s696_s23, %s696_s23 }
   0xd   :  { %p703_p6 = por %p702_p5, %p701_p4 }
   0xf   :  { %p704_p7 = pnand %p703_p6, %p697_p3 }
  0x11   :  { %707 = shalt.err (!%p704_p7)
}
  0x12   :  { %s782_s24 = smov 64   ;;  %s783_s25 = smov 4  }
  0x13   :  { %34 = dma.hbm_to_vmem [thread:$0]  %s871_s1, 1024, %s29_s13, [#allocation7], %s782_s24, %s782_s24, %s783_s25  }
  0x14   :  { %s708_s30 = scalar_lea.hbm %s870_s0, 1024 }
  0x15   :  { %p709_p8 = scmp.ne.s32.totalorder %s870_s0, %s708_s30  ;;  %p712_p9 = scmp.lt.u32.totalorder %s708_s30, %s870_s0 }
  0x17   :  { %p714_p10 = pnand %p712_p9, %p709_p8 }
  0x19   :  { %717 = shalt.err (!%p714_p10)
}
  0x1a   :  { %s718_s8 = scalar_lea.vmem %s806_s15, 1024  ;;  %p723_p12 = scmp.lt.s32.totalorder %s806_s15, %s806_s15 }
  0x1b   :  { %p719_p11 = scmp.ne.s32.totalorder %s806_s15, %s718_s8  ;;  %p724_p13 = scmp.lt.s32.totalorder %s718_s8, %s718_s8 }
  0x1d   :  { %p725_p0 = por %p724_p13, %p723_p12 }
  0x1f   :  { %p726_p1 = pnand %p725_p0, %p719_p11 }
  0x21   :  { %729 = shalt.err (!%p726_p1)
}
  0x22   :  { %22 = dma.hbm_to_vmem [thread:$0]  %s870_s0, 1024, %s806_s15, [#allocation4], %s782_s24, %s782_s24, %s783_s25  }
  0x23   :  { %s784_s10 = smov [#allocation8]   ;;  %s730_s14 = scalar_lea.hbm %s872_s2, 16 }
  0x24   :  { %s41_s11 = sshll.u32 %s784_s10, 4  ;;  %p731_p2 = scmp.ne.s32.totalorder %s872_s2, %s730_s14  ;;  %s42_s11 = int_to_ptr.vmem [resolvable:$true] %s41_s11 }
  0x25   :  { %p734_p3 = scmp.lt.u32.totalorder %s730_s14, %s872_s2 }
  0x27   :  { %p736_p4 = pnand %p734_p3, %p731_p2 }
  0x29   :  { %739 = shalt.err (!%p736_p4)
}
  0x2a   :  { %s740_s20 = scalar_lea.vmem %s42_s11, 16  ;;  %s744_s0 = scalar_lea.vmem %s42_s11, 32 }
  0x2b   :  { %p741_p5 = scmp.ne.s32.totalorder %s42_s11, %s740_s20  ;;  %p745_p6 = scmp.lt.s32.totalorder %s42_s11, %s42_s11 }
  0x2c   :  { %p746_p7 = scmp.lt.s32.totalorder %s744_s0, %s740_s20 }
  0x2e   :  { %p747_p8 = por %p746_p7, %p745_p6 }
  0x30   :  { %p748_p9 = pnand %p747_p8, %p741_p5 }
  0x32   :  { %751 = shalt.err (!%p748_p9)
}
  0x33   :  { %44 = dma.hbm_to_vmem [thread:$0]  %s872_s2, 16, %s42_s11, [#allocation7]  }
  0x34   :  { %774 = dma.done.wait [#allocation4], 1024  }
  0x35   :  { %775 = vsyncadd [#allocation4], 4294966272 }
  0x36   :  { %776 = dma.done.wait [#allocation7], 1040  }
  0x37   :  { %777 = vsyncadd [#allocation7], 4294966256  ;;  %v670_v0 = vld [vmem:[#allocation6] sm:$0xff]   ;;  %v671_v1 = vld [vmem:[#allocation6 + $0x8] sm:$0xff]   ;;  %s785_s2 = smov [#allocation9]  }
  0x38   :  { %616 = vmatprep.subr.bf16.mxu0 %v670_v0  ;;  %648 = vmatprep.subr.bf16.mxu1 %v670_v0  ;;  %v672_v2 = vld [vmem:[#allocation6 + $0x10] sm:$0xff]   ;;  %v673_v3 = vld [vmem:[#allocation6 + $0x18] sm:$0xff]   ;;  %v678_v4 = vld [vmem:[#allocation3] sm:$0xff]   ;;  %s491_s22 = sshll.u32 %s785_s2, 4  ;;  %s492_s22 = int_to_ptr.vmem [resolvable:$true] %s491_s22 }
  0x39   :  { %617 = vmatpush3.bf16.msra.mxu0 %v670_v0  ;;  %656 = vmatpush3.bf16.msra.mxu1 %v670_v0  ;;  %v679_v5 = vld [vmem:[#allocation3 + $0x20] sm:$0xff]   ;;  %v675_v7 = vld [vmem:[#allocation6 + $0x28] sm:$0xff]   ;;  %v676_v8 = vld [vmem:[#allocation6 + $0x30] sm:$0xff]   ;;  %s752_s23 = scalar_lea.vmem %s492_s22, 1024  ;;  %p757_p11 = scmp.lt.s32.totalorder %s492_s22, %s492_s22 }
  0x3a   :  { %618 = vmatprep.subr.bf16.mxu0 %v671_v1  ;;  %649 = vmatprep.subr.bf16.mxu1 %v671_v1  ;;  %v674_v6 = vld [vmem:[#allocation6 + $0x20] sm:$0xff]   ;;  %v677_v9 = vld [vmem:[#allocation6 + $0x38] sm:$0xff]   ;;  %v680_v10 = vld [vmem:[#allocation3 + $0x8] sm:$0xff]   ;;  %p753_p10 = scmp.ne.s32.totalorder %s492_s22, %s752_s23  ;;  %p758_p12 = scmp.lt.s32.totalorder %s752_s23, %s752_s23 }
  0x3b   :  { %632 = vmatprep.mubr.bf16.mxu0 %v678_v4  ;;  %640 = vmatprep.mubr.bf16.mxu1 %v679_v5  ;;  %v681_v11 = vld [vmem:[#allocation3 + $0x28] sm:$0xff]   ;;  %v682_v12 = vld [vmem:[#allocation3 + $0x10] sm:$0xff]   ;;  %v684_v14 = vld [vmem:[#allocation3 + $0x18] sm:$0xff]  }
  0x3c   :  { %v683_v13 = vld [vmem:[#allocation3 + $0x30] sm:$0xff]   ;;  %v685_v15 = vld [vmem:[#allocation3 + $0x38] sm:$0xff]   ;;  %v520_v16 = vld [vmem:[#allocation8] ss:$0 sm:$0xff]  ;;  %p759_p13 = por %p758_p12, %p757_p11 }
  0x3d   :  { %619 = vmatpush3.bf16.msra.mxu0 %v671_v1  ;;  %657 = vmatpush3.bf16.msra.mxu1 %v671_v1 }
  0x3e   :  { %620 = vmatprep.subr.bf16.mxu0 %v672_v2  ;;  %650 = vmatprep.subr.bf16.mxu1 %v672_v2  ;;  %p760_p0 = pnand %p759_p13, %p753_p10 }
  0x41   :  { %621 = vmatpush3.bf16.msra.mxu0 %v672_v2  ;;  %658 = vmatpush3.bf16.msra.mxu1 %v672_v2 }
  0x42   :  { %622 = vmatprep.subr.bf16.mxu0 %v673_v3  ;;  %651 = vmatprep.subr.bf16.mxu1 %v673_v3 }
  0x45   :  { %623 = vmatpush3.bf16.msra.mxu0 %v673_v3  ;;  %659 = vmatpush3.bf16.msra.mxu1 %v673_v3 }
  0x46   :  { %624 = vmatprep.subr.bf16.mxu0 %v674_v6  ;;  %652 = vmatprep.subr.bf16.mxu1 %v674_v6 }
  0x49   :  { %625 = vmatpush3.bf16.msra.mxu0 %v674_v6  ;;  %660 = vmatpush3.bf16.msra.mxu1 %v674_v6 }
  0x4a   :  { %626 = vmatprep.subr.bf16.mxu0 %v675_v7  ;;  %653 = vmatprep.subr.bf16.mxu1 %v675_v7 }
  0x4d   :  { %627 = vmatpush3.bf16.msra.mxu0 %v675_v7  ;;  %661 = vmatpush3.bf16.msra.mxu1 %v675_v7 }
  0x4e   :  { %628 = vmatprep.subr.bf16.mxu0 %v676_v8  ;;  %654 = vmatprep.subr.bf16.mxu1 %v676_v8 }
  0x51   :  { %629 = vmatpush3.bf16.msra.mxu0 %v676_v8  ;;  %662 = vmatpush3.bf16.msra.mxu1 %v676_v8 }
  0x52   :  { %630 = vmatprep.subr.bf16.mxu0 %v677_v9  ;;  %655 = vmatprep.subr.bf16.mxu1 %v677_v9 }
  0x55   :  { %631 = vmatpush3.bf16.msra.mxu0 %v677_v9  ;;  %663 = vmatpush3.bf16.msra.mxu1 %v677_v9 }
  0x58   :  { %633 = vmatmul.mubr.bf16.vlgmr.msra.gmra.mrb[0].mxu0 %v680_v10  ;;  %641 = vmatmul.mubr.bf16.vlgmr.msra.gmra.mrb[0].mxu1 %v681_v11 }
  0x59   :  { %636 = vmatprep.mubr.bf16.mxu0 %v682_v12  ;;  %644 = vmatprep.mubr.bf16.mxu1 %v683_v13 }
  0x60   :  { %637 = vmatmul.mubr.bf16.gmra.mrb[4].mxu0 %v684_v14  ;;  %645 = vmatmul.mubr.bf16.gmra.mrb[4].mxu1 %v685_v15 }
 0x12b   :  { %v634_v17 = vpop.f32.mrb[0].mxu0  ;;  %v642_v18 = vpop.f32.mrb[0].mxu1 }
 0x12c   :  { %v376_v19 = vadd.f32 %v634_v17, %v520_v16  ;;  %v384_v20 = vadd.f32 %v642_v18, %v520_v16  ;;  %v253_v21 = vpop.f32.mrb[1].mxu0  ;;  %v285_v22 = vpop.f32.mrb[1].mxu1 }
 0x12d   :  { %v374_v23 = vadd.f32 %v520_v16, %v253_v21  ;;  %v382_v24 = vadd.f32 %v520_v16, %v285_v22  ;;  %v635_v25 = vpop.f32.mrb[2].mxu0  ;;  %v643_v26 = vpop.f32.mrb[2].mxu1 }
 0x12e   :  { %v377_v27 = vadd.f32 %v635_v25, %v520_v16  ;;  %v385_v28 = vadd.f32 %v643_v26, %v520_v16  ;;  %v256_v29 = vpop.f32.mrb[3].mxu0  ;;  %v288_v30 = vpop.f32.mrb[3].mxu1  ;;  %v392_v33 = vmax.f32 %v376_v19, 0.0  ;;  %v400_v34 = vmax.f32 %v384_v20, 0.0 }
 0x12f   :  { %v375_v31 = vadd.f32 %v520_v16, %v256_v29  ;;  %v383_v32 = vadd.f32 %v520_v16, %v288_v30  ;;  %v390_v37 = vmax.f32 %v374_v23, 0.0  ;;  %v398_v38 = vmax.f32 %v382_v24, 0.0 }
 0x130   :  { %v393_v35 = vmax.f32 %v377_v27, 0.0  ;;  %v401_v36 = vmax.f32 %v385_v28, 0.0 }
 0x131   :  { %v391_v39 = vmax.f32 %v375_v31, 0.0  ;;  %v399_v40 = vmax.f32 %v383_v32, 0.0 }
 0x132   :  { %v561_v41 = vpack.c.bf16 %v393_v35, %v392_v33  ;;  %v581_v42 = vpack.c.bf16 %v401_v36, %v400_v34 }
 0x133   :  { %v556_v43 = vpack.c.bf16 %v391_v39, %v390_v37  ;;  %v576_v44 = vpack.c.bf16 %v399_v40, %v398_v38  ;;  %v638_v45 = vpop.f32.mrb[4].mxu0  ;;  %v646_v46 = vpop.f32.mrb[4].mxu1 }
 0x134   :  { %593 = vst [vmem:[#allocation9 + $0x8] sm:$0xff] %v561_v41   ;;  %597 = vst [vmem:[#allocation9 + $0x28] sm:$0xff] %v581_v42   ;;  %v380_v47 = vadd.f32 %v638_v45, %v520_v16  ;;  %v388_v48 = vadd.f32 %v646_v46, %v520_v16  ;;  %v269_v49 = vpop.f32.mrb[5].mxu0  ;;  %v301_v50 = vpop.f32.mrb[5].mxu1 }
 0x135   :  { %557 = vst [vmem:[#allocation9] sm:$0xff] %v556_v43   ;;  %596 = vst [vmem:[#allocation9 + $0x20] sm:$0xff] %v576_v44   ;;  %v378_v51 = vadd.f32 %v520_v16, %v269_v49  ;;  %v386_v52 = vadd.f32 %v520_v16, %v301_v50  ;;  %v639_v53 = vpop.f32.mrb[6].mxu0  ;;  %v647_v54 = vpop.f32.mrb[6].mxu1 }
 0x136   :  { %v381_v55 = vadd.f32 %v639_v53, %v520_v16  ;;  %v389_v56 = vadd.f32 %v647_v54, %v520_v16  ;;  %v272_v57 = vpop.f32.mrb[7].mxu0  ;;  %v304_v58 = vpop.f32.mrb[7].mxu1  ;;  %v396_v61 = vmax.f32 %v380_v47, 0.0  ;;  %v404_v62 = vmax.f32 %v388_v48, 0.0 }
 0x137   :  { %v379_v59 = vadd.f32 %v520_v16, %v272_v57  ;;  %v387_v60 = vadd.f32 %v520_v16, %v304_v58  ;;  %v394_v1 = vmax.f32 %v378_v51, 0.0  ;;  %v402_v2 = vmax.f32 %v386_v52, 0.0 }
 0x138   :  { %v397_v63 = vmax.f32 %v381_v55, 0.0  ;;  %v405_v0 = vmax.f32 %v389_v56, 0.0 }
 0x139   :  { %v395_v3 = vmax.f32 %v379_v59, 0.0  ;;  %v403_v4 = vmax.f32 %v387_v60, 0.0 }
 0x13a   :  { %v571_v5 = vpack.c.bf16 %v397_v63, %v396_v61  ;;  %v591_v6 = vpack.c.bf16 %v405_v0, %v404_v62 }
 0x13b   :  { %v566_v7 = vpack.c.bf16 %v395_v3, %v394_v1  ;;  %v586_v8 = vpack.c.bf16 %v403_v4, %v402_v2 }
 0x13c   :  { %595 = vst [vmem:[#allocation9 + $0x18] sm:$0xff] %v571_v5   ;;  %599 = vst [vmem:[#allocation9 + $0x38] sm:$0xff] %v591_v6  }
 0x13d   :  { %594 = vst [vmem:[#allocation9 + $0x10] sm:$0xff] %v566_v7   ;;  %598 = vst [vmem:[#allocation9 + $0x30] sm:$0xff] %v586_v8  }
 0x13e   :  { %763 = shalt.err (!%p760_p0)
}
 0x13f   :  { %s764_s28 = scalar_lea.hbm %s873_s3, 1024 }
 0x140   :  { %p765_p1 = scmp.ne.s32.totalorder %s873_s3, %s764_s28  ;;  %p768_p2 = scmp.lt.u32.totalorder %s764_s28, %s873_s3 }
 0x142   :  { %p770_p3 = pnand %p768_p2, %p765_p1 }
 0x144   :  { %773 = shalt.err (!%p770_p3)
}
 0x145   :  { %497 = dma.vmem_to_hbm [thread:$0]  %s492_s22, 1024, %s873_s3, [#allocation5], %s782_s24, %s782_s24, %s783_s25  }
 0x146   :  { %778 = dma.done.wait [#allocation5], 1024  }
 0x147   :  { %779 = vsyncadd [#allocation5], 4294966272 }
 0x148   :  { %501 = vsyncpa [#allocation4], 1 }
 0x149   :  { %502 = vsyncpa [#allocation7], 1 }
 0x14a   :  { %503 = vsyncpa [#allocation5], 1 }

// kernel: bottleneck_forward.5
= control target key start
LH: loop header
LB: loop body
LE: loop exit
PB: predicated region body
PF: predicated region fallthrough
CT: control target
= control target key end

     0   :  { %10 = vsyncpa [#allocation3], 0  ;;  %s1237_s0 = inlined_call_operand.hbm [shape: bf16[128,128], index: 0, kind: input, shape index: {}]   ;;  %s1238_s1 = inlined_call_operand.hbm [shape: bf16[128,128], index: 1, kind: input, shape index: {}]   ;;  %s1239_s2 = inlined_call_operand.hbm [shape: bf16[128,128], index: 2, kind: input, shape index: {}]   ;;  %s1240_s3 = inlined_call_operand.hbm [shape: bf16[128,128], index: 3, kind: input, shape index: {}]   ;;  %s1241_s4 = inlined_call_operand.hbm [shape: f32[1,128], index: 4, kind: input, shape index: {}]   ;;  %s1242_s5 = inlined_call_operand.hbm [shape: bf16[128,128], index: 5, kind: output, shape index: {}]  }
   0x1   :  { %11 = vsyncpa [#allocation6], 0 }
   0x2   :  { %12 = vsyncpa [#allocation9], 0 }
   0x3   :  { %13 = vsyncpa [#allocation4], 0  ;;  %s1080_s18 = smov [#allocation5]   ;;  %s1081_s20 = smov [#allocation8]  }
   0x4   :  { %s31_s19 = sshll.u32 %s1080_s18, 4  ;;  %s55_s21 = sshll.u32 %s1081_s20, 4  ;;  %s32_s19 = int_to_ptr.vmem [resolvable:$true] %s31_s19  ;;  %s1118_s21 = int_to_ptr.vmem [resolvable:$true] %s55_s21 }
   0x5   :  { %s940_s24 = scalar_lea.hbm %s1238_s1, 1024 }
   0x6   :  { %p941_p0 = scmp.ne.s32.totalorder %s1238_s1, %s940_s24  ;;  %p944_p1 = scmp.lt.u32.totalorder %s940_s24, %s1238_s1 }
   0x8   :  { %p946_p2 = pnand %p944_p1, %p941_p0 }
   0xa   :  { %949 = shalt.err (!%p946_p2)
}
   0xb   :  { %s950_s29 = scalar_lea.vmem %s32_s19, 1024  ;;  %p955_p4 = scmp.lt.s32.totalorder %s32_s19, %s32_s19 }
   0xc   :  { %p951_p3 = scmp.ne.s32.totalorder %s32_s19, %s950_s29  ;;  %p956_p5 = scmp.lt.s32.totalorder %s950_s29, %s950_s29 }
   0xe   :  { %p957_p6 = por %p956_p5, %p955_p4 }
  0x10   :  { %p958_p7 = pnand %p957_p6, %p951_p3 }
  0x12   :  { %961 = shalt.err (!%p958_p7)
}
  0x13   :  { %s1082_s30 = smov 64   ;;  %s1083_s6 = smov 4  }
  0x14   :  { %37 = dma.hbm_to_vmem [thread:$0]  %s1238_s1, 1024, %s32_s19, [#allocation6], %s1082_s30, %s1082_s30, %s1083_s6  }
  0x15   :  { %s962_s11 = scalar_lea.hbm %s1240_s3, 1024 }
  0x16   :  { %p963_p8 = scmp.ne.s32.totalorder %s1240_s3, %s962_s11  ;;  %p966_p9 = scmp.lt.u32.totalorder %s962_s11, %s1240_s3 }
  0x18   :  { %p968_p10 = pnand %p966_p9, %p963_p8 }
  0x1a   :  { %971 = shalt.err (!%p968_p10)
}
  0x1b   :  { %s972_s16 = scalar_lea.vmem %s1118_s21, 1024  ;;  %p977_p12 = scmp.lt.s32.totalorder %s1118_s21, %s1118_s21 }
  0x1c   :  { %p973_p11 = scmp.ne.s32.totalorder %s1118_s21, %s972_s16  ;;  %p978_p13 = scmp.lt.s32.totalorder %s972_s16, %s972_s16 }
  0x1e   :  { %p979_p0 = por %p978_p13, %p977_p12 }
  0x20   :  { %p980_p1 = pnand %p979_p0, %p973_p11 }
  0x22   :  { %983 = shalt.err (!%p980_p1)
}
  0x23   :  { %61 = dma.hbm_to_vmem [thread:$0]  %s1240_s3, 1024, %s1118_s21, [#allocation9], %s1082_s30, %s1082_s30, %s1083_s6  }
  0x24   :  { %s1084_s18 = smov [#allocation2]   ;;  %s1085_s20 = smov [#allocation7]  }
  0x25   :  { %s19_s19 = sshll.u32 %s1084_s18, 4  ;;  %s43_s22 = sshll.u32 %s1085_s20, 4  ;;  %s20_s19 = int_to_ptr.vmem [resolvable:$true] %s19_s19  ;;  %s1155_s22 = int_to_ptr.vmem [resolvable:$true] %s43_s22 }
  0x26   :  { %s984_s25 = scalar_lea.hbm %s1237_s0, 1024 }
  0x27   :  { %p985_p2 = scmp.ne.s32.totalorder %s1237_s0, %s984_s25  ;;  %p988_p3 = scmp.lt.u32.totalorder %s984_s25, %s1237_s0 }
  0x29   :  { %p990_p4 = pnand %p988_p3, %p985_p2 }
  0x2b   :  { %993 = shalt.err (!%p990_p4)
}
  0x2c   :  { %s994_s3 = scalar_lea.vmem %s20_s19, 1024  ;;  %p999_p6 = scmp.lt.s32.totalorder %s20_s19, %s20_s19 }
  0x2d   :  { %p995_p5 = scmp.ne.s32.totalorder %s20_s19, %s994_s3  ;;  %p1000_p7 = scmp.lt.s32.totalorder %s994_s3, %s994_s3 }
  0x2f   :  { %p1001_p8 = por %p1000_p7, %p999_p6 }
  0x31   :  { %p1002_p9 = pnand %p1001_p8, %p995_p5 }
  0x33   :  { %1005 = shalt.err (!%p1002_p9)
}
  0x34   :  { %25 = dma.hbm_to_vmem [thread:$0]  %s1237_s0, 1024, %s20_s19, [#allocation3], %s1082_s30, %s1082_s30, %s1083_s6  }
  0x35   :  { %s1006_s10 = scalar_lea.hbm %s1239_s2, 1024 }
  0x36   :  { %p1007_p10 = scmp.ne.s32.totalorder %s1239_s2, %s1006_s10  ;;  %p1010_p11 = scmp.lt.u32.totalorder %s1006_s10, %s1239_s2 }
  0x38   :  { %p1012_p12 = pnand %p1010_p11, %p1007_p10 }
  0x3a   :  { %1015 = shalt.err (!%p1012_p12)
}
  0x3b   :  { %s1016_s15 = scalar_lea.vmem %s1155_s22, 1024  ;;  %p1021_p0 = scmp.lt.s32.totalorder %s1155_s22, %s1155_s22 }
  0x3c   :  { %p1017_p13 = scmp.ne.s32.totalorder %s1155_s22, %s1016_s15  ;;  %p1022_p1 = scmp.lt.s32.totalorder %s1016_s15, %s1016_s15 }
  0x3e   :  { %p1023_p2 = por %p1022_p1, %p1021_p0 }
  0x40   :  { %p1024_p3 = pnand %p1023_p2, %p1017_p13 }
  0x42   :  { %1027 = shalt.err (!%p1024_p3)
}
  0x43   :  { %49 = dma.hbm_to_vmem [thread:$0]  %s1239_s2, 1024, %s1155_s22, [#allocation6], %s1082_s30, %s1082_s30, %s1083_s6  }
  0x44   :  { %s1086_s1 = smov [#allocation10]   ;;  %s1028_s20 = scalar_lea.hbm %s1241_s4, 16 }
  0x45   :  { %s68_s17 = sshll.u32 %s1086_s1, 4  ;;  %p1029_p4 = scmp.ne.s32.totalorder %s1241_s4, %s1028_s20  ;;  %s69_s17 = int_to_ptr.vmem [resolvable:$true] %s68_s17 }
  0x46   :  { %p1032_p5 = scmp.lt.u32.totalorder %s1028_s20, %s1241_s4 }
  0x48   :  { %p1034_p6 = pnand %p1032_p5, %p1029_p4 }
  0x4a   :  { %1037 = shalt.err (!%p1034_p6)
}
  0x4b   :  { %s1038_s27 = scalar_lea.vmem %s69_s17, 16  ;;  %s1042_s2 = scalar_lea.vmem %s69_s17, 32 }
  0x4c   :  { %p1039_p7 = scmp.ne.s32.totalorder %s69_s17, %s1038_s27  ;;  %p1043_p8 = scmp.lt.s32.totalorder %s69_s17, %s69_s17 }
  0x4d   :  { %p1044_p9 = scmp.lt.s32.totalorder %s1042_s2, %s1038_s27 }
  0x4f   :  { %p1045_p10 = por %p1044_p9, %p1043_p8 }
  0x51   :  { %p1046_p11 = pnand %p1045_p10, %p1039_p7 }
  0x53   :  { %1049 = shalt.err (!%p1046_p11)
}
  0x54   :  { %71 = dma.hbm_to_vmem [thread:$0]  %s1241_s4, 16, %s69_s17, [#allocation9]  }
  0x55   :  { %1072 = dma.done.wait [#allocation3], 1024  }
  0x56   :  { %1073 = vsyncadd [#allocation3], 4294966272 }
  0x57   :  { %1074 = dma.done.wait [#allocation6], 2048  }
  0x58   :  { %1075 = vsyncadd [#allocation6], 4294965248 }
  0x59   :  { %1076 = dma.done.wait [#allocation9], 1040  }
  0x5a   :  { %1077 = vsyncadd [#allocation9], 4294966256  ;;  %v908_v0 = vld [vmem:[#allocation8] sm:$0xff]   ;;  %v910_v2 = vld [vmem:[#allocation8 + $0x8] sm:$0xff]   ;;  %s1087_s4 = smov [#allocation11]  }
  0x5b   :  { %v909_v1 = vld [vmem:[#allocation5] sm:$0xff]   ;;  %820 = vmatprep.subr.bf16.mxu1 %v908_v0  ;;  %v911_v3 = vld [vmem:[#allocation5 + $0x8] sm:$0xff]   ;;  %v912_v4 = vld [vmem:[#allocation8 + $0x10] sm:$0xff]   ;;  %s662_s29 = sshll.u32 %s1087_s4, 4  ;;  %s663_s29 = int_to_ptr.vmem [resolvable:$true] %s662_s29 }
  0x5c   :  { %852 = vmatprep.subr.bf16.mxu0 %v909_v1  ;;  %821 = vmatpush3.bf16.msra.mxu1 %v908_v0  ;;  %v913_v5 = vld [vmem:[#allocation5 + $0x10] sm:$0xff]   ;;  %v914_v6 = vld [vmem:[#allocation8 + $0x18] sm:$0xff]   ;;  %v916_v8 = vld [vmem:[#allocation8 + $0x20] sm:$0xff]   ;;  %s1050_s3 = scalar_lea.vmem %s663_s29, 1024  ;;  %p1055_p13 = scmp.lt.s32.totalorder %s663_s29, %s663_s29 }
  0x5d   :  { %853 = vmatpush3.bf16.msra.mxu0 %v909_v1  ;;  %822 = vmatprep.subr.bf16.mxu1 %v910_v2  ;;  %v915_v7 = vld [vmem:[#allocation5 + $0x18] sm:$0xff]   ;;  %v917_v9 = vld [vmem:[#allocation5 + $0x20] sm:$0xff]   ;;  %v918_v10 = vld [vmem:[#allocation8 + $0x28] sm:$0xff]   ;;  %p1051_p12 = scmp.ne.s32.totalorder %s663_s29, %s1050_s3  ;;  %p1056_p0 = scmp.lt.s32.totalorder %s1050_s3, %s1050_s3 }
  0x5e   :  { %854 = vmatprep.subr.bf16.mxu0 %v911_v3  ;;  %v919_v11 = vld [vmem:[#allocation5 + $0x28] sm:$0xff]   ;;  %v924_v12 = vld [vmem:[#allocation7] sm:$0xff]   ;;  %v920_v14 = vld [vmem:[#allocation8 + $0x30] sm:$0xff]  }
  0x5f   :  { %v925_v13 = vld [vmem:[#allocation2] sm:$0xff]   ;;  %836 = vmatprep.mubr.bf16.mxu1 %v924_v12  ;;  %v921_v15 = vld [vmem:[#allocation5 + $0x30] sm:$0xff]   ;;  %v922_v16 = vld [vmem:[#allocation8 + $0x38] sm:$0xff]   ;;  %p1057_p1 = por %p1056_p0, %p1055_p13 }
  0x60   :  { %823 = vmatpush3.bf16.msra.mxu1 %v910_v2  ;;  %868 = vmatprep.mubr.bf16.mxu0 %v925_v13  ;;  %v923_v17 = vld [vmem:[#allocation5 + $0x38] sm:$0xff]   ;;  %v926_v18 = vld [vmem:[#allocation7 + $0x8] sm:$0xff]   ;;  %v928_v20 = vld [vmem:[#allocation7 + $0x10] sm:$0xff]  }
  0x61   :  { %855 = vmatpush3.bf16.msra.mxu0 %v911_v3  ;;  %824 = vmatprep.subr.bf16.mxu1 %v912_v4  ;;  %v927_v19 = vld [vmem:[#allocation2 + $0x8] sm:$0xff]   ;;  %v929_v21 = vld [vmem:[#allocation2 + $0x10] sm:$0xff]   ;;  %v930_v22 = vld [vmem:[#allocation7 + $0x18] sm:$0xff]   ;;  %p1058_p2 = pnand %p1057_p1, %p1051_p12 }
  0x62   :  { %856 = vmatprep.subr.bf16.mxu0 %v913_v5  ;;  %v931_v23 = vld [vmem:[#allocation2 + $0x18] sm:$0xff]   ;;  %v932_v24 = vld [vmem:[#allocation7 + $0x20] sm:$0xff]   ;;  %v934_v26 = vld [vmem:[#allocation7 + $0x28] sm:$0xff]  }
  0x63   :  { %v933_v25 = vld [vmem:[#allocation2 + $0x20] sm:$0xff]   ;;  %v935_v27 = vld [vmem:[#allocation2 + $0x28] sm:$0xff]   ;;  %v936_v28 = vld [vmem:[#allocation7 + $0x30] sm:$0xff]  }
  0x64   :  { %825 = vmatpush3.bf16.msra.mxu1 %v912_v4  ;;  %v937_v29 = vld [vmem:[#allocation2 + $0x30] sm:$0xff]   ;;  %v938_v30 = vld [vmem:[#allocation7 + $0x38] sm:$0xff]   ;;  %v1204_v34 = vld [vmem:[#allocation10] ss:$0 sm:$0xff] }
  0x65   :  { %857 = vmatpush3.bf16.msra.mxu0 %v913_v5  ;;  %826 = vmatprep.subr.bf16.mxu1 %v914_v6  ;;  %v939_v31 = vld [vmem:[#allocation2 + $0x38] sm:$0xff]  }
  0x66   :  { %858 = vmatprep.subr.bf16.mxu0 %v915_v7 }
  0x68   :  { %827 = vmatpush3.bf16.msra.mxu1 %v914_v6 }
  0x69   :  { %859 = vmatpush3.bf16.msra.mxu0 %v915_v7  ;;  %828 = vmatprep.subr.bf16.mxu1 %v916_v8 }
  0x6a   :  { %860 = vmatprep.subr.bf16.mxu0 %v917_v9 }
  0x6c   :  { %829 = vmatpush3.bf16.msra.mxu1 %v916_v8 }
  0x6d   :  { %861 = vmatpush3.bf16.msra.mxu0 %v917_v9  ;;  %830 = vmatprep.subr.bf16.mxu1 %v918_v10 }
  0x6e   :  { %862 = vmatprep.subr.bf16.mxu0 %v919_v11 }
  0x70   :  { %831 = vmatpush3.bf16.msra.mxu1 %v918_v10 }
  0x71   :  { %863 = vmatpush3.bf16.msra.mxu0 %v919_v11  ;;  %832 = vmatprep.subr.bf16.mxu1 %v920_v14 }
  0x72   :  { %864 = vmatprep.subr.bf16.mxu0 %v921_v15 }
  0x74   :  { %833 = vmatpush3.bf16.msra.mxu1 %v920_v14 }
  0x75   :  { %865 = vmatpush3.bf16.msra.mxu0 %v921_v15  ;;  %834 = vmatprep.subr.bf16.mxu1 %v922_v16 }
  0x76   :  { %866 = vmatprep.subr.bf16.mxu0 %v923_v17 }
  0x78   :  { %835 = vmatpush3.bf16.msra.mxu1 %v922_v16 }
  0x79   :  { %867 = vmatpush3.bf16.msra.mxu0 %v923_v17 }
  0x7b   :  { %837 = vmatmul.mubr.bf16.vlgmr.msra.gmra.mrb[0].mxu1 %v926_v18 }
  0x7c   :  { %869 = vmatmul.mubr.bf16.vlgmr.msra.gmra.mrb[0].mxu0 %v927_v19  ;;  %840 = vmatprep.mubr.bf16.mxu1 %v928_v20 }
  0x7d   :  { %872 = vmatprep.mubr.bf16.mxu0 %v929_v21 }
  0x83   :  { %841 = vmatmul.mubr.bf16.gmra.mrb[4].mxu1 %v930_v22 }
  0x84   :  { %873 = vmatmul.mubr.bf16.gmra.mrb[4].mxu0 %v931_v23  ;;  %844 = vmatprep.mubr.bf16.mxu1 %v932_v24 }
  0x85   :  { %876 = vmatprep.mubr.bf16.mxu0 %v933_v25 }
  0x8b   :  { %845 = vmatmul.mubr.bf16.gmra.mrb[8].mxu1 %v934_v26 }
  0x8c   :  { %877 = vmatmul.mubr.bf16.gmra.mrb[8].mxu0 %v935_v27  ;;  %848 = vmatprep.mubr.bf16.mxu1 %v936_v28 }
  0x8d   :  { %880 = vmatprep.mubr.bf16.mxu0 %v937_v29 }
  0x93   :  { %849 = vmatmul.mubr.bf16.gmra.mrb[12].mxu1 %v938_v30 }
  0x94   :  { %881 = vmatmul.mubr.bf16.gmra.mrb[12].mxu0 %v939_v31 }
 0x14e   :  { %v838_v32 = vpop.f32.mrb[0].mxu1 }
 0x14f   :  { %v870_v33 = vpop.f32.mrb[0].mxu0  ;;  %v282_v35 = vpop.f32.mrb[1].mxu1 }
 0x150   :  { %v484_v36 = vadd.f32 %v870_v33, %v838_v32  ;;  %v475_v37 = vpop.f32.mrb[1].mxu0  ;;  %v839_v38 = vpop.f32.mrb[2].mxu1 }
 0x151   :  { %v476_v39 = vadd.f32 %v475_v37, %v282_v35  ;;  %v871_v40 = vpop.f32.mrb[2].mxu0  ;;  %v285_v41 = vpop.f32.mrb[3].mxu1 }
 0x152   :  { %v547_v42 = vadd.f32 %v1204_v34, %v484_v36  ;;  %v487_v43 = vadd.f32 %v871_v40, %v839_v38  ;;  %v478_v44 = vpop.f32.mrb[3].mxu0 }
 0x153   :  { %v545_v45 = vadd.f32 %v1204_v34, %v476_v39  ;;  %v479_v46 = vadd.f32 %v478_v44, %v285_v41 }
 0x154   :  { %v548_v47 = vadd.f32 %v1204_v34, %v487_v43  ;;  %v563_v49 = vmax.f32 %v547_v42, 0.0 }
 0x155   :  { %v546_v48 = vadd.f32 %v1204_v34, %v479_v46  ;;  %v561_v52 = vmax.f32 %v545_v45, 0.0 }
 0x156   :  { %v564_v50 = vmax.f32 %v548_v47, 0.0  ;;  %v842_v51 = vpop.f32.mrb[4].mxu1 }
 0x157   :  { %v562_v53 = vmax.f32 %v546_v48, 0.0  ;;  %v874_v54 = vpop.f32.mrb[4].mxu0  ;;  %v298_v55 = vpop.f32.mrb[5].mxu1 }
 0x158   :  { %v749_v56 = vpack.c.bf16 %v564_v50, %v563_v49  ;;  %v500_v57 = vadd.f32 %v874_v54, %v842_v51  ;;  %v491_v58 = vpop.f32.mrb[5].mxu0  ;;  %v843_v59 = vpop.f32.mrb[6].mxu1 }
 0x159   :  { %v744_v60 = vpack.c.bf16 %v562_v53, %v561_v52  ;;  %v492_v61 = vadd.f32 %v491_v58, %v298_v55  ;;  %v875_v62 = vpop.f32.mrb[6].mxu0  ;;  %v301_v63 = vpop.f32.mrb[7].mxu1 }
 0x15a   :  { %781 = vst [vmem:[#allocation11 + $0x8] sm:$0xff] %v749_v56   ;;  %v551_v0 = vadd.f32 %v1204_v34, %v500_v57  ;;  %v503_v1 = vadd.f32 %v875_v62, %v843_v59  ;;  %v494_v2 = vpop.f32.mrb[7].mxu0 }
 0x15b   :  { %745 = vst [vmem:[#allocation11] sm:$0xff] %v744_v60   ;;  %v549_v3 = vadd.f32 %v1204_v34, %v492_v61  ;;  %v495_v4 = vadd.f32 %v494_v2, %v301_v63 }
 0x15c   :  { %v552_v5 = vadd.f32 %v1204_v34, %v503_v1  ;;  %v567_v7 = vmax.f32 %v551_v0, 0.0 }
 0x15d   :  { %v550_v6 = vadd.f32 %v1204_v34, %v495_v4  ;;  %v565_v10 = vmax.f32 %v549_v3, 0.0 }
 0x15e   :  { %v568_v8 = vmax.f32 %v552_v5, 0.0  ;;  %v846_v9 = vpop.f32.mrb[8].mxu1 }
 0x15f   :  { %v566_v11 = vmax.f32 %v550_v6, 0.0  ;;  %v878_v12 = vpop.f32.mrb[8].mxu0  ;;  %v314_v13 = vpop.f32.mrb[9].mxu1 }
 0x160   :  { %v759_v14 = vpack.c.bf16 %v568_v8, %v567_v7  ;;  %v516_v15 = vadd.f32 %v878_v12, %v846_v9  ;;  %v507_v16 = vpop.f32.mrb[9].mxu0  ;;  %v847_v17 = vpop.f32.mrb[10].mxu1 }
 0x161   :  { %v754_v18 = vpack.c.bf16 %v566_v11, %v565_v10  ;;  %v508_v19 = vadd.f32 %v507_v16, %v314_v13  ;;  %v879_v20 = vpop.f32.mrb[10].mxu0  ;;  %v317_v21 = vpop.f32.mrb[11].mxu1 }
 0x162   :  { %783 = vst [vmem:[#allocation11 + $0x18] sm:$0xff] %v759_v14   ;;  %v555_v22 = vadd.f32 %v1204_v34, %v516_v15  ;;  %v519_v23 = vadd.f32 %v879_v20, %v847_v17  ;;  %v510_v24 = vpop.f32.mrb[11].mxu0 }
 0x163   :  { %782 = vst [vmem:[#allocation11 + $0x10] sm:$0xff] %v754_v18   ;;  %v553_v25 = vadd.f32 %v1204_v34, %v508_v19  ;;  %v511_v26 = vadd.f32 %v510_v24, %v317_v21 }
 0x164   :  { %v556_v27 = vadd.f32 %v1204_v34, %v519_v23  ;;  %v571_v29 = vmax.f32 %v555_v22, 0.0 }
 0x165   :  { %v554_v28 = vadd.f32 %v1204_v34, %v511_v26  ;;  %v569_v32 = vmax.f32 %v553_v25, 0.0 }
 0x166   :  { %v572_v30 = vmax.f32 %v556_v27, 0.0  ;;  %v850_v31 = vpop.f32.mrb[12].mxu1 }
 0x167   :  { %v570_v33 = vmax.f32 %v554_v28, 0.0  ;;  %v882_v35 = vpop.f32.mrb[12].mxu0  ;;  %v330_v36 = vpop.f32.mrb[13].mxu1 }
 0x168   :  { %v769_v37 = vpack.c.bf16 %v572_v30, %v571_v29  ;;  %v532_v38 = vadd.f32 %v882_v35, %v850_v31  ;;  %v523_v39 = vpop.f32.mrb[13].mxu0  ;;  %v851_v40 = vpop.f32.mrb[14].mxu1 }
 0x169   :  { %v764_v41 = vpack.c.bf16 %v570_v33, %v569_v32  ;;  %v524_v42 = vadd.f32 %v523_v39, %v330_v36  ;;  %v883_v43 = vpop.f32.mrb[14].mxu0  ;;  %v333_v44 = vpop.f32.mrb[15].mxu1 }
 0x16a   :  { %785 = vst [vmem:[#allocation11 + $0x28] sm:$0xff] %v769_v37   ;;  %v559_v45 = vadd.f32 %v1204_v34, %v532_v38  ;;  %v535_v46 = vadd.f32 %v883_v43, %v851_v40  ;;  %v526_v47 = vpop.f32.mrb[15].mxu0 }
 0x16b   :  { %784 = vst [vmem:[#allocation11 + $0x20] sm:$0xff] %v764_v41   ;;  %v557_v48 = vadd.f32 %v1204_v34, %v524_v42  ;;  %v527_v49 = vadd.f32 %v526_v47, %v333_v44 }
 0x16c   :  { %v560_v50 = vadd.f32 %v1204_v34, %v535_v46  ;;  %v575_v52 = vmax.f32 %v559_v45, 0.0 }
 0x16d   :  { %v558_v51 = vadd.f32 %v1204_v34, %v527_v49  ;;  %v573_v54 = vmax.f32 %v557_v48, 0.0 }
 0x16e   :  { %v576_v53 = vmax.f32 %v560_v50, 0.0 }
 0x16f   :  { %v574_v55 = vmax.f32 %v558_v51, 0.0 }
 0x170   :  { %v779_v56 = vpack.c.bf16 %v576_v53, %v575_v52 }
 0x171   :  { %v774_v57 = vpack.c.bf16 %v574_v55, %v573_v54 }
 0x172   :  { %787 = vst [vmem:[#allocation11 + $0x38] sm:$0xff] %v779_v56  }
 0x173   :  { %786 = vst [vmem:[#allocation11 + $0x30] sm:$0xff] %v774_v57  }
 0x174   :  { %1061 = shalt.err (!%p1058_p2)
}
 0x175   :  { %s1062_s8 = scalar_lea.hbm %s1242_s5, 1024 }
 0x176   :  { %p1063_p3 = scmp.ne.s32.totalorder %s1242_s5, %s1062_s8  ;;  %p1066_p4 = scmp.lt.u32.totalorder %s1062_s8, %s1242_s5 }
 0x178   :  { %p1068_p5 = pnand %p1066_p4, %p1063_p3 }
 0x17a   :  { %1071 = shalt.err (!%p1068_p5)
}
 0x17b   :  { %668 = dma.vmem_to_hbm [thread:$0]  %s663_s29, 1024, %s1242_s5, [#allocation4], %s1082_s30, %s1082_s30, %s1083_s6  }
 0x17c   :  { %1078 = dma.done.wait [#allocation4], 1024  }
 0x17d   :  { %1079 = vsyncadd [#allocation4], 4294966272 }
 0x17e   :  { %672 = vsyncpa [#allocation3], 1 }
 0x17f   :  { %673 = vsyncpa [#allocation6], 1 }
 0x180   :  { %674 = vsyncpa [#allocation9], 1 }
 0x181   :  { %675 = vsyncpa [#allocation4], 1 }

// kernel: bottleneck_forward.4
= control target key start
LH: loop header
LB: loop body
LE: loop exit
PB: predicated region body
PF: predicated region fallthrough
CT: control target
= control target key end

     0   :  { %8 = vsyncpa [#allocation4], 0  ;;  %s3978_s0 = inlined_call_operand.hbm [shape: bf16[2,64,128], index: 0, kind: input, shape index: {}]   ;;  %s3979_s1 = inlined_call_operand.hbm [shape: bf16[9,128,128], index: 1, kind: input, shape index: {}]   ;;  %s3980_s2 = inlined_call_operand.hbm [shape: f32[1,128], index: 2, kind: input, shape index: {}]   ;;  %s3981_s3 = inlined_call_operand.hbm [shape: bf16[2,64,128], index: 3, kind: output, shape index: {}]  }
   0x1   :  { %10 = vsyncpa [#allocation4 + $0x1], 0 }
   0x2   :  { %11 = vsyncpa [#allocation7], 0 }
   0x3   :  { %12 = vsyncpa [#allocation5], 0 }
   0x4   :  { %14 = vsyncpa [#allocation5 + $0x1], 0  ;;  %s3261_s12 = smov 0   ;;  %s3263_s13 = smov 0  }
   0x5   :  { %s3265_s14 = smov 0   ;;  %s3267_s15 = smov 0  }
   0x6 LB: > { %s3282_s16 = sadd.s32 4294967295, %s3228_s15   ;;  %s2306_s17 = sadd.s32 4294967294, %s3228_s15   ;;  %s3228_s15 = sphi %s3267_s15, %s4026_s15   ;;  %s3224_s14 = sphi %s3265_s14, %s4025_s14   ;;  %s3220_s13 = sphi %s3263_s13, %s4024_s13   ;;  %s3216_s12 = sphi %s3261_s12, %s4023_s12  }
   0x7   : > { %p40_p0 = scmp.ne.s32.totalorder %s3220_s13, %s3216_s12  ;;  %p3982_p1 = scmp.eq.s32.totalorder %s3282_s16, 0 }
   0x8   : > { %p112_p3 = scmp.eq.s32.totalorder %s2306_s17, 1  ;;  %p2307_p5 = scmp.ge.s32.totalorder %s3228_s15, 1 }
   0x9   : > { %p3291_p4 = por %p3982_p1, %p40_p0  ;;  %p119_p7 = scmp.lt.s32.totalorder %s3228_s15, 3 }
   0xa   : > { %p3296_p6 = por %p112_p3, %p40_p0  ;;  %s3230_s21 = smov [#allocation6]  }
   0xb   : > { %s3987_s18 = scalar_select %p3291_p4, 1, 0 }
   0xc   : > { %s3988_s19 = scalar_select %p3296_p6, 1, 0 }
   0xd   : > { %p3301_p8 = pnand %p2307_p5, %p119_p7  ;;  %s131_s22 = sshll.u32 %s3230_s21, 4  ;;  %s3305_s22 = int_to_ptr.vmem [resolvable:$true] %s131_s22 }
   0xe   : > { %s3231_s24 = smov [#allocation8]   ;;  %s3072_s28 = scalar_lea.hbm %s3979_s1, 9216 }
   0xf   : > { %p2915_p9 = pneg %p3301_p8  ;;  %s145_s25 = sshll.u32 %s3231_s24, 4  ;;  %s3316_s25 = int_to_ptr.vmem [resolvable:$true] %s145_s25 }
  0x10   : > { %p3073_p12 = scmp.ne.s32.totalorder %s3979_s1, %s3072_s28  ;;  %p3079_p5 = scmp.lt.u32.totalorder %s3072_s28, %s3979_s1 }
  0x11   : > { %p3312_p11 = pnand %p2915_p9, %p3982_p1 }
  0x13   : > { %p3074_p13 = pneg %p3312_p11 }
  0x15   : > { %p3075_p0 = pnand %p3074_p13, %p3073_p12 }
  0x17   : > { %p3076_p3 = pneg %p3075_p0 }
  0x19   : > { %p3081_p7 = pnand %p3079_p5, %p3076_p3 }
  0x1b   : > { %3084 = shalt.err (!%p3081_p7)
}
  0x1c   : > { %s3085_s6 = scalar_lea.vmem %s3305_s22, 9216  ;;  %p3093_p2 = scmp.lt.s32.totalorder %s3305_s22, %s3305_s22 }
  0x1d   : > { %p3086_p9 = scmp.ne.s32.totalorder %s3305_s22, %s3085_s6  ;;  %p3094_p12 = scmp.lt.s32.totalorder %s3085_s6, %s3085_s6 }
  0x1f   : > { %p3088_p10 = pnand %p3086_p9, %p3074_p13  ;;  %p3095_p0 = por %p3094_p12, %p3093_p2 }
  0x21   : > { %p3089_p1 = pneg %p3088_p10 }
  0x23   : > { %p3096_p6 = pnand %p3095_p0, %p3089_p1 }
  0x25   : > { %3099 = shalt.err (!%p3096_p6)
}
  0x26   : > { %s3232_s7 = smov 64   ;;  %s3233_s8 = smov 4  }
  0x27   : > { %2918 = dma.hbm_to_vmem [thread:$0]  (!%p3312_p11), %s3979_s1, 9216, %s3305_s22, [#allocation7], %s3232_s7, %s3232_s7, %s3233_s8  }
  0x28   : > { %s3100_s21 = scalar_lea.hbm %s3980_s2, 16 }
  0x29   : > { %p3101_p1 = scmp.ne.s32.totalorder %s3980_s2, %s3100_s21  ;;  %p3107_p10 = scmp.lt.u32.totalorder %s3100_s21, %s3980_s2 }
  0x2b   : > { %p3103_p2 = pnand %p3101_p1, %p3074_p13 }
  0x2d   : > { %p3104_p6 = pneg %p3103_p2 }
  0x2f   : > { %p3109_p3 = pnand %p3107_p10, %p3104_p6 }
  0x31   : > { %3112 = shalt.err (!%p3109_p3)
}
  0x32   : > { %s3113_s22 = scalar_lea.vmem %s3316_s25, 16  ;;  %s3120_s29 = scalar_lea.vmem %s3316_s25, 32 }
  0x33   : > { %p3114_p5 = scmp.ne.s32.totalorder %s3316_s25, %s3113_s22  ;;  %p3121_p12 = scmp.lt.s32.totalorder %s3316_s25, %s3316_s25 }
  0x34   : > { %p3122_p0 = scmp.lt.s32.totalorder %s3120_s29, %s3113_s22 }
  0x35   : > { %p3116_p7 = pnand %p3114_p5, %p3074_p13 }
  0x36   : > { %p3123_p1 = por %p3122_p0, %p3121_p12 }
  0x37   : > { %p3117_p9 = pneg %p3116_p7 }
  0x39   : > { %p3124_p2 = pnand %p3123_p1, %p3117_p9 }
  0x3b   : > { %3127 = shalt.err (!%p3124_p2)
}
  0x3c   : > { %2921 = dma.hbm_to_vmem [thread:$0]  (!%p3312_p11), %s3980_s2, 16, %s3316_s25, [#allocation7]  }
  0x3d   : > { %s3375_s5 = sadd.s32 1, %s3228_s15   ;;  %s27_s23 = sadd.s32 1, %s3224_s14 }
  0x3e   : > { %s24_s6 = ssub.s32 %s3228_s15, %s3375_s5  ;;  %p34_p13 = scmp.ne.s32.totalorder %s3224_s14, %s3220_s13 }
  0x3f   : > { %p25_p6 = scmp.eq.s32.totalorder %s24_s6, 0  ;;  %p35_p10 = scmp.eq.s32.totalorder %s3228_s15, 0 }
  0x40   : > { %p3991_p3 = scmp.eq.s32.totalorder %s3282_s16, 1  ;;  %p2932_p7 = scmp.lt.s32.totalorder %s3228_s15, 2 }
  0x41   : > { %s3391_s10 = scalar_select %p25_p6, %s3224_s14, %s27_s23  }
  0x42   : > { %p3385_p5 = por %p3991_p3, %p34_p13  ;;  %p36_p9 = por %p35_p10, %p34_p13 }
  0x43   : > { %s156_s11 = sand.u32 1, %s3224_s14   ;;  %s2435_s25 = sshll.u32 %s3228_s15, 9 }
  0x44   : > { %s3992_s9 = scalar_select %p3385_p5, 1, 0 }
  0x45   : > { %s2311_s17 = sshll.u32 %s156_s11, 5  ;;  %s3398_s26 = scalar_lea.hbm %s3978_s0, %s2435_s25 }
  0x46   : > { %s160_s27 = scalar_lea.vmem [#allocation3], %s2311_s17  ;;  %p3402_p11 = pnand %p2932_p7, %p36_p9 }
  0x47   : > { %s167_s28 = sshll.u32 %s160_s27, 4  ;;  %s3406_s29 = scalar_lea.sflag [#allocation4], %s156_s11  ;;  %s3400_s28 = int_to_ptr.vmem [resolvable:$true] %s167_s28 }
  0x48   : > { %s3128_s30 = scalar_lea.hbm %s3398_s26, 512  ;;  %p3130_p0 = pneg %p3402_p11 }
  0x49   : > { %p3129_p12 = scmp.ne.s32.totalorder %s3398_s26, %s3128_s30  ;;  %s3133_s6 = scalar_lea.hbm %s3978_s0, 1024 }
  0x4a   : > { %p3134_p13 = scmp.lt.u32.totalorder %s3398_s26, %s3978_s0  ;;  %p3135_p6 = scmp.lt.u32.totalorder %s3133_s6, %s3128_s30 }
  0x4b   : > { %p3131_p1 = pnand %p3130_p0, %p3129_p12  ;;  %p3137_p3 = scmp.lt.u32.totalorder %s3128_s30, %s3398_s26 }
  0x4c   : > { %p3136_p10 = por %p3135_p6, %p3134_p13 }
  0x4d   : > { %p3132_p2 = pneg %p3131_p1 }
  0x4e   : > { %p3138_p7 = por %p3137_p3, %p3136_p10 }
  0x50   : > { %p3139_p9 = pnand %p3138_p7, %p3132_p2 }
  0x52   : > { %3142 = shalt.err (!%p3139_p9)
}
  0x53   : > { %s3143_s11 = scalar_lea.vmem %s3400_s28, 512  ;;  %s3234_s21 = smov [#allocation3]  }
  0x54   : > { %p3144_p12 = scmp.ne.s32.totalorder %s3400_s28, %s3143_s11  ;;  %s3148_s24 = sshll.u32 %s3234_s21, 4  ;;  %s3149_s24 = int_to_ptr.vmem [resolvable:$false] %s3148_s24 }
  0x55   : > { %s3150_s27 = scalar_lea.vmem %s3149_s24, 1024  ;;  %p3151_p4 = scmp.lt.s32.totalorder %s3400_s28, %s3149_s24 }
  0x56   : > { %p3146_p1 = pnand %p3144_p12, %p3130_p0  ;;  %p3152_p13 = scmp.lt.s32.totalorder %s3150_s27, %s3143_s11 }
  0x58   : > { %p3147_p5 = pneg %p3146_p1  ;;  %p3153_p6 = por %p3152_p13, %p3151_p4 }
  0x5a   : > { %p3154_p10 = pnand %p3153_p6, %p3147_p5 }
  0x5c   : > { %3157 = shalt.err (!%p3154_p10)
}
  0x5d   : > { %2925 = dma.hbm_to_vmem [thread:$0]  (!%p3402_p11), %s3398_s26, 512, %s3400_s28, %s3406_s29, %s3232_s7, %s3232_s7, %s3233_s8  }
  0x5e   : > { %179 = sbr.rel (%p3301_p8) target bundleno = 555 (0x22b), region = 32  ;;  %s3440_s30 = sand.u32 (!%p3301_p8), 1, %s3220_s13  }
  0x5f   : > { %s2315_s4 = sshll.u32 (!%p3301_p8), %s3440_s30, 5  ;;  %s182_s23 = scalar_lea.sflag (!%p3301_p8), [#allocation4], %s3440_s30 }
  0x60   : > { %s3446_s22 = scalar_lea.vmem (!%p3301_p8), [#allocation3], %s2315_s4  ;;  %p3994_p4 = scmp.ne.s32.totalorder (!%p3301_p8), %s3987_s18, 0 }
  0x65   : > { %3203 = dma.done.wait (%p3994_p4), %s182_s23, 512  }
  0x66   : > { %3205 = vsyncadd (%p3994_p4), %s182_s23, 4294966784  ;;  %p3995_p5 = scmp.eq.s32.totalorder %s3282_s16, 0 }
  0x68   : > { %3207 = dma.done.wait (%p3995_p5), [#allocation7], 9232   ;;  %p3996_p8 = pmov %p3995_p5 }
  0x69   : > { %v3235_v0 = vmov 0.0   ;;  %v3236_v1 = vmov 0   ;;  %vm3985_vm0 = vmmov 0   ;;  %v2977_v2 = vld [vmem:[#allocation6 + $0x40] sm:$0xff]   ;;  %v2979_v4 = vld [vmem:[#allocation6 + $0x48] sm:$0xff]   ;;  %v2981_v6 = vld [vmem:[#allocation6 + $0x50] sm:$0xff]  }
  0x6a   : > { %3209 = vsyncadd (%p3996_p8), [#allocation7], 4294958064  ;;  %2563 = vmatprep.subr.bf16.mxu0 %v3235_v0  ;;  %2599 = vmatprep.subr.bf16.mxu1 %v3235_v0  ;;  %217 = vst [vmem:[#allocation2] sm:$0xf] %v3236_v1  ;;  %v2978_v3 = vld [vmem:[#allocation6] sm:$0xff]   ;;  %v2980_v5 = vld [vmem:[#allocation6 + $0x8] sm:$0xff]  }
  0x6b   : > { %218 = vst [vmem:[#allocation2 + $0x4] sm:$0xf] %v3236_v1  ;;  %219 = vst [vmem:[#allocation2 + $0x8] sm:$0xf] %v3236_v1  ;;  %2579 = vmatprep.mubr.msk.bf16.mxu0 %vm3985_vm0, %v3235_v0  ;;  %2615 = vmatprep.mubr.msk.bf16.mxu1 %vm3985_vm0, %v3235_v0  ;;  %vm244_vm1 = vsmask.f32 7942 }
  0x6c   : > { %220 = vst [vmem:[#allocation2 + $0xc] sm:$0xf] %v3236_v1  ;;  %221 = vst [vmem:[#allocation2 + $0x10] sm:$0xf] %v3236_v1  ;;  %2564 = vmatpush3.bf16.msra.mxu0 %v2977_v2  ;;  %2600 = vmatpush3.bf16.msra.mxu1 %v2978_v3  ;;  %vm243_vm2 = vcmask 1043457   ;;  %v2982_v7 = vld [vmem:[#allocation6 + $0x10] sm:$0xff]  }
  0x6d   : > { %222 = vst [vmem:[#allocation2 + $0x14] sm:$0xf] %v3236_v1  ;;  %223 = vst [vmem:[#allocation2 + $0x18] sm:$0xf] %v3236_v1  ;;  %2565 = vmatprep.subr.bf16.mxu0 %v3235_v0  ;;  %2601 = vmatprep.subr.bf16.mxu1 %v3235_v0  ;;  %vm249_vm3 = vcmask 1041408   ;;  %v2983_v8 = vld [vmem:[#allocation6 + $0x58] sm:$0xff]  }
  0x6e   : > { %224 = vst [vmem:[#allocation2 + $0x1c] sm:$0xf] %v3236_v1  ;;  %225 = vst [vmem:[#allocation2 + $0x20] sm:$0xf] %v3236_v1  ;;  %vm250_vm4 = vsmask.f32 1280 }
  0x6f   : > { %226 = vst [vmem:[#allocation2 + $0x24] sm:$0xf] %v3236_v1  ;;  %227 = vst [vmem:[#allocation2 + $0x28] sm:$0xf] %v3236_v1  ;;  %vm268_vm5 = vsmask.f32 7946 }
  0x70   : > { %228 = vst [vmem:[#allocation2 + $0x2c] sm:$0xf] %v3236_v1  ;;  %229 = vst [vmem:[#allocation2 + $0x30] sm:$0xf] %v3236_v1  ;;  %2566 = vmatpush3.bf16.msra.mxu0 %v2979_v4  ;;  %2602 = vmatpush3.bf16.msra.mxu1 %v2980_v5  ;;  %vm267_vm6 = vcmask 1043458   ;;  %v2984_v9 = vld [vmem:[#allocation6 + $0x18] sm:$0xff]  }
  0x71   : > { %2567 = vmatprep.subr.bf16.mxu0 %v3235_v0  ;;  %2603 = vmatprep.subr.bf16.mxu1 %v3235_v0  ;;  %vm273_vm7 = vcmask 1042432   ;;  %vm274_vm8 = vsmask.f32 2304  ;;  %vm292_vm9 = vsmask.f32 7950  ;;  %v2985_v10 = vld [vmem:[#allocation6 + $0x60] sm:$0xff]   ;;  %vm3473_vm12 = vmand %vm243_vm2, %vm244_vm1 }
  0x72   : > { %vm291_vm10 = vcmask 1043459   ;;  %v2986_v11 = vld [vmem:[#allocation6 + $0x20] sm:$0xff]   ;;  %vm297_vm11 = vcmask 1043456   ;;  %vm298_vm13 = vsmask.f32 3328  ;;  %v2987_v14 = vld [vmem:[#allocation6 + $0x68] sm:$0xff]   ;;  %vm3480_vm0 = vmand %vm249_vm3, %vm250_vm4 }
  0x73   : > { %v231_v12 = vld [vmem:[%s3446_s22] sm:$0xf]  ;;  %vm314_vm14 = vsmask.f32 7938  ;;  %v2988_v15 = vld [vmem:[#allocation6 + $0x28] sm:$0xff]   ;;  %vm3488_vm1 = vmand %vm267_vm6, %vm268_vm5  ;;  %vm319_vm5 = vcmask 1040384  }
  0x74   : > { %2568 = vmatpush3.bf16.msra.mxu0 %v2981_v6  ;;  %2604 = vmatpush3.bf16.msra.mxu1 %v2982_v7  ;;  %v233_v16 = vshrl.u32 %v231_v12, 16  ;;  %v236_v17 = vshll.u32 %v231_v12, 16  ;;  %v255_v18 = vld [vmem:[%s3446_s22 + $0x4] sm:$0xf]  ;;  %vm320_vm15 = vsmask.f32 256  ;;  %vm3495_vm2 = vmand %vm291_vm10, %vm292_vm9 }
  0x75   : > { %2569 = vmatprep.subr.bf16.mxu0 %v3235_v0  ;;  %2605 = vmatprep.subr.bf16.mxu1 %v3235_v0  ;;  %v246_v19 = vld [vmem:[#allocation2 + $0x4] sm:$0xe]  ;;  %v257_v21 = vshrl.u32 %v255_v18, 16  ;;  %v260_v22 = vshll.u32 %v255_v18, 16  ;;  %v279_v23 = vld [vmem:[%s3446_s22 + $0x8] sm:$0xf]  ;;  %vm3501_vm4 = vmand %vm273_vm7, %vm274_vm8 }
  0x76   : > { %v235_v24 = vrot.slane %v233_v16, 6  ;;  %v238_v25 = vrot.slane %v236_v17, 7  ;;  %v270_v27 = vld [vmem:[#allocation2 + $0x8] sm:$0xc]  ;;  %v281_v28 = vshll.u32 %v279_v23, 16  ;;  %v284_v29 = vshrl.u32 %v279_v23, 16  ;;  %vm3518_vm6 = vmand %vm297_vm11, %vm298_vm13 }
  0x77   : > { %v252_v30 = vld [vmem:[#allocation2 + $0x8] sm:$0x3]  ;;  %v259_v31 = vrot.slane %v257_v21, 5  ;;  %v262_v32 = vrot.slane %v260_v22, 6  ;;  %v294_v34 = vld [vmem:[#allocation2 + $0xc] sm:$0x8]  ;;  %vm3527_vm8 = vmand %vm297_vm11, %vm314_vm14 }
  0x78   : > { %2570 = vmatpush3.bf16.msra.mxu0 %v2983_v8  ;;  %2606 = vmatpush3.bf16.msra.mxu1 %v2984_v9  ;;  %v239_v35 = vor.u32 %v238_v25, %v235_v24  ;;  %v283_v37 = vrot.slane %v281_v28, 5  ;;  %v2989_v38 = vld [vmem:[#allocation6 + $0x70] sm:$0xff]   ;;  %v286_v40 = vrot.slane %v284_v29, 4  ;;  %v2991_v46 = vld [vmem:[#allocation6 + $0x78] sm:$0xff]   ;;  %v303_v51 = vld [vmem:[%s3446_s22 + $0xc] sm:$0xf] }
  0x79   : > { %2571 = vmatprep.subr.bf16.mxu0 %v3235_v0  ;;  %2607 = vmatprep.subr.bf16.mxu1 %v3235_v0  ;;  %v263_v39 = vor.u32 %v262_v32, %v259_v31  ;;  %v2990_v41 = vld [vmem:[#allocation6 + $0x30] sm:$0xff]   ;;  %v300_v50 = vld [vmem:[#allocation2 + $0x10] sm:$0xf]  ;;  %v305_v54 = vshrl.u32 %v303_v51, 16  ;;  %v308_v55 = vshll.u32 %v303_v51, 16  ;;  %vm3537_vm9 = vmand %vm319_vm5, %vm320_vm15  ;;  %vm4013_vm10 = vmmov 0  }
  0x7a   : > { %v240_v42 = vrot.slane %v239_v35, 4  ;;  %v247_v43 = vsel %vm3473_vm12, %v239_v35, %v246_v19  ;;  %v276_v44 = vld [vmem:[#allocation2 + $0xc] sm:$0x7]  ;;  %v295_v45 = vsel %vm3495_vm2, %v283_v37, %v294_v34  ;;  %v287_v49 = vor.u32 %v286_v40, %v283_v37  ;;  %v2992_v56 = vld [vmem:[#allocation6 + $0x38] sm:$0xff]   ;;  %v396_v59 = vld [vmem:[#allocation2] sm:$0xf] }
  0x7b   : > { %248 = vst [vmem:[#allocation2 + $0x4] sm:$0xe] %v247_v43  ;;  %v264_v47 = vrot.slane %v263_v39, 4  ;;  %v271_v48 = vsel %vm3488_vm1, %v263_v39, %v270_v27  ;;  %296 = vst [vmem:[#allocation2 + $0xc] sm:$0x8] %v295_v45  ;;  %v307_v60 = vrot.slane %v305_v54, 7 }
  0x7c   : > { %2572 = vmatpush3.bf16.msra.mxu0 %v2985_v10  ;;  %2608 = vmatpush3.bf16.msra.mxu1 %v2986_v11  ;;  %v253_v52 = vsel %vm3480_vm0, %v240_v42, %v252_v30  ;;  %272 = vst [vmem:[#allocation2 + $0x8] sm:$0xc] %v271_v48  ;;  %v288_v58 = vrot.slane %v287_v49, 4  ;;  %v325_v62 = vld [vmem:[%s3446_s22 + $0x10] sm:$0xf]  ;;  %v2997_v6 = vld [vmem:[#allocation6 + $0xc0] sm:$0xff]  }
  0x7d   : > { %2573 = vmatprep.subr.bf16.mxu0 %v3235_v0  ;;  %2609 = vmatprep.subr.bf16.mxu1 %v3235_v0  ;;  %254 = vst [vmem:[#allocation2 + $0x8] sm:$0x3] %v253_v52  ;;  %v277_v57 = vsel %vm3501_vm4, %v264_v47, %v276_v44  ;;  %v316_v1 = vld [vmem:[#allocation2 + $0x14] sm:$0xf]  ;;  %v322_v3 = vld [vmem:[#allocation2 + $0x18] sm:$0x1]  ;;  %v310_v7 = vor.u32 %v308_v55, %v307_v60 }
  0x7e   : > { %278 = vst [vmem:[#allocation2 + $0xc] sm:$0x7] %v277_v57  ;;  %v301_v63 = vsel %vm3518_vm6, %v288_v58, %v300_v50  ;;  %v327_v4 = vshrl.u32 %v325_v62, 16  ;;  %v330_v5 = vshll.u32 %v325_v62, 16  ;;  %v311_v8 = vrot.slane %v307_v60, 4  ;;  %v3000_v32 = vld [vmem:[#allocation6 + $0xc8] sm:$0xff]  }
  0x7f   : > { %302 = vst [vmem:[#allocation2 + $0x10] sm:$0xf] %v301_v63  ;;  %v337_v9 = vld [vmem:[#allocation2 + $0x18] sm:$0xe]  ;;  %v343_v10 = vld [vmem:[%s3446_s22 + $0x14] sm:$0xf]  ;;  %v317_v17 = vsel %vm3527_vm8, %v310_v7, %v316_v1 }
  0x80   : > { %2574 = vmatpush3.bf16.msra.mxu0 %v2987_v14  ;;  %2610 = vmatpush3.bf16.msra.mxu1 %v2988_v15  ;;  %v329_v11 = vrot.slane %v327_v4, 6  ;;  %v332_v12 = vrot.slane %v330_v5, 7  ;;  %v345_v14 = vshrl.u32 %v343_v10, 16  ;;  %v348_v15 = vshll.u32 %v343_v10, 16  ;;  %v340_v19 = vld [vmem:[#allocation2 + $0x1c] sm:$0x3] }
  0x81   : > { %2575 = vmatprep.subr.bf16.mxu0 %v3235_v0  ;;  %2611 = vmatprep.subr.bf16.mxu1 %v3235_v0  ;;  %v323_v18 = vsel %vm3537_vm9, %v311_v8, %v322_v3  ;;  %318 = vst [vmem:[#allocation2 + $0x14] sm:$0xf] %v317_v17  ;;  %v355_v25 = vld [vmem:[#allocation2 + $0x1c] sm:$0xc]  ;;  %vm468_vm11 = vsmask.f32 7424 }
  0x82   : > { %v3542_v16 = vld [vmem:[#allocation2 + $0x4] sm:$0xf]  ;;  %324 = vst [vmem:[#allocation2 + $0x18] sm:$0x1] %v323_v18  ;;  %v333_v22 = vor.u32 %v332_v12, %v329_v11  ;;  %v347_v23 = vrot.slane %v345_v14, 5  ;;  %v350_v24 = vrot.slane %v348_v15, 6 }
  0x83   : > { %v2319_v21 = vcombine.low %v396_v59, %v3542_v16  ;;  %v361_v42 = vld [vmem:[%s3446_s22 + $0x18] sm:$0xf]  ;;  %v2995_v45 = vld [vmem:[#allocation6 + $0x80] sm:$0xff]   ;;  %v373_v50 = vld [vmem:[#allocation2 + $0x20] sm:$0x8]  ;;  %vm1952_vm15 = vcmask 1044480  }
  0x84   : > { %2576 = vmatpush3.bf16.msra.mxu0 %v2989_v38  ;;  %2612 = vmatpush3.bf16.msra.mxu1 %v2990_v41  ;;  %v334_v30 = vrot.slane %v333_v22, 4  ;;  %v338_v31 = vsel %vm3473_vm12, %v333_v22, %v337_v9  ;;  %v351_v34 = vor.u32 %v350_v24, %v347_v23  ;;  %v358_v41 = vld [vmem:[#allocation2 + $0x20] sm:$0x7]  ;;  %v363_v47 = vshll.u32 %v361_v42, 16  ;;  %v2999_v60 = vld [vmem:[#allocation6 + $0x90] sm:$0xff]   ;;  %v3005_v62 = vld [vmem:[#allocation6 + $0xd8] sm:$0xff]  }
  0x85   : > { %2577 = vmatprep.subr.bf16.mxu0 %v3235_v0  ;;  %2613 = vmatprep.subr.bf16.mxu1 %v3235_v0  ;;  %v3551_v27 = vld [vmem:[#allocation2 + $0x8] sm:$0xff]   ;;  %v470_v28 = vshrl.u32 %v2319_v21, 16  ;;  %v472_v29 = vshll.u32 %v2319_v21, 16  ;;  %339 = vst [vmem:[#allocation2 + $0x18] sm:$0xe] %v338_v31  ;;  %v366_v48 = vshrl.u32 %v361_v42, 16 }
  0x86   : > { %v477_v37 = vshll.u32 %v3551_v27, 16  ;;  %v341_v38 = vsel %vm3480_vm0, %v334_v30, %v340_v19  ;;  %v481_v13 = vshrl.u32 %v3551_v27, 16  ;;  %v356_v39 = vsel %vm3488_vm1, %v351_v34, %v355_v25  ;;  %v2996_v54 = vld [vmem:[#allocation6 + $0x88] sm:$0xff]   ;;  %v379_v1 = vld [vmem:[%s3446_s22 + $0x1c] sm:$0xf]  ;;  %v3007_v9 = vld [vmem:[#allocation6 + $0xe0] sm:$0xff]  }
  0x87   : > { %v474_v35 = vrot.slane %v472_v29, 1  ;;  %342 = vst [vmem:[#allocation2 + $0x1c] sm:$0x3] %v341_v38  ;;  %v352_v40 = vrot.slane %v351_v34, 4  ;;  %357 = vst [vmem:[#allocation2 + $0x1c] sm:$0xc] %v356_v39 }
  0x88   : > { %2578 = vmatpush3.bf16.msra.mxu0 %v2991_v46  ;;  %2614 = vmatpush3.bf16.msra.mxu1 %v2992_v56  ;;  %v479_v44 = vrot.slane %v477_v37, 1  ;;  %v3003_v46 = vld [vmem:[#allocation6 + $0xd0] sm:$0xff]   ;;  %v3565_v49 = vld [vmem:[#allocation2 + $0x10] sm:$0xff]   ;;  %v365_v51 = vrot.slane %v363_v47, 5  ;;  %v368_v52 = vrot.slane %v366_v48, 4  ;;  %v381_v33 = vshrl.u32 %v379_v1, 16 }
  0x89   : > { %2635 = vmatprep.subr.bf16.mxu0 %v3235_v0  ;;  %2671 = vmatprep.subr.bf16.mxu1 %v3235_v0  ;;  %v475_v43 = vor.u32 %v474_v35, %v470_v28  ;;  %v359_v20 = vsel %vm3501_vm4, %v352_v40, %v358_v41  ;;  %v485_v55 = vshll.u32 %v3565_v49, 16  ;;  %v376_v56 = vld [vmem:[#allocation2 + $0x24] sm:$0xf]  ;;  %v489_v4 = vshrl.u32 %v3565_v49, 16  ;;  %v390_v11 = vld [vmem:[#allocation2 + $0x28] sm:$0xf] }
  0x8a   : > { %360 = vst [vmem:[#allocation2 + $0x20] sm:$0x7] %v359_v20  ;;  %v483_v36 = vor.u32 %v481_v13, %v479_v44  ;;  %v369_v57 = vor.u32 %v368_v52, %v365_v51  ;;  %v374_v58 = vsel %vm3495_vm2, %v365_v51, %v373_v50  ;;  %v384_v5 = vshll.u32 %v379_v1, 16  ;;  %v3002_v14 = vld [vmem:[#allocation6 + $0x98] sm:$0xff]   ;;  %v3009_v18 = vld [vmem:[#allocation6 + $0xe8] sm:$0xff]   ;;  %v3012_v24 = vld [vmem:[#allocation6 + $0xf0] sm:$0xff]  }
  0x8b   : > { %2616 = vmatmul.mubr.bf16.vlgmr.msra.gmra.mrb[0].mxu1 %v2319_v21  ;;  %v480_v26 = vsel %vm468_vm11, %v475_v43, %v479_v44  ;;  %v487_v59 = vrot.slane %v485_v55, 1  ;;  %375 = vst [vmem:[#allocation2 + $0x20] sm:$0x8] %v374_v58  ;;  %v3590_v10 = vrot.slane %v381_v33, 7  ;;  %v3004_v21 = vld [vmem:[#allocation6 + $0xa0] sm:$0xff]   ;;  %v3008_v29 = vld [vmem:[#allocation6 + $0xa8] sm:$0xff]  }
  0x8c   : > { %2619 = vmatprep.mubr.msk.bf16.mxu1 %vm4013_vm10, %v3235_v0  ;;  %2672 = vmatpush3.bf16.msra.mxu1 %v2997_v6  ;;  %v370_v63 = vrot.slane %v369_v57, 4  ;;  %v3014_v31 = vld [vmem:[#allocation6 + $0xf8] sm:$0xff]   ;;  %v934_v34 = vld [vmem:[#allocation2 + $0x4] sm:$0xe]  ;;  %v3619_v35 = vld [vmem:[#allocation2 + $0x8] sm:$0xf] }
  0x8d   : > { %2673 = vmatprep.subr.bf16.mxu1 %v3235_v0  ;;  %2580 = vmatmul.mubr.bf16.vlgmr.msra.gmra.mrb[0].mxu0 %v480_v26  ;;  %v488_v6 = vsel %vm468_vm11, %v483_v36, %v487_v59  ;;  %v386_v15 = vor.u32 %v384_v5, %v3590_v10  ;;  %v491_v53 = vor.u32 %v489_v4, %v487_v59  ;;  %v3628_v40 = vld [vmem:[#allocation2 + $0xc] sm:$0xff]   ;;  %v387_v44 = vrot.slane %v3590_v10, 4  ;;  %v3020_v52 = vld [vmem:[#allocation6 + $0x140] sm:$0xff]   ;;  %v3032_v10 = vld [vmem:[#allocation6 + $0x168] sm:$0xff]   ;;  %s3888_s18 = scalar_lea.vmem [#allocation9], %s2315_s4  ;;  %s2445_s20 = sshll.u32 %s3282_s16, 9 }
  0x8e   : > { %2636 = vmatpush3.bf16.msra.mxu0 %v2995_v45  ;;  %2583 = vmatprep.mubr.msk.bf16.mxu0 %vm4013_vm10, %v3235_v0  ;;  %v3581_v3 = vld [vmem:[#allocation2 + $0x18] sm:$0xff]   ;;  %v377_v7 = vsel %vm3518_vm6, %v370_v63, %v376_v56  ;;  %v3626_v39 = vcombine.low %v934_v34, %v3619_v35  ;;  %v3013_v41 = vld [vmem:[#allocation6 + $0xb8] sm:$0xff]   ;;  %v765_v45 = vld [vmem:[#allocation2] sm:$0xe]  ;;  %v991_v47 = vrot.slane %v3628_v40, 1  ;;  %vm786_vm0 = vcmask 1046528   ;;  %s3928_s28 = scalar_lea.hbm %s3981_s3, %s2445_s20 }
  0x8f   : > { %2637 = vmatprep.subr.bf16.mxu0 %v3235_v0  ;;  %v493_v8 = vshll.u32 %v3581_v3, 16  ;;  %378 = vst [vmem:[#allocation2 + $0x24] sm:$0xf] %v377_v7  ;;  %v391_v17 = vsel %vm3527_vm8, %v386_v15, %v390_v11  ;;  %v497_v23 = vshrl.u32 %v3581_v3, 16  ;;  %v393_v48 = vld [vmem:[#allocation2 + $0x2c] sm:$0x1]  ;;  %v2341_v50 = vcombine.low %v765_v45, %v3542_v16 }
  0x90   : > { %2674 = vmatpush3.bf16.msra.mxu1 %v3000_v32  ;;  %392 = vst [vmem:[#allocation2 + $0x28] sm:$0xf] %v391_v17  ;;  %v3010_v32 = vld [vmem:[#allocation6 + $0xb0] sm:$0xff]   ;;  %v394_v26 = vsel %vm3537_vm9, %v387_v44, %v393_v48  ;;  %v788_v56 = vrot.slane %v3551_v27, 1  ;;  %v3023_v16 = vld [vmem:[#allocation6 + $0x148] sm:$0xff]   ;;  %v3018_v57 = vld [vmem:[#allocation6 + $0x100] sm:$0xff]  }
  0x91   : > { %2675 = vmatprep.subr.bf16.mxu1 %v3235_v0  ;;  %v495_v12 = vrot.slane %v493_v8, 1  ;;  %395 = vst [vmem:[#allocation2 + $0x2c] sm:$0x1] %v394_v26  ;;  %v787_v55 = vrot.slane %v2341_v50, 1  ;;  %v3028_v1 = vld [vmem:[#allocation6 + $0x158] sm:$0xff]   ;;  %v3022_v4 = vld [vmem:[#allocation6 + $0x110] sm:$0xff]  }
  0x92   : > { %2638 = vmatpush3.bf16.msra.mxu0 %v2996_v54  ;;  %v3646_v54 = vld [vmem:[#allocation2 + $0x14] sm:$0xff]   ;;  %v3656_v58 = vld [vmem:[#allocation2 + $0x1c] sm:$0xff]   ;;  %v792_v7 = vrot.slane %v3581_v3, 1  ;;  %v3035_v15 = vld [vmem:[#allocation6 + $0x170] sm:$0xff]   ;;  %v1171_v34 = vshll.u32 %v3628_v40, 16  ;;  %vm1369_vm12 = vcmask 1045504  }
  0x93   : > { %2620 = vmatmul.mubr.bf16.gmra.mrb[4].mxu1 %v3551_v27  ;;  %2639 = vmatprep.subr.bf16.mxu0 %v3235_v0  ;;  %v496_v19 = vsel %vm468_vm11, %v491_v53, %v495_v12  ;;  %v499_v25 = vor.u32 %v497_v23, %v495_v12  ;;  %v993_v2 = vrot.slane %v3646_v54, 1  ;;  %v789_v36 = vsel %vm786_vm0, %v787_v55, %v788_v56  ;;  %v3019_v27 = vld [vmem:[#allocation6 + $0x108] sm:$0xff]   ;;  %v3025_v8 = vld [vmem:[#allocation6 + $0x118] sm:$0xff]   ;;  %v3027_v11 = vld [vmem:[#allocation6 + $0x120] sm:$0xff]   ;;  %s2214_s7 = sshll.u32 %s3888_s18, 4  ;;  %s2201_s16 = scalar_lea.sflag [#allocation5], %s3440_s30  ;;  %s3930_s7 = int_to_ptr.vmem [resolvable:$true] %s2214_s7 }
  0x94   : > { %2623 = vmatprep.mubr.msk.bf16.mxu1 %vm4013_vm10, %v3235_v0  ;;  %2676 = vmatpush3.bf16.msra.mxu1 %v3003_v46  ;;  %v990_v46 = vrot.slane %v3626_v39, 1  ;;  %v995_v63 = vrot.slane %v3656_v58, 1  ;;  %v3031_v17 = vld [vmem:[#allocation6 + $0x128] sm:$0xff]   ;;  %vm1158_vm13 = vsmask.f32 6400  ;;  %v3039_v50 = vld [vmem:[#allocation6 + $0x180] sm:$0xff]  }
  0x95   : > { %2677 = vmatprep.subr.bf16.mxu1 %v3235_v0  ;;  %2584 = vmatmul.mubr.bf16.gmra.mrb[4].mxu0 %v488_v6  ;;  %v994_v59 = vsel %vm786_vm0, %v991_v47, %v993_v2  ;;  %v3030_v6 = vld [vmem:[#allocation6 + $0x160] sm:$0xff]   ;;  %v3043_v48 = vld [vmem:[#allocation6 + $0x1c8] sm:$0xff]   ;;  %v3045_v55 = vld [vmem:[#allocation6 + $0x1d0] sm:$0xff]   ;;  %vm1741_vm14 = vsmask.f32 5376  ;;  %vm2139_vm1 = vcmask 1046532  }
  0x96   : > { %2640 = vmatpush3.bf16.msra.mxu0 %v2999_v60  ;;  %2587 = vmatprep.mubr.msk.bf16.mxu0 %vm4013_vm10, %v3235_v0  ;;  %v3604_v22 = vld [vmem:[#allocation2 + $0x20] sm:$0xff]   ;;  %v992_v51 = vsel %vm786_vm0, %v990_v46, %v991_v47  ;;  %v3026_v60 = vld [vmem:[#allocation6 + $0x150] sm:$0xff]   ;;  %v1180_v46 = vshll.u32 %v3646_v54, 16  ;;  %v1373_v47 = vrot.slane %v3646_v54, 2  ;;  %vm3878_vm2 = vmor %vm273_vm7, %vm2139_vm1  ;;  %vm2149_vm7 = vcmask 1045508   ;;  %s3158_s29 = scalar_lea.vmem %s3930_s7, 512 }
  0x97   : > { %2641 = vmatprep.subr.bf16.mxu0 %v3235_v0  ;;  %v501_v61 = vshll.u32 %v3604_v22, 16  ;;  %v3614_v30 = vld [vmem:[#allocation2 + $0x28] ss:$0 sps:$4 sm:$0x11]   ;;  %v505_v38 = vshrl.u32 %v3604_v22, 16  ;;  %v794_v53 = vrot.slane %v3604_v22, 1  ;;  %vm3896_vm6 = vmor %vm249_vm3, %vm2149_vm7  ;;  %p3159_p11 = scmp.ne.s32.totalorder %s3930_s7, %s3158_s29 }
  0x98   : > { %2678 = vmatpush3.bf16.msra.mxu1 %v3005_v62  ;;  %v509_v13 = vshll.u32 %v3614_v30, 16  ;;  %v790_v62 = vrot.slane %v3565_v49, 1  ;;  %v3671_v5 = vld [vmem:[#allocation2 + $0x24] sm:$0xff]   ;;  %vm2160_vm4 = vcmask 1044484   ;;  %p4020_p0 = scmp.ne.s32.totalorder %s3992_s9, 0  ;;  %s3238_s6 = smov [#allocation9]  }
  0x99   : > { %2679 = vmatprep.subr.bf16.mxu1 %v3235_v0  ;;  %v503_v28 = vrot.slane %v501_v61, 1  ;;  %v795_v23 = vsel %vm786_vm0, %v792_v7, %v794_v53  ;;  %v3033_v61 = vld [vmem:[#allocation6 + $0x130] sm:$0xff]   ;;  %vm3903_vm8 = vmor %vm319_vm5, %vm2160_vm4  ;;  %s3162_s17 = sshll.u32 %s3238_s6, 4  ;;  %s3163_s17 = int_to_ptr.vmem [resolvable:$false] %s3162_s17 }
  0x9a   : > { %2642 = vmatpush3.bf16.msra.mxu0 %v3002_v14  ;;  %v511_v43 = vrot.slane %v509_v13, 1  ;;  %v791_v33 = vsel %vm786_vm0, %v788_v56, %v790_v62  ;;  %v793_v12 = vsel %vm786_vm0, %v790_v62, %v792_v7  ;;  %v3034_v14 = vld [vmem:[#allocation2 + $0x2c] ss:$0 sps:$4 sm:$0x11]   ;;  %v3040_v56 = vld [vmem:[#allocation6 + $0x188] sm:$0xff]   ;;  %p3160_p2 = pnand %p3159_p11, %p4020_p0  ;;  %s3164_s25 = scalar_lea.vmem %s3163_s17, 1024 }
  0x9b   : > { %2624 = vmatmul.mubr.bf16.gmra.mrb[8].mxu1 %v3565_v49  ;;  %2643 = vmatprep.subr.bf16.mxu0 %v3235_v0  ;;  %v504_v37 = vsel %vm468_vm11, %v499_v25, %v503_v28  ;;  %v507_v42 = vor.u32 %v505_v38, %v503_v28  ;;  %v996_v49 = vsel %vm786_vm0, %v993_v2, %v995_v63  ;;  %v1160_v25 = vshrl.u32 %v3626_v39, 16  ;;  %v3050_v7 = vld [vmem:[#allocation6 + $0x1e8] sm:$0xff]   ;;  %p3165_p7 = scmp.lt.s32.totalorder %s3930_s7, %s3163_s17  ;;  %p3166_p9 = scmp.lt.s32.totalorder %s3164_s25, %s3158_s29 }
  0x9c   : > { %2627 = vmatprep.mubr.msk.bf16.mxu1 %vm4013_vm10, %v3235_v0  ;;  %2680 = vmatpush3.bf16.msra.mxu1 %v3007_v9  ;;  %v997_v9 = vrot.slane %v3671_v5, 1  ;;  %v1186_v2 = vshrl.u32 %v3656_v58, 16  ;;  %p3161_p3 = pneg %p3160_p2 }
  0x9d   : > { %2681 = vmatprep.subr.bf16.mxu1 %v3235_v0  ;;  %2588 = vmatmul.mubr.bf16.gmra.mrb[8].mxu0 %v496_v19  ;;  %v512_v20 = vsel %vm468_vm11, %v507_v42, %v511_v43  ;;  %v3037_v19 = vld [vmem:[#allocation6 + $0x178] sm:$0xff]   ;;  %v1162_v38 = vrot.slane %v1160_v25, 1  ;;  %v3041_v43 = vld [vmem:[#allocation6 + $0x1c0] sm:$0xff]   ;;  %p3167_p12 = por %p3166_p9, %p3165_p7 }
  0x9e   : > { %2644 = vmatpush3.bf16.msra.mxu0 %v3004_v21  ;;  %2591 = vmatprep.mubr.msk.bf16.mxu0 %vm4013_vm10, %v3235_v0  ;;  %v1348_v21 = vld [vmem:[#allocation2 + $0x4] sm:$0xc] }
  0x9f   : > { %2645 = vmatprep.subr.bf16.mxu0 %v3235_v0  ;;  %v2373_v28 = vcombine.low %v1348_v21, %v3619_v35  ;;  %v1371_v35 = vrot.slane %v3628_v40, 2  ;;  %p3168_p1 = pnand %p3167_p12, %p3161_p3 }
  0xa0   : > { %2682 = vmatpush3.bf16.msra.mxu1 %v3009_v18  ;;  %v999_v18 = vrot.slane %v3034_v14, 1  ;;  %v3052_v14 = vld [vmem:[#allocation2 + $0x2c] ss:$0 sps:$4 sm:$0x33]  }
  0xa1   : > { %2683 = vmatprep.subr.bf16.mxu1 %v3235_v0  ;;  %v1204_v21 = vshrl.u32 %v3052_v14, 16 }
  0xa2   : > { %2646 = vmatpush3.bf16.msra.mxu0 %v3008_v29  ;;  %v3036_v29 = vld [vmem:[#allocation6 + $0x138] sm:$0xff]  }
  0xa3   : > { %2628 = vmatmul.mubr.bf16.gmra.mrb[12].mxu1 %v3581_v3  ;;  %2647 = vmatprep.subr.bf16.mxu0 %v3235_v0  ;;  %v998_v3 = vsel %vm786_vm0, %v995_v63, %v997_v9 }
  0xa4   : > { %2631 = vmatprep.mubr.msk.bf16.mxu1 %vm4013_vm10, %v3235_v0  ;;  %2684 = vmatpush3.bf16.msra.mxu1 %v3012_v24  ;;  %v1000_v24 = vsel %vm786_vm0, %v997_v9, %v999_v18  ;;  %v3745_v9 = vld [vmem:[#allocation2 + $0xc] sm:$0xf] }
  0xa5   : > { %2685 = vmatprep.subr.bf16.mxu1 %v3235_v0  ;;  %2592 = vmatmul.mubr.bf16.gmra.mrb[12].mxu0 %v504_v37 }
  0xa6   : > { %2595 = vmatprep.mubr.msk.bf16.mxu0 %vm4013_vm10, %v3235_v0  ;;  %2648 = vmatpush3.bf16.msra.mxu0 %v3010_v32  ;;  %v1168_v32 = vshrl.u32 %v3628_v40, 16  ;;  %v1177_v40 = vshrl.u32 %v3646_v54, 16 }
  0xa7   : > { %2649 = vmatprep.subr.bf16.mxu0 %v3235_v0 }
  0xa8   : > { %2686 = vmatpush3.bf16.msra.mxu1 %v3014_v31  ;;  %v1163_v31 = vshll.u32 %v3626_v39, 16  ;;  %v1170_v39 = vrot.slane %v1168_v32, 1  ;;  %v1179_v26 = vrot.slane %v1177_v40, 1  ;;  %v3051_v32 = vld [vmem:[#allocation6 + $0x1b0] sm:$0xff]  }
  0xa9   : > { %2743 = vmatprep.subr.bf16.mxu1 %v3235_v0 }
  0xaa   : > { %2650 = vmatpush3.bf16.msra.mxu0 %v3013_v41  ;;  %v1165_v13 = vrot.slane %v1163_v31, 2  ;;  %v1173_v41 = vrot.slane %v1171_v34, 2  ;;  %v1206_v34 = vrot.slane %v1204_v21, 1 }
  0xab   : > { %2632 = vmatmul.mubr.bf16.gmra.mrb[16].mxu1 %v3604_v22  ;;  %2707 = vmatprep.subr.bf16.mxu0 %v3235_v0  ;;  %v796_v22 = vrot.slane %v3614_v30, 1  ;;  %v1370_v30 = vrot.slane %v2373_v28, 2 }
  0xac   : > { %2687 = vmatprep.mubr.msk.bf16.mxu1 %vm4013_vm10, %v3235_v0  ;;  %v1166_v44 = vor.u32 %v1165_v13, %v1162_v38  ;;  %v1174_v45 = vor.u32 %v1173_v41, %v1170_v39  ;;  %v3769_v41 = vld [vmem:[#allocation2 + $0x18] sm:$0xff]  }
  0xad   : > { %2596 = vmatmul.mubr.bf16.gmra.mrb[16].mxu0 %v512_v20  ;;  %v797_v37 = vsel %vm786_vm0, %v794_v53, %v796_v22  ;;  %v1372_v42 = vsel %vm1369_vm12, %v1370_v30, %v1371_v35  ;;  %v3055_v22 = vld [vmem:[#allocation6 + $0x1f8] sm:$0xff]   ;;  %v1760_v40 = vshrl.u32 %v3769_v41, 16 }
  0xae   : > { %2651 = vmatprep.mubr.msk.bf16.mxu0 %vm4013_vm10, %v3235_v0  ;;  %v1175_v20 = vsel %vm1158_vm13, %v1166_v44, %v1174_v45 }
  0xb3   : > { %2688 = vmatmul.mubr.bf16.vlgmr.msra.gmra.mrb[20].mxu1 %v992_v51  ;;  %v1182_v51 = vrot.slane %v1180_v46, 2  ;;  %v1763_v46 = vshll.u32 %v3769_v41, 16 }
  0xb4   : > { %2691 = vmatprep.mubr.msk.bf16.mxu1 %vm4013_vm10, %v3235_v0  ;;  %2744 = vmatpush3.bf16.msra.mxu1 %v3020_v52  ;;  %v1374_v52 = vsel %vm1369_vm12, %v1371_v35, %v1373_v47 }
  0xb5   : > { %2745 = vmatprep.subr.bf16.mxu1 %v3235_v0  ;;  %2652 = vmatmul.mubr.bf16.vlgmr.msra.gmra.mrb[20].mxu0 %v789_v36  ;;  %v1183_v54 = vor.u32 %v1182_v51, %v1179_v26  ;;  %v1375_v36 = vrot.slane %v3656_v58, 2  ;;  %v1765_v26 = vrot.slane %v1763_v46, 3  ;;  %v3782_v51 = vld [vmem:[#allocation2 + $0x20] sm:$0xff]  }
  0xb6   : > { %2708 = vmatpush3.bf16.msra.mxu0 %v3018_v57  ;;  %2655 = vmatprep.mubr.msk.bf16.mxu0 %vm4013_vm10, %v3235_v0  ;;  %v3047_v57 = vld [vmem:[#allocation6 + $0x1d8] sm:$0xff]  }
  0xb7   : > { %2709 = vmatprep.subr.bf16.mxu0 %v3235_v0  ;;  %v1376_v63 = vsel %vm1369_vm12, %v1373_v47, %v1375_v36 }
  0xb8   : > { %2746 = vmatpush3.bf16.msra.mxu1 %v3023_v16  ;;  %v1189_v16 = vshll.u32 %v3656_v58, 16 }
  0xb9   : > { %2747 = vmatprep.subr.bf16.mxu1 %v3235_v0 }
  0xba   : > { %2710 = vmatpush3.bf16.msra.mxu0 %v3019_v27  ;;  %v1188_v27 = vrot.slane %v1186_v2, 1  ;;  %v1191_v62 = vrot.slane %v1189_v16, 2  ;;  %v1769_v2 = vshrl.u32 %v3782_v51, 16  ;;  %v1772_v16 = vshll.u32 %v3782_v51, 16 }
  0xbb   : > { %2692 = vmatmul.mubr.bf16.gmra.mrb[24].mxu1 %v994_v59  ;;  %2711 = vmatprep.subr.bf16.mxu0 %v3235_v0  ;;  %v1184_v59 = vsel %vm1158_vm13, %v1174_v45, %v1183_v54 }
  0xbc   : > { %2695 = vmatprep.mubr.msk.bf16.mxu1 %vm4013_vm10, %v3235_v0  ;;  %2748 = vmatpush3.bf16.msra.mxu1 %v3026_v60  ;;  %v3042_v60 = vld [vmem:[#allocation6 + $0x190] sm:$0xff]   ;;  %v1192_v58 = vor.u32 %v1191_v62, %v1188_v27  ;;  %v1774_v27 = vrot.slane %v1772_v16, 3 }
  0xbd   : > { %2749 = vmatprep.subr.bf16.mxu1 %v3235_v0  ;;  %2656 = vmatmul.mubr.bf16.gmra.mrb[24].mxu0 %v791_v33  ;;  %v1195_v33 = vshrl.u32 %v3671_v5, 16  ;;  %v3795_v62 = vld [vmem:[#allocation2 + $0x28] sm:$0xff]  }
  0xbe   : > { %2712 = vmatpush3.bf16.msra.mxu0 %v3022_v4  ;;  %2659 = vmatprep.mubr.msk.bf16.mxu0 %vm4013_vm10, %v3235_v0  ;;  %v3044_v4 = vld [vmem:[#allocation6 + $0x198] sm:$0xff]  }
  0xbf   : > { %2713 = vmatprep.subr.bf16.mxu0 %v3235_v0 }
  0xc0   : > { %2750 = vmatpush3.bf16.msra.mxu1 %v3028_v1  ;;  %v3048_v1 = vld [vmem:[#allocation6 + $0x1e0] sm:$0xff]  }
  0xc1   : > { %2751 = vmatprep.subr.bf16.mxu1 %v3235_v0 }
  0xc2   : > { %2714 = vmatpush3.bf16.msra.mxu0 %v3025_v8  ;;  %v1517_v8 = vld [vmem:[#allocation2 + $0x8] sm:$0xc] }
  0xc3   : > { %2696 = vmatmul.mubr.bf16.gmra.mrb[28].mxu1 %v996_v49  ;;  %2715 = vmatprep.subr.bf16.mxu0 %v3235_v0  ;;  %v1198_v49 = vshll.u32 %v3671_v5, 16  ;;  %v3751_v53 = vcombine.low %v1517_v8, %v3745_v9 }
  0xc4   : > { %2699 = vmatprep.mubr.msk.bf16.mxu1 %vm4013_vm10, %v3235_v0  ;;  %2752 = vmatpush3.bf16.msra.mxu1 %v3030_v6  ;;  %v1377_v6 = vrot.slane %v3671_v5, 2  ;;  %v3053_v5 = vld [vmem:[#allocation6 + $0x1f0] sm:$0xff]  }
  0xc5   : > { %2753 = vmatprep.subr.bf16.mxu1 %v3235_v0  ;;  %2660 = vmatmul.mubr.bf16.gmra.mrb[28].mxu0 %v793_v12  ;;  %v1197_v12 = vrot.slane %v1195_v33, 1  ;;  %v1746_v25 = vshll.u32 %v3751_v53, 16  ;;  %v1781_v33 = vshll.u32 %v3795_v62, 16 }
  0xc6   : > { %2716 = vmatpush3.bf16.msra.mxu0 %v3027_v11  ;;  %2663 = vmatprep.mubr.msk.bf16.mxu0 %vm4013_vm10, %v3235_v0  ;;  %v3046_v11 = vld [vmem:[#allocation6 + $0x1a0] sm:$0xff]  }
  0xc7   : > { %2717 = vmatprep.subr.bf16.mxu0 %v3235_v0  ;;  %v1748_v38 = vrot.slane %v1746_v25, 3 }
  0xc8   : > { %2754 = vmatpush3.bf16.msra.mxu1 %v3032_v10  ;;  %v1193_v10 = vsel %vm1158_vm13, %v1183_v54, %v1192_v58 }
  0xc9   : > { %2755 = vmatprep.subr.bf16.mxu1 %v3235_v0 }
  0xca   : > { %2718 = vmatpush3.bf16.msra.mxu0 %v3031_v17  ;;  %v3753_v17 = vld [vmem:[#allocation2 + $0x10] sm:$0xff]  }
  0xcb   : > { %2700 = vmatmul.mubr.bf16.gmra.mrb[32].mxu1 %v998_v3  ;;  %2719 = vmatprep.subr.bf16.mxu0 %v3235_v0  ;;  %v1200_v3 = vrot.slane %v1198_v49, 2  ;;  %v1751_v28 = vshrl.u32 %v3753_v17, 16 }
  0xcc   : > { %2703 = vmatprep.mubr.msk.bf16.mxu1 %vm4013_vm10, %v3235_v0  ;;  %2756 = vmatpush3.bf16.msra.mxu1 %v3035_v15  ;;  %v1378_v15 = vsel %vm1369_vm12, %v1375_v36, %v1377_v6 }
  0xcd   : > { %2757 = vmatprep.subr.bf16.mxu1 %v3235_v0  ;;  %2664 = vmatmul.mubr.bf16.gmra.mrb[32].mxu0 %v795_v23  ;;  %v1201_v18 = vor.u32 %v1200_v3, %v1197_v12  ;;  %v1207_v23 = vshll.u32 %v3052_v14, 16  ;;  %v1753_v13 = vrot.slane %v1751_v28, 2  ;;  %v1578_v12 = vrot.slane %v3782_v51, 2  ;;  %v3068_v28 = vld [vmem:[#allocation2 + $0x30] ss:$0 sps:$4 sm:$0x33]  }
  0xce   : > { %2667 = vmatprep.mubr.msk.bf16.mxu0 %vm4013_vm10, %v3235_v0  ;;  %2720 = vmatpush3.bf16.msra.mxu0 %v3033_v61  ;;  %v1379_v61 = vrot.slane %v3052_v14, 2  ;;  %v3066_v14 = vld [vmem:[#allocation6 + $0x228] sm:$0xff]  }
  0xcf   : > { %2721 = vmatprep.subr.bf16.mxu0 %v3235_v0  ;;  %v1202_v31 = vsel %vm1158_vm13, %v1192_v58, %v1201_v18  ;;  %v1209_v30 = vrot.slane %v1207_v23, 2  ;;  %v3063_v58 = vld [vmem:[#allocation6 + $0x218] sm:$0xff]  }
  0xd0   : > { %2758 = vmatpush3.bf16.msra.mxu1 %v3037_v19  ;;  %v3049_v19 = vld [vmem:[#allocation6 + $0x1a8] sm:$0xff]   ;;  %v1380_v35 = vsel %vm1369_vm12, %v1377_v6, %v1379_v61  ;;  %v1580_v61 = vrot.slane %v3795_v62, 2 }
  0xd1   : > { %2815 = vmatprep.subr.bf16.mxu1 %v3235_v0 }
  0xd2   : > { %2722 = vmatpush3.bf16.msra.mxu0 %v3036_v29  ;;  %v1754_v29 = vshll.u32 %v3753_v17, 16  ;;  %v1581_v25 = vsel %vm1369_vm12, %v1578_v12, %v1580_v61 }
  0xd3   : > { %2704 = vmatmul.mubr.bf16.gmra.mrb[36].mxu1 %v1000_v24  ;;  %2779 = vmatprep.subr.bf16.mxu0 %v3235_v0  ;;  %v1743_v24 = vshrl.u32 %v3751_v53, 16 }
  0xd4   : > { %2759 = vmatprep.mubr.msk.bf16.mxu1 %vm4013_vm10, %v3235_v0  ;;  %v1756_v39 = vrot.slane %v1754_v29, 3 }
  0xd5   : > { %2668 = vmatmul.mubr.bf16.gmra.mrb[36].mxu0 %v797_v37  ;;  %v1745_v37 = vrot.slane %v1743_v24, 2  ;;  %v3070_v24 = vld [vmem:[#allocation6 + $0x238] sm:$0xff]  }
  0xd6   : > { %2723 = vmatprep.mubr.msk.bf16.mxu0 %vm4013_vm10, %v3235_v0  ;;  %v1757_v45 = vor.u32 %v1756_v39, %v1753_v13  ;;  %v1954_v39 = vrot.slane %v3753_v17, 3 }
  0xd7   : > { %v1749_v44 = vor.u32 %v1748_v38, %v1745_v37 }
  0xdb   : > { %2760 = vmatmul.mubr.bf16.vlgmr.msra.gmra.mrb[40].mxu1 %v1372_v42  ;;  %v1210_v42 = vor.u32 %v1209_v30, %v1206_v34  ;;  %v1958_v34 = vrot.slane %v3782_v51, 3  ;;  %v1960_v30 = vrot.slane %v3795_v62, 3 }
  0xdc   : > { %2763 = vmatprep.mubr.msk.bf16.mxu1 %vm4013_vm10, %v3235_v0  ;;  %2816 = vmatpush3.bf16.msra.mxu1 %v3041_v43  ;;  %v3054_v43 = vld [vmem:[#allocation6 + $0x1b8] sm:$0xff]  }
  0xdd   : > { %2817 = vmatprep.subr.bf16.mxu1 %v3235_v0  ;;  %2724 = vmatmul.mubr.bf16.vlgmr.msra.gmra.mrb[40].mxu0 %v1175_v20  ;;  %v1211_v47 = vsel %vm1158_vm13, %v1201_v18, %v1210_v42  ;;  %v3058_v20 = vld [vmem:[#allocation6 + $0x200] sm:$0xff]   ;;  %v1961_v38 = vsel %vm1952_vm15, %v1958_v34, %v1960_v30 }
  0xde   : > { %2780 = vmatpush3.bf16.msra.mxu0 %v3039_v50  ;;  %2727 = vmatprep.mubr.msk.bf16.mxu0 %vm4013_vm10, %v3235_v0  ;;  %v1762_v50 = vrot.slane %v1760_v40, 2 }
  0xdf   : > { %2781 = vmatprep.subr.bf16.mxu0 %v3235_v0 }
  0xe0   : > { %2818 = vmatpush3.bf16.msra.mxu1 %v3043_v48  ;;  %v1758_v48 = vsel %vm1741_vm14, %v1749_v44, %v1757_v45  ;;  %v1766_v54 = vor.u32 %v1765_v26, %v1762_v50 }
  0xe1   : > { %2819 = vmatprep.subr.bf16.mxu1 %v3235_v0 }
  0xe2   : > { %2782 = vmatpush3.bf16.msra.mxu0 %v3040_v56  ;;  %v3059_v56 = vld [vmem:[#allocation6 + $0x208] sm:$0xff]  }
  0xe3   : > { %2764 = vmatmul.mubr.bf16.gmra.mrb[44].mxu1 %v1374_v52  ;;  %2783 = vmatprep.subr.bf16.mxu0 %v3235_v0  ;;  %v1573_v52 = vrot.slane %v3751_v53, 2 }
  0xe4   : > { %2767 = vmatprep.mubr.msk.bf16.mxu1 %vm4013_vm10, %v3235_v0  ;;  %2820 = vmatpush3.bf16.msra.mxu1 %v3045_v55  ;;  %v1574_v55 = vrot.slane %v3753_v17, 2 }
  0xe5   : > { %2821 = vmatprep.subr.bf16.mxu1 %v3235_v0  ;;  %2728 = vmatmul.mubr.bf16.gmra.mrb[44].mxu0 %v1184_v59  ;;  %v3061_v59 = vld [vmem:[#allocation6 + $0x210] sm:$0xff]  }
  0xe6   : > { %2784 = vmatpush3.bf16.msra.mxu0 %v3042_v60  ;;  %2731 = vmatprep.mubr.msk.bf16.mxu0 %vm4013_vm10, %v3235_v0  ;;  %v1575_v36 = vsel %vm1369_vm12, %v1573_v52, %v1574_v55  ;;  %v1771_v60 = vrot.slane %v1769_v2, 2 }
  0xe7   : > { %2785 = vmatprep.subr.bf16.mxu0 %v3235_v0 }
  0xe8   : > { %2822 = vmatpush3.bf16.msra.mxu1 %v3047_v57  ;;  %v1767_v57 = vsel %vm1741_vm14, %v1757_v45, %v1766_v54 }
  0xe9   : > { %2823 = vmatprep.subr.bf16.mxu1 %v3235_v0 }
  0xea   : > { %2786 = vmatpush3.bf16.msra.mxu0 %v3044_v4  ;;  %v1778_v4 = vshrl.u32 %v3795_v62, 16 }
  0xeb   : > { %2768 = vmatmul.mubr.bf16.gmra.mrb[48].mxu1 %v1376_v63  ;;  %2787 = vmatprep.subr.bf16.mxu0 %v3235_v0  ;;  %v1576_v63 = vrot.slane %v3769_v41, 2 }
  0xec   : > { %2771 = vmatprep.mubr.msk.bf16.mxu1 %vm4013_vm10, %v3235_v0  ;;  %2824 = vmatpush3.bf16.msra.mxu1 %v3048_v1  ;;  %v1775_v1 = vor.u32 %v1774_v27, %v1771_v60  ;;  %v1780_v8 = vrot.slane %v1778_v4, 2 }
  0xed   : > { %2825 = vmatprep.subr.bf16.mxu1 %v3235_v0  ;;  %2732 = vmatmul.mubr.bf16.gmra.mrb[48].mxu0 %v1193_v10  ;;  %v1577_v49 = vsel %vm1369_vm12, %v1574_v55, %v1576_v63  ;;  %v1783_v10 = vrot.slane %v1781_v33, 3  ;;  %v1579_v53 = vsel %vm1369_vm12, %v1576_v63, %v1578_v12 }
  0xee   : > { %2788 = vmatpush3.bf16.msra.mxu0 %v3046_v11  ;;  %2735 = vmatprep.mubr.msk.bf16.mxu0 %vm4013_vm10, %v3235_v0  ;;  %v1776_v6 = vsel %vm1741_vm14, %v1766_v54, %v1775_v1  ;;  %v3810_v11 = vld [vmem:[#allocation2 + $0x30] ss:$0 sps:$4 sm:$0x77]  }
  0xef   : > { %2789 = vmatprep.subr.bf16.mxu0 %v3235_v0  ;;  %v1784_v3 = vor.u32 %v1783_v10, %v1780_v8  ;;  %v1962_v42 = vrot.slane %v3810_v11, 3 }
  0xf0   : > { %2826 = vmatpush3.bf16.msra.mxu1 %v3050_v7  ;;  %v3064_v7 = vld [vmem:[#allocation6 + $0x220] sm:$0xff]  }
  0xf1   : > { %2827 = vmatprep.subr.bf16.mxu1 %v3235_v0  ;;  %v1785_v18 = vsel %vm1741_vm14, %v1775_v1, %v1784_v3  ;;  %v1963_v44 = vsel %vm1952_vm15, %v1960_v30, %v1962_v42 }
  0xf2   : > { %2790 = vmatpush3.bf16.msra.mxu0 %v3049_v19  ;;  %v3067_v19 = vld [vmem:[#allocation6 + $0x230] sm:$0xff]  }
  0xf3   : > { %2772 = vmatmul.mubr.bf16.gmra.mrb[52].mxu1 %v1378_v15  ;;  %2791 = vmatprep.subr.bf16.mxu0 %v3235_v0  ;;  %v1787_v15 = vshrl.u32 %v3810_v11, 16 }
  0xf4   : > { %2775 = vmatprep.mubr.msk.bf16.mxu1 %vm4013_vm10, %v3235_v0  ;;  %2828 = vmatpush3.bf16.msra.mxu1 %v3053_v5  ;;  %v1790_v5 = vshll.u32 %v3810_v11, 16 }
  0xf5   : > { %2829 = vmatprep.subr.bf16.mxu1 %v3235_v0  ;;  %2736 = vmatmul.mubr.bf16.gmra.mrb[52].mxu0 %v1202_v31  ;;  %v1789_v21 = vrot.slane %v1787_v15, 2  ;;  %v1582_v31 = vrot.slane %v3068_v28, 2 }
  0xf6   : > { %2739 = vmatprep.mubr.msk.bf16.mxu0 %vm4013_vm10, %v3235_v0  ;;  %2792 = vmatpush3.bf16.msra.mxu0 %v3051_v32  ;;  %v1792_v23 = vrot.slane %v1790_v5, 3  ;;  %v1931_v32 = vld [vmem:[#allocation2 + $0x8] sm:$0x8] }
  0xf7   : > { %2793 = vmatprep.subr.bf16.mxu0 %v3235_v0  ;;  %v2405_v37 = vcombine.low %v1931_v32, %v3745_v9  ;;  %v1956_v9 = vrot.slane %v3769_v41, 3 }
  0xf8   : > { %2830 = vmatpush3.bf16.msra.mxu1 %v3055_v22  ;;  %v1793_v22 = vor.u32 %v1792_v23, %v1789_v21 }
  0xf9   : > { %2887 = vmatprep.subr.bf16.mxu1 %v3235_v0  ;;  %v1953_v13 = vrot.slane %v2405_v37, 3  ;;  %v1957_v45 = vsel %vm1952_vm15, %v1954_v39, %v1956_v9  ;;  %v1959_v17 = vsel %vm1952_vm15, %v1956_v9, %v1958_v34 }
  0xfa   : > { %2794 = vmatpush3.bf16.msra.mxu0 %v3054_v43  ;;  %v1794_v29 = vsel %vm1741_vm14, %v1784_v3, %v1793_v22 }
  0xfb   : > { %2776 = vmatmul.mubr.bf16.gmra.mrb[56].mxu1 %v1380_v35  ;;  %2851 = vmatprep.subr.bf16.mxu0 %v3235_v0  ;;  %v1583_v35 = vsel %vm1369_vm12, %v1580_v61, %v1582_v31  ;;  %v1955_v43 = vsel %vm1952_vm15, %v1953_v13, %v1954_v39 }
  0xfc   : > { %2831 = vmatprep.mubr.msk.bf16.mxu1 %vm4013_vm10, %v3235_v0 }
  0xfd   : > { %2740 = vmatmul.mubr.bf16.gmra.mrb[56].mxu0 %v1211_v47 }
  0xfe   : > { %2795 = vmatprep.mubr.msk.bf16.mxu0 %vm4013_vm10, %v3235_v0 }
 0x103   : > { %2832 = vmatmul.mubr.bf16.vlgmr.msra.gmra.mrb[60].mxu1 %v1758_v48 }
 0x104   : > { %2835 = vmatprep.mubr.msk.bf16.mxu1 %vm4013_vm10, %v3235_v0  ;;  %2895 = vmatpush3.bf16.msra.mxu1 %v3058_v20 }
 0x105   : > { %2888 = vmatprep.subr.bf16.mxu1 %v3235_v0  ;;  %2796 = vmatmul.mubr.bf16.vlgmr.msra.gmra.mrb[60].mxu0 %v1575_v36 }
 0x106   : > { %2852 = vmatpush3.bf16.msra.mxu0 %v3058_v20  ;;  %2799 = vmatprep.mubr.msk.bf16.mxu0 %vm4013_vm10, %v3235_v0 }
 0x107   : > { %2853 = vmatprep.subr.bf16.mxu0 %v3235_v0 }
 0x108   : > { %2896 = vmatpush3.bf16.msra.mxu1 %v3059_v56 }
 0x109   : > { %2889 = vmatprep.subr.bf16.mxu1 %v3235_v0 }
 0x10a   : > { %2854 = vmatpush3.bf16.msra.mxu0 %v3059_v56 }
 0x10b   : > { %2836 = vmatmul.mubr.bf16.gmra.mrb[64].mxu1 %v1767_v57  ;;  %2855 = vmatprep.subr.bf16.mxu0 %v3235_v0 }
 0x10c   : > { %2839 = vmatprep.mubr.msk.bf16.mxu1 %vm4013_vm10, %v3235_v0  ;;  %2897 = vmatpush3.bf16.msra.mxu1 %v3061_v59 }
 0x10d   : > { %2890 = vmatprep.subr.bf16.mxu1 %v3235_v0  ;;  %2800 = vmatmul.mubr.bf16.gmra.mrb[64].mxu0 %v1577_v49 }
 0x10e   : > { %2856 = vmatpush3.bf16.msra.mxu0 %v3061_v59  ;;  %2803 = vmatprep.mubr.msk.bf16.mxu0 %vm4013_vm10, %v3235_v0 }
 0x10f   : > { %2857 = vmatprep.subr.bf16.mxu0 %v3235_v0 }
 0x110   : > { %2898 = vmatpush3.bf16.msra.mxu1 %v3063_v58 }
 0x111   : > { %2891 = vmatprep.subr.bf16.mxu1 %v3235_v0 }
 0x112   : > { %2858 = vmatpush3.bf16.msra.mxu0 %v3063_v58 }
 0x113   : > { %2840 = vmatmul.mubr.bf16.gmra.mrb[68].mxu1 %v1776_v6  ;;  %2859 = vmatprep.subr.bf16.mxu0 %v3235_v0 }
 0x114   : > { %2843 = vmatprep.mubr.msk.bf16.mxu1 %vm4013_vm10, %v3235_v0  ;;  %2899 = vmatpush3.bf16.msra.mxu1 %v3064_v7 }
 0x115   : > { %2892 = vmatprep.subr.bf16.mxu1 %v3235_v0  ;;  %2804 = vmatmul.mubr.bf16.gmra.mrb[68].mxu0 %v1579_v53 }
 0x116   : > { %2860 = vmatpush3.bf16.msra.mxu0 %v3064_v7  ;;  %2807 = vmatprep.mubr.msk.bf16.mxu0 %vm4013_vm10, %v3235_v0 }
 0x117   : > { %2861 = vmatprep.subr.bf16.mxu0 %v3235_v0 }
 0x118   : > { %2900 = vmatpush3.bf16.msra.mxu1 %v3066_v14 }
 0x119   : > { %2893 = vmatprep.subr.bf16.mxu1 %v3235_v0 }
 0x11a   : > { %2862 = vmatpush3.bf16.msra.mxu0 %v3066_v14 }
 0x11b   : > { %2844 = vmatmul.mubr.bf16.gmra.mrb[72].mxu1 %v1785_v18  ;;  %2863 = vmatprep.subr.bf16.mxu0 %v3235_v0 }
 0x11c   : > { %2847 = vmatprep.mubr.msk.bf16.mxu1 %vm4013_vm10, %v3235_v0  ;;  %2901 = vmatpush3.bf16.msra.mxu1 %v3067_v19 }
 0x11d   : > { %2894 = vmatprep.subr.bf16.mxu1 %v3235_v0  ;;  %2808 = vmatmul.mubr.bf16.gmra.mrb[72].mxu0 %v1581_v25 }
 0x11e   : > { %2811 = vmatprep.mubr.msk.bf16.mxu0 %vm4013_vm10, %v3235_v0  ;;  %2864 = vmatpush3.bf16.msra.mxu0 %v3067_v19 }
 0x11f   : > { %2865 = vmatprep.subr.bf16.mxu0 %v3235_v0 }
 0x120   : > { %2902 = vmatpush3.bf16.msra.mxu1 %v3070_v24 }
 0x122   : > { %2866 = vmatpush3.bf16.msra.mxu0 %v3070_v24 }
 0x123   : > { %2848 = vmatmul.mubr.bf16.gmra.mrb[76].mxu1 %v1794_v29 }
 0x124   : > { %2879 = vmatprep.mubr.msk.bf16.mxu1 %vm4013_vm10, %v3235_v0 }
 0x125   : > { %2812 = vmatmul.mubr.bf16.gmra.mrb[76].mxu0 %v1583_v35 }
 0x126   : > { %2867 = vmatprep.mubr.msk.bf16.mxu0 %vm4013_vm10, %v3235_v0 }
 0x12b   : > { %2880 = vmatmul.mubr.bf16.vlgmr.msra.gmra.mrb[80].mxu1 %v1961_v38 }
 0x12c   : > { %2883 = vmatprep.mubr.msk.bf16.mxu1 %vm4013_vm10, %v3235_v0 }
 0x12d   : > { %2868 = vmatmul.mubr.bf16.vlgmr.msra.gmra.mrb[80].mxu0 %v1955_v43 }
 0x12e   : > { %2871 = vmatprep.mubr.msk.bf16.mxu0 %vm4013_vm10, %v3235_v0 }
 0x133   : > { %2884 = vmatmul.mubr.bf16.gmra.mrb[84].mxu1 %v1963_v44 }
 0x135   : > { %2872 = vmatmul.mubr.bf16.gmra.mrb[84].mxu0 %v1957_v45 }
 0x136   : > { %2875 = vmatprep.mubr.msk.bf16.mxu0 %vm4013_vm10, %v3235_v0 }
 0x13d   : > { %2876 = vmatmul.mubr.bf16.gmra.mrb[88].mxu0 %v1959_v17 }
 0x15e   : > { %v726_v40 = vpop.f32.mrb[0].mxu1 }
 0x15f   : > { %v2617_v46 = vpop.f32.mrb[1].mxu1 }
 0x160   : > { %v729_v47 = vpop.f32.mrb[2].mxu1  ;;  %v600_v20 = vpop.f32.mrb[0].mxu0 }
 0x161   : > { %v2618_v48 = vpop.f32.mrb[3].mxu1  ;;  %v727_v50 = vadd.f32 %v726_v40, %v600_v20  ;;  %v2581_v26 = vpop.f32.mrb[1].mxu0 }
 0x162   : > { %v603_v51 = vpop.f32.mrb[2].mxu0 }
 0x163   : > { %v730_v41 = vadd.f32 %v729_v47, %v603_v51  ;;  %v2582_v55 = vpop.f32.mrb[3].mxu0 }
 0x166   : > { %v734_v52 = vpop.f32.mrb[4].mxu1 }
 0x167   : > { %v2621_v56 = vpop.f32.mrb[5].mxu1 }
 0x168   : > { %v737_v54 = vpop.f32.mrb[6].mxu1  ;;  %v608_v16 = vpop.f32.mrb[4].mxu0 }
 0x169   : > { %v2622_v2 = vpop.f32.mrb[7].mxu1  ;;  %v735_v36 = vadd.f32 %v734_v52, %v608_v16  ;;  %v2585_v0 = vpop.f32.mrb[5].mxu0 }
 0x16a   : > { %v611_v57 = vpop.f32.mrb[6].mxu0 }
 0x16b   : > { %v738_v60 = vadd.f32 %v737_v54, %v611_v57  ;;  %v2586_v27 = vpop.f32.mrb[7].mxu0 }
 0x16e   : > { %v742_v59 = vpop.f32.mrb[8].mxu1 }
 0x16f   : > { %v2625_v62 = vpop.f32.mrb[9].mxu1 }
 0x170   : > { %v745_v63 = vpop.f32.mrb[10].mxu1  ;;  %v616_v58 = vpop.f32.mrb[8].mxu0 }
 0x171   : > { %v2626_v1 = vpop.f32.mrb[11].mxu1  ;;  %v743_v4 = vadd.f32 %v742_v59, %v616_v58  ;;  %v2589_v33 = vpop.f32.mrb[9].mxu0 }
 0x172   : > { %v619_v49 = vpop.f32.mrb[10].mxu0 }
 0x173   : > { %v746_v7 = vadd.f32 %v745_v63, %v619_v49  ;;  %v2590_v8 = vpop.f32.mrb[11].mxu0 }
 0x176   : > { %v750_v6 = vpop.f32.mrb[12].mxu1 }
 0x177   : > { %v2629_v10 = vpop.f32.mrb[13].mxu1 }
 0x178   : > { %v753_v11 = vpop.f32.mrb[14].mxu1  ;;  %v624_v3 = vpop.f32.mrb[12].mxu0 }
 0x179   : > { %v2630_v12 = vpop.f32.mrb[15].mxu1  ;;  %v751_v14 = vadd.f32 %v750_v6, %v624_v3  ;;  %v2593_v15 = vpop.f32.mrb[13].mxu0 }
 0x17a   : > { %v627_v5 = vpop.f32.mrb[14].mxu0 }
 0x17b   : > { %v754_v18 = vadd.f32 %v753_v11, %v627_v5  ;;  %v2594_v19 = vpop.f32.mrb[15].mxu0 }
 0x17e   : > { %v758_v53 = vpop.f32.mrb[16].mxu1 }
 0x17f   : > { %v2633_v21 = vpop.f32.mrb[17].mxu1 }
 0x180   : > { %v761_v23 = vpop.f32.mrb[18].mxu1  ;;  %v632_v22 = vpop.f32.mrb[16].mxu0 }
 0x181   : > { %v2634_v61 = vpop.f32.mrb[19].mxu1  ;;  %v759_v24 = vadd.f32 %v758_v53, %v632_v22  ;;  %v2597_v25 = vpop.f32.mrb[17].mxu0 }
 0x182   : > { %v635_v28 = vpop.f32.mrb[18].mxu0 }
 0x183   : > { %v762_v31 = vadd.f32 %v761_v23, %v635_v28  ;;  %v2598_v32 = vpop.f32.mrb[19].mxu0 }
 0x186   : > { %v1088_v29 = vpop.f32.mrb[20].mxu1 }
 0x187   : > { %v2689_v34 = vpop.f32.mrb[21].mxu1 }
 0x188   : > { %v1091_v30 = vpop.f32.mrb[22].mxu1  ;;  %v885_v37 = vpop.f32.mrb[20].mxu0 }
 0x189   : > { %v2690_v35 = vpop.f32.mrb[23].mxu1  ;;  %v924_v38 = vadd.f32 %v885_v37, %v727_v50  ;;  %v2653_v13 = vpop.f32.mrb[21].mxu0 }
 0x18a   : > { %v888_v39 = vpop.f32.mrb[22].mxu0 }
 0x18b   : > { %v925_v43 = vadd.f32 %v888_v39, %v730_v41  ;;  %v1127_v44 = vadd.f32 %v1088_v29, %v924_v38  ;;  %v2654_v9 = vpop.f32.mrb[23].mxu0 }
 0x18d   : > { %v1128_v40 = vadd.f32 %v1091_v30, %v925_v43 }
 0x18e   : > { %v1096_v42 = vpop.f32.mrb[24].mxu1 }
 0x18f   : > { %v2693_v45 = vpop.f32.mrb[25].mxu1 }
 0x190   : > { %v1099_v17 = vpop.f32.mrb[26].mxu1  ;;  %v893_v47 = vpop.f32.mrb[24].mxu0 }
 0x191   : > { %v2694_v46 = vpop.f32.mrb[27].mxu1  ;;  %v926_v48 = vadd.f32 %v893_v47, %v735_v36  ;;  %v2657_v20 = vpop.f32.mrb[25].mxu0 }
 0x192   : > { %v896_v26 = vpop.f32.mrb[26].mxu0 }
 0x193   : > { %v927_v52 = vadd.f32 %v896_v26, %v738_v60  ;;  %v1129_v55 = vadd.f32 %v1096_v42, %v926_v48  ;;  %v2658_v56 = vpop.f32.mrb[27].mxu0 }
 0x195   : > { %v1130_v2 = vadd.f32 %v1099_v17, %v927_v52 }
 0x196   : > { %v1104_v51 = vpop.f32.mrb[28].mxu1 }
 0x197   : > { %v2697_v54 = vpop.f32.mrb[29].mxu1 }
 0x198   : > { %v1107_v50 = vpop.f32.mrb[30].mxu1  ;;  %v901_v0 = vpop.f32.mrb[28].mxu0 }
 0x199   : > { %v2698_v16 = vpop.f32.mrb[31].mxu1  ;;  %v928_v41 = vadd.f32 %v901_v0, %v743_v4  ;;  %v2661_v57 = vpop.f32.mrb[29].mxu0 }
 0x19a   : > { %v904_v59 = vpop.f32.mrb[30].mxu0 }
 0x19b   : > { %v929_v62 = vadd.f32 %v904_v59, %v746_v7  ;;  %v1131_v63 = vadd.f32 %v1104_v51, %v928_v41  ;;  %v2662_v1 = vpop.f32.mrb[31].mxu0 }
 0x19d   : > { %v1132_v33 = vadd.f32 %v1107_v50, %v929_v62 }
 0x19e   : > { %v1112_v27 = vpop.f32.mrb[32].mxu1 }
 0x19f   : > { %v2701_v58 = vpop.f32.mrb[33].mxu1 }
 0x1a0   : > { %v1115_v36 = vpop.f32.mrb[34].mxu1  ;;  %v909_v6 = vpop.f32.mrb[32].mxu0 }
 0x1a1   : > { %v2702_v49 = vpop.f32.mrb[35].mxu1  ;;  %v930_v60 = vadd.f32 %v909_v6, %v751_v14  ;;  %v2665_v8 = vpop.f32.mrb[33].mxu0 }
 0x1a2   : > { %v912_v10 = vpop.f32.mrb[34].mxu0 }
 0x1a3   : > { %v931_v12 = vadd.f32 %v912_v10, %v754_v18  ;;  %v1133_v3 = vadd.f32 %v1112_v27, %v930_v60  ;;  %v2666_v15 = vpop.f32.mrb[35].mxu0 }
 0x1a5   : > { %v1134_v53 = vadd.f32 %v1115_v36, %v931_v12 }
 0x1a6   : > { %v1120_v11 = vpop.f32.mrb[36].mxu1 }
 0x1a7   : > { %v2705_v5 = vpop.f32.mrb[37].mxu1 }
 0x1a8   : > { %v1123_v4 = vpop.f32.mrb[38].mxu1  ;;  %v917_v21 = vpop.f32.mrb[36].mxu0 }
 0x1a9   : > { %v2706_v19 = vpop.f32.mrb[39].mxu1  ;;  %v932_v7 = vadd.f32 %v917_v21, %v759_v24  ;;  %v2669_v23 = vpop.f32.mrb[37].mxu0 }
 0x1aa   : > { %v920_v61 = vpop.f32.mrb[38].mxu0 }
 0x1ab   : > { %v933_v25 = vadd.f32 %v920_v61, %v762_v31  ;;  %v1135_v28 = vadd.f32 %v1120_v11, %v932_v7  ;;  %v2670_v29 = vpop.f32.mrb[39].mxu0 }
 0x1ad   : > { %v1136_v34 = vadd.f32 %v1123_v4, %v933_v25 }
 0x1ae   : > { %v1468_v22 = vpop.f32.mrb[40].mxu1 }
 0x1af   : > { %v2761_v32 = vpop.f32.mrb[41].mxu1 }
 0x1b0   : > { %v1471_v14 = vpop.f32.mrb[42].mxu1  ;;  %v1299_v35 = vpop.f32.mrb[40].mxu0 }
 0x1b1   : > { %v2762_v30 = vpop.f32.mrb[43].mxu1  ;;  %v1338_v18 = vadd.f32 %v1299_v35, %v1127_v44  ;;  %v2725_v37 = vpop.f32.mrb[41].mxu0 }
 0x1b2   : > { %v1302_v38 = vpop.f32.mrb[42].mxu0 }
 0x1b3   : > { %v1339_v39 = vadd.f32 %v1302_v38, %v1128_v40  ;;  %v1507_v42 = vadd.f32 %v1468_v22, %v1338_v18  ;;  %v2726_v43 = vpop.f32.mrb[43].mxu0 }
 0x1b5   : > { %v1508_v45 = vadd.f32 %v1471_v14, %v1339_v39 }
 0x1b6   : > { %v1476_v13 = vpop.f32.mrb[44].mxu1 }
 0x1b7   : > { %v2765_v9 = vpop.f32.mrb[45].mxu1 }
 0x1b8   : > { %v1479_v24 = vpop.f32.mrb[46].mxu1  ;;  %v1307_v46 = vpop.f32.mrb[44].mxu0 }
 0x1b9   : > { %v2766_v17 = vpop.f32.mrb[47].mxu1  ;;  %v1340_v31 = vadd.f32 %v1307_v46, %v1129_v55  ;;  %v2729_v47 = vpop.f32.mrb[45].mxu0 }
 0x1ba   : > { %v1310_v48 = vpop.f32.mrb[46].mxu0 }
 0x1bb   : > { %v1341_v26 = vadd.f32 %v1310_v48, %v1130_v2  ;;  %v1509_v51 = vadd.f32 %v1476_v13, %v1340_v31  ;;  %v2730_v52 = vpop.f32.mrb[47].mxu0 }
 0x1bd   : > { %v1510_v54 = vadd.f32 %v1479_v24, %v1341_v26 }
 0x1be   : > { %v1484_v20 = vpop.f32.mrb[48].mxu1 }
 0x1bf   : > { %v2769_v56 = vpop.f32.mrb[49].mxu1 }
 0x1c0   : > { %v1487_v44 = vpop.f32.mrb[50].mxu1  ;;  %v1315_v16 = vpop.f32.mrb[48].mxu0 }
 0x1c1   : > { %v2770_v50 = vpop.f32.mrb[51].mxu1  ;;  %v1342_v40 = vadd.f32 %v1315_v16, %v1131_v63  ;;  %v2733_v0 = vpop.f32.mrb[49].mxu0 }
 0x1c2   : > { %v1318_v41 = vpop.f32.mrb[50].mxu0 }
 0x1c3   : > { %v1343_v59 = vadd.f32 %v1318_v41, %v1132_v33  ;;  %v1511_v27 = vadd.f32 %v1484_v20, %v1342_v40  ;;  %v2734_v62 = vpop.f32.mrb[51].mxu0 }
 0x1c5   : > { %v1512_v58 = vadd.f32 %v1487_v44, %v1343_v59 }
 0x1c6   : > { %v1492_v57 = vpop.f32.mrb[52].mxu1 }
 0x1c7   : > { %v2773_v1 = vpop.f32.mrb[53].mxu1 }
 0x1c8   : > { %v1495_v55 = vpop.f32.mrb[54].mxu1  ;;  %v1323_v49 = vpop.f32.mrb[52].mxu0 }
 0x1c9   : > { %v2774_v36 = vpop.f32.mrb[55].mxu1  ;;  %v1344_v2 = vadd.f32 %v1323_v49, %v1133_v3  ;;  %v2737_v6 = vpop.f32.mrb[53].mxu0 }
 0x1ca   : > { %v1326_v60 = vpop.f32.mrb[54].mxu0 }
 0x1cb   : > { %v1345_v10 = vadd.f32 %v1326_v60, %v1134_v53  ;;  %v1513_v11 = vadd.f32 %v1492_v57, %v1344_v2  ;;  %v2738_v12 = vpop.f32.mrb[55].mxu0 }
 0x1cd   : > { %v1514_v5 = vadd.f32 %v1495_v55, %v1345_v10 }
 0x1ce   : > { %v1500_v8 = vpop.f32.mrb[56].mxu1 }
 0x1cf   : > { %v2777_v15 = vpop.f32.mrb[57].mxu1 }
 0x1d0   : > { %v1503_v63 = vpop.f32.mrb[58].mxu1  ;;  %v1331_v19 = vpop.f32.mrb[56].mxu0 }
 0x1d1   : > { %v2778_v4 = vpop.f32.mrb[59].mxu1  ;;  %v1346_v33 = vadd.f32 %v1331_v19, %v1135_v28  ;;  %v2741_v21 = vpop.f32.mrb[57].mxu0 }
 0x1d2   : > { %v1334_v7 = vpop.f32.mrb[58].mxu0  ;;  %v3871_v21 = vld [vmem:[#allocation8] ss:$0 sm:$0xff] }
 0x1d3   : > { %v1347_v61 = vadd.f32 %v1334_v7, %v1136_v34  ;;  %v1515_v22 = vadd.f32 %v1500_v8, %v1346_v33  ;;  %v2742_v25 = vpop.f32.mrb[59].mxu0 }
 0x1d5   : > { %v1516_v32 = vadd.f32 %v1503_v63, %v1347_v61 }
 0x1d6   : > { %v1882_v23 = vpop.f32.mrb[60].mxu1 }
 0x1d7   : > { %v2833_v29 = vpop.f32.mrb[61].mxu1 }
 0x1d8   : > { %v1885_v3 = vpop.f32.mrb[62].mxu1  ;;  %v1671_v30 = vpop.f32.mrb[60].mxu0 }
 0x1d9   : > { %v2834_v14 = vpop.f32.mrb[63].mxu1  ;;  %v1710_v53 = vadd.f32 %v1671_v30, %v1507_v42  ;;  %v2797_v35 = vpop.f32.mrb[61].mxu0 }
 0x1da   : > { %v1674_v18 = vpop.f32.mrb[62].mxu0 }
 0x1db   : > { %v1711_v38 = vadd.f32 %v1674_v18, %v1508_v45  ;;  %v1921_v13 = vadd.f32 %v1882_v23, %v1710_v53  ;;  %v2798_v39 = vpop.f32.mrb[63].mxu0 }
 0x1dd   : > { %v3861_v9 = vadd.f32 %v1885_v3, %v1711_v38 }
 0x1de   : > { %v1890_v37 = vpop.f32.mrb[64].mxu1 }
 0x1df   : > { %v2837_v43 = vpop.f32.mrb[65].mxu1 }
 0x1e0   : > { %v1893_v28 = vpop.f32.mrb[66].mxu1  ;;  %v1679_v34 = vpop.f32.mrb[64].mxu0 }
 0x1e1   : > { %v2838_v24 = vpop.f32.mrb[67].mxu1  ;;  %v1712_v17 = vadd.f32 %v1679_v34, %v1509_v51  ;;  %v2801_v46 = vpop.f32.mrb[65].mxu0 }
 0x1e2   : > { %v1682_v31 = vpop.f32.mrb[66].mxu0 }
 0x1e3   : > { %v1713_v48 = vadd.f32 %v1682_v31, %v1510_v54  ;;  %v3863_v20 = vadd.f32 %v1890_v37, %v1712_v17  ;;  %v2802_v42 = vpop.f32.mrb[67].mxu0 }
 0x1e5   : > { %v3865_v56 = vadd.f32 %v1893_v28, %v1713_v48 }
 0x1e6   : > { %v1898_v47 = vpop.f32.mrb[68].mxu1 }
 0x1e7   : > { %v2841_v26 = vpop.f32.mrb[69].mxu1 }
 0x1e8   : > { %v1901_v52 = vpop.f32.mrb[70].mxu1  ;;  %v1687_v44 = vpop.f32.mrb[68].mxu0 }
 0x1e9   : > { %v2842_v45 = vpop.f32.mrb[71].mxu1  ;;  %v1714_v50 = vadd.f32 %v1687_v44, %v1511_v27  ;;  %v2805_v16 = vpop.f32.mrb[69].mxu0 }
 0x1ea   : > { %v1690_v40 = vpop.f32.mrb[70].mxu0 }
 0x1eb   : > { %v1715_v41 = vadd.f32 %v1690_v40, %v1512_v58  ;;  %v3867_v57 = vadd.f32 %v1898_v47, %v1714_v50  ;;  %v2806_v51 = vpop.f32.mrb[71].mxu0 }
 0x1ed   : > { %v3869_v54 = vadd.f32 %v1901_v52, %v1715_v41 }
 0x1ee   : > { %v1906_v0 = vpop.f32.mrb[72].mxu1 }
 0x1ef   : > { %v2845_v59 = vpop.f32.mrb[73].mxu1 }
 0x1f0   : > { %v1909_v62 = vpop.f32.mrb[74].mxu1  ;;  %v1695_v55 = vpop.f32.mrb[72].mxu0 }
 0x1f1   : > { %v2846_v1 = vpop.f32.mrb[75].mxu1  ;;  %v1716_v36 = vadd.f32 %v1695_v55, %v1513_v11  ;;  %v2809_v49 = vpop.f32.mrb[73].mxu0 }
 0x1f2   : > { %v1698_v2 = vpop.f32.mrb[74].mxu0 }
 0x1f3   : > { %v1717_v60 = vadd.f32 %v1698_v2, %v1514_v5  ;;  %v1927_v8 = vadd.f32 %v1906_v0, %v1716_v36  ;;  %v2810_v27 = vpop.f32.mrb[75].mxu0 }
 0x1f5   : > { %v1928_v15 = vadd.f32 %v1909_v62, %v1717_v60 }
 0x1f6   : > { %v1914_v6 = vpop.f32.mrb[76].mxu1 }
 0x1f7   : > { %v2849_v10 = vpop.f32.mrb[77].mxu1 }
 0x1f8   : > { %v1917_v12 = vpop.f32.mrb[78].mxu1  ;;  %v1703_v63 = vpop.f32.mrb[76].mxu0 }
 0x1f9   : > { %v2850_v58 = vpop.f32.mrb[79].mxu1  ;;  %v1718_v4 = vadd.f32 %v1703_v63, %v1515_v22  ;;  %v2813_v19 = vpop.f32.mrb[77].mxu0 }
 0x1fa   : > { %v1706_v33 = vpop.f32.mrb[78].mxu0 }
 0x1fb   : > { %v1719_v23 = vadd.f32 %v1706_v33, %v1516_v32  ;;  %v1929_v61 = vadd.f32 %v1914_v6, %v1718_v4  ;;  %v2814_v11 = vpop.f32.mrb[79].mxu0 }
 0x1fd   : > { %v1930_v5 = vadd.f32 %v1917_v12, %v1719_v23 }
 0x1fe   : > { %v2075_v7 = vpop.f32.mrb[80].mxu1 }
 0x1ff   : > { %v2096_v25 = vadd.f32 %v2075_v7, %v1927_v8  ;;  %v2881_v29 = vpop.f32.mrb[81].mxu1 }
 0x200   : > { %v2078_v3 = vpop.f32.mrb[82].mxu1  ;;  %v2051_v22 = vpop.f32.mrb[80].mxu0 }
 0x201   : > { %v2113_v14 = vadd.f32 %v3871_v21, %v2096_v25  ;;  %v2097_v30 = vadd.f32 %v2078_v3, %v1928_v15  ;;  %v2882_v53 = vpop.f32.mrb[83].mxu1  ;;  %v2090_v37 = vadd.f32 %v2051_v22, %v1921_v13  ;;  %v2869_v39 = vpop.f32.mrb[81].mxu0 }
 0x202   : > { %v2054_v32 = vpop.f32.mrb[82].mxu0 }
 0x203   : > { %v2123_v35 = vmax.f32 %v2113_v14, 0.0  ;;  %v2114_v18 = vadd.f32 %v3871_v21, %v2097_v30  ;;  %v2107_v24 = vadd.f32 %v3871_v21, %v2090_v37  ;;  %v2091_v34 = vadd.f32 %v2054_v32, %v3861_v9  ;;  %v2870_v46 = vpop.f32.mrb[83].mxu0 }
 0x205   : > { %v2441_v38 = vpack.c.bf16 %v2123_v35, %v2123_v35  ;;  %v2124_v43 = vmax.f32 %v2114_v18, 0.0  ;;  %v2108_v26 = vadd.f32 %v3871_v21, %v2091_v34  ;;  %v2117_v9 = vmax.f32 %v2107_v24, 0.0 }
 0x206   : > { %v2083_v28 = vpop.f32.mrb[84].mxu1 }
 0x207   : > { %v2442_v17 = vpack.c.bf16 %v2124_v43, %v2124_v43  ;;  %v2885_v31 = vpop.f32.mrb[85].mxu1  ;;  %v2098_v13 = vadd.f32 %v2083_v28, %v1929_v61  ;;  %v2425_v42 = vrot.slane %v2441_v38, 9  ;;  %v2118_v16 = vmax.f32 %v2108_v26, 0.0 }
 0x208   : > { %v2086_v48 = vpop.f32.mrb[86].mxu1  ;;  %v2059_v0 = vpop.f32.mrb[84].mxu0 }
 0x209   : > { %v2179_v52 = vrot.slane %v2442_v17, 5  ;;  %v2886_v45 = vpop.f32.mrb[87].mxu1  ;;  %v2115_v44 = vadd.f32 %v3871_v21, %v2098_v13  ;;  %v2099_v50 = vadd.f32 %v2086_v48, %v1930_v5  ;;  %v2127_v59 = vpack.c.bf16 %v2118_v16, %v2117_v9  ;;  %v2873_v1 = vpop.f32.mrb[85].mxu0 }
 0x20a   : > { %v2092_v62 = vadd.f32 %v2059_v0, %v3863_v20  ;;  %v2062_v36 = vpop.f32.mrb[86].mxu0  ;;  %v2427_v27 = vrot.slane %v2442_v17, 10  ;;  %v2436_v12 = vpack.c.bf16 %v2118_v16, %v2118_v16 }
 0x20b   : > { %v2180_v40 = vsel %vm3878_vm2, %v2425_v42, %v2179_v52  ;;  %v2125_v41 = vmax.f32 %v2115_v44, 0.0  ;;  %v2116_v51 = vadd.f32 %v3871_v21, %v2099_v50  ;;  %2132 = vst [vmem:[%s3888_s18] sm:$0xf] %v2127_v59  ;;  %v2093_v60 = vadd.f32 %v2062_v36, %v3865_v56  ;;  %v2874_v8 = vpop.f32.mrb[87].mxu0 }
 0x20c   : > { %2182 = vst [vmem:[%s3888_s18 + $0x14] sm:$0xf] %v2180_v40  ;;  %v2109_v2 = vadd.f32 %v3871_v21, %v2092_v62  ;;  %v2417_v11 = vrot.slane %v2436_v12, 9 }
 0x20d   : > { %v2443_v55 = vpack.c.bf16 %v2125_v41, %v2125_v41  ;;  %v2126_v49 = vmax.f32 %v2116_v51, 0.0  ;;  %v2110_v58 = vadd.f32 %v3871_v21, %v2093_v60 }
 0x20e   : > { %v2119_v15 = vmax.f32 %v2109_v2, 0.0 }
 0x20f   : > { %v2188_v10 = vrot.slane %v2443_v55, 6  ;;  %v2444_v20 = vpack.c.bf16 %v2126_v49, %v2126_v49  ;;  %v2429_v19 = vrot.slane %v2443_v55, 11  ;;  %v2120_v7 = vmax.f32 %v2110_v58, 0.0 }
 0x210   : > { %v2437_v56 = vpack.c.bf16 %v2119_v15, %v2119_v15  ;;  %v2067_v61 = vpop.f32.mrb[88].mxu0 }
 0x211   : > { %v2189_v4 = vsel %vm3896_vm6, %v2427_v27, %v2188_v10  ;;  %v2196_v33 = vrot.slane %v2444_v20, 7  ;;  %v2438_v29 = vpack.c.bf16 %v2120_v7, %v2120_v7  ;;  %v2094_v3 = vadd.f32 %v2067_v61, %v3867_v57  ;;  %v2877_v5 = vpop.f32.mrb[89].mxu0 }
 0x212   : > { %2191 = vst [vmem:[%s3888_s18 + $0x18] sm:$0xf] %v2189_v4  ;;  %v2143_v25 = vrot.slane %v2437_v56, 5  ;;  %v2070_v14 = vpop.f32.mrb[90].mxu0  ;;  %v2419_v53 = vrot.slane %v2437_v56, 10 }
 0x213   : > { %v2197_v23 = vsel %vm3903_vm8, %v2429_v19, %v2196_v33  ;;  %v2153_v35 = vrot.slane %v2438_v29, 6  ;;  %v2111_v18 = vadd.f32 %v3871_v21, %v2094_v3  ;;  %v2878_v22 = vpop.f32.mrb[91].mxu0  ;;  %v2095_v37 = vadd.f32 %v2070_v14, %v3869_v54 }
 0x214   : > { %2199 = vst [vmem:[%s3888_s18 + $0x1c] sm:$0xf] %v2197_v23  ;;  %v2144_v30 = vsel %vm3878_vm2, %v2417_v11, %v2143_v25  ;;  %v2421_v28 = vrot.slane %v2438_v29, 11 }
 0x215   : > { %2146 = vst [vmem:[%s3888_s18 + $0x4] sm:$0xf] %v2144_v30  ;;  %v2154_v38 = vsel %vm3896_vm6, %v2419_v53, %v2153_v35  ;;  %v2121_v57 = vmax.f32 %v2111_v18, 0.0  ;;  %v2112_v39 = vadd.f32 %v3871_v21, %v2095_v37 }
 0x216   : > { %2156 = vst [vmem:[%s3888_s18 + $0x8] sm:$0xf] %v2154_v38 }
 0x217   : > { %v2439_v43 = vpack.c.bf16 %v2121_v57, %v2121_v57  ;;  %v2122_v32 = vmax.f32 %v2112_v39, 0.0 }
 0x219   : > { %v2164_v24 = vrot.slane %v2439_v43, 7  ;;  %v2440_v54 = vpack.c.bf16 %v2122_v32, %v2122_v32 }
 0x21b   : > { %v2165_v21 = vsel %vm3903_vm8, %v2421_v28, %v2164_v24  ;;  %2171 = vst [vmem:[%s3888_s18 + $0x10] sm:$0xf] %v2440_v54 }
 0x21c   : > { %2167 = vst [vmem:[%s3888_s18 + $0xc] sm:$0xf] %v2165_v21 }
 0x21d   : > { %3171 = shalt.err (!%p3168_p1)
}
 0x21e   : > { %s3172_s11 = scalar_lea.hbm %s3928_s28, 512  ;;  %s3176_s27 = scalar_lea.hbm %s3981_s3, 1024 }
 0x21f   : > { %p3173_p13 = scmp.ne.s32.totalorder %s3928_s28, %s3172_s11  ;;  %p3177_p4 = scmp.lt.u32.totalorder %s3928_s28, %s3981_s3 }
 0x220   : > { %p3178_p5 = scmp.lt.u32.totalorder %s3176_s27, %s3172_s11  ;;  %p3180_p11 = scmp.lt.u32.totalorder %s3172_s11, %s3928_s28 }
 0x221   : > { %p3174_p6 = pnand %p3173_p13, %p4020_p0 }
 0x222   : > { %p3179_p8 = por %p3178_p5, %p3177_p4 }
 0x223   : > { %p3175_p10 = pneg %p3174_p6 }
 0x224   : > { %p3181_p2 = por %p3180_p11, %p3179_p8 }
 0x226   : > { %p3182_p3 = pnand %p3181_p2, %p3175_p10 }
 0x228   : > { %3185 = shalt.err (!%p3182_p3)
}
 0x229   : > { %s3239_s22 = smov 64   ;;  %s3240_s18 = smov 4  }
 0x22a   : > { %2913 = dma.vmem_to_hbm [thread:$0]  (%p4020_p0), %s3930_s7, 512, %s3928_s28, %s2201_s16, %s3239_s22, %s3239_s22, %s3240_s18  }
 0x22b PF: > { %s2229_s20 = sand.u32 1, %s3216_s12   ;;  %p4021_p7 = scmp.ne.s32.totalorder %s3988_s19, 0 }
 0x22c   : > { %p4022_p9 = scmp.ge.s32.totalorder %s3228_s15, 2  ;;  %s2230_s8 = scalar_lea.sflag [#allocation5], %s2229_s20 }
 0x22e   : > { %p2927_p12 = pnand %p4022_p9, %p4021_p7 }
 0x230   : > { %3211 = dma.done.wait (!%p2927_p12), %s2230_s8, 512  }
 0x231   : > { %3213 = vsyncadd (!%p2927_p12), %s2230_s8, 4294966784  ;;  %p17_p1 = scmp.ge.s32.totalorder %s3375_s5, 4   ;;  %s4023_s12 = smov %s3220_s13 }
 0x232   : > { %s4024_s13 = smov %s3224_s14  ;;  %s4025_s14 = smov %s3391_s10 }
 0x233   : > { %s4026_s15 = smov %s3375_s5  ;;  %19 = sbr.rel (!%p17_p1) target bundleno = 6 (0x6), region = 93 }
 0x23a   :  { %2235 = vsyncpa [#allocation4], 1 }
 0x23b   :  { %2237 = vsyncpa [#allocation4 + $0x1], 1 }
 0x23c   :  { %2238 = vsyncpa [#allocation7], 1 }
 0x23d   :  { %2239 = vsyncpa [#allocation5], 1 }
 0x23e   :  { %2241 = vsyncpa [#allocation5 + $0x1], 1 }

</bundles_post_ra>
